<compile_context>
chip_gen: v5e
topology: v5e:2x2
jax: 0.10.0
libtpu: 0.0.40
codegen_flags: <defaults>
</compile_context>

<pallas_src>
import jax
import jax.numpy as jnp
from jax.experimental import pallas as pl
from jax.experimental.pallas import tpu as pltpu

K = 4            # conv kernel size
STRIDE = 2
PAD = 1          # get_pad(256,5,2)==get_pad(128,5,2)==get_pad(64,5,2)==get_pad(4,5,2)==1
NEG_SLOPE = 0.2  # LeakyReLU slope used by SNConvWithActivation
CHANNELS = (4, 16, 32, 64, 64)
_TAPS = ((0, 0), (0, 1), (1, 0), (1, 1))   # (ay, ax); tap index t = ay*2 + ax


# ----------------------------------------------------------------------------
# Kernel helpers
# ----------------------------------------------------------------------------
def _conv4x4_s2(q, w_ref, b_ref, ho, wo):
    """k=4/s=2 conv of a parity-packed padded input + bias + LeakyReLU(0.2).

    q     : (hn, wn, 4*cin) bf16 value;  q[r, s, (pr*2+pc)*cin + c] = x_pad[2r+pr, 2s+pc, c]
    w_ref : (4, 4*cin, cout) bf16;       w_ref[ay*2+ax, (pr*2+pc)*cin + c, :] = W[2ay+pr, 2ax+pc, c, :]
    b_ref : (1, cout) f32
    returns (ho*wo, cout) f32 with rows in (oy, ox) row-major order.
    """
    c4 = q.shape[-1]
    acc = None
    for t, (ay, ax) in enumerate(_TAPS):
        # Unit-stride static slice -> one matmul per 2x2 tap (no lane-axis concat at all).
        tap = q[ay:ay + ho, ax:ax + wo, :].reshape(ho * wo, c4)
        d = jnp.dot(tap, w_ref[t], preferred_element_type=jnp.float32)
        acc = d if acc is None else acc + d
    acc = acc + b_ref[...]
    return jnp.maximum(acc, NEG_SLOPE * acc)           # LeakyReLU(0.2), f32


def _scatter_parity(y_flat, ho, wo, qn_ref):
    """Write this layer's output y into the NEXT layer's padded parity-packed scratch."""
    hn, wn, c4n = qn_ref.shape
    cout = c4n // 4
    ho2, wo2 = ho // 2, wo // 2
    dt = qn_ref.dtype

    # Zero ONLY the 1-pixel padding border; the interior is fully overwritten below.
    # This runs every grid step on purpose (scratch is per-TensorCore under "parallel").
    zrow = jnp.zeros((1, wn, c4n), dt)
    zcol = jnp.zeros((hn, 1, c4n), dt)
    qn_ref[0:1, :, :] = zrow
    qn_ref[hn - 1:hn, :, :] = zrow
    qn_ref[:, 0:1, :] = zcol
    qn_ref[:, wn - 1:wn, :] = zcol

    # Plane (pr, pc) of the next padded input holds y[2r + pr - 1, 2s + pc - 1]
    # (the -1 is the next layer's zero padding, already present from the border zeroing).
    # TODO(synk): if the bundle dump shows this small-dim reshape as a relayout on the
    # critical path, switch to a y scratch + strided ref loads (pl.ds(..., stride=2)).
    ys = y_flat.astype(dt).reshape(ho2, 2, wo2, 2, cout)
    qn_ref[1:hn, 1:wn, 0:cout] = ys[:, 1, :, 1, :]                 # plane (pr=0, pc=0)
    qn_ref[1:hn, 0:wo2, cout:2 * cout] = ys[:, 1, :, 0, :]         # plane (0, 1)
    qn_ref[0:ho2, 1:wn, 2 * cout:3 * cout] = ys[:, 0, :, 1, :]     # plane (1, 0)
    qn_ref[0:ho2, 0:wo2, 3 * cout:4 * cout] = ys[:, 0, :, 0, :]    # plane (1, 1)


def _make_kernel(out_hw):
    """out_hw: static (h_i, w_i) output sizes of layers 1..4."""
    def kernel(q1_ref, w1, b1, w2, b2, w3, b3, w4, b4, out_ref,
               q2_ref, q3_ref, q4_ref):
        layers = ((w1, b1), (w2, b2), (w3, b3), (w4, b4))
        nxt = (q2_ref, q3_ref, q4_ref)
        q = q1_ref[0]                                   # (hn1, wn1, 16) bf16
        for i, (w_ref, b_ref) in enumerate(layers):
            ho, wo = out_hw[i]
            y = _conv4x4_s2(q, w_ref, b_ref, ho, wo)    # (ho*wo, cout) f32
            if i < 3:
                _scatter_parity(y, ho, wo, nxt[i])
                q = nxt[i][...]
            else:
                # torch x.view(N, -1) on NCHW == channel-major flatten; emit it
                # lane-dense and in final layout directly from the kernel.
                out_ref[...] = (jnp.transpose(y, (1, 0))
                                .reshape(1, 1, -1).astype(out_ref.dtype))
    return kernel


# ----------------------------------------------------------------------------
# Wrapper
# ----------------------------------------------------------------------------
def _full_spec(arr):
    nd = arr.ndim
    return pl.BlockSpec(arr.shape, lambda b, _nd=nd: (0,) * _nd)


def _round_up(x, m):
    return -(-x // m) * m


def _padded_bytes(shape, dtype):
    """Approximate Mosaic (sublane, lane) padded size of a VMEM-resident array."""
    item = jnp.dtype(dtype).itemsize
    dims = list(shape)
    dims[-1] = _round_up(dims[-1], 128)
    if len(dims) >= 2:
        dims[-2] = _round_up(dims[-2], 32 // item)
    total = item
    for d in dims:
        total *= d
    return total


def deepfill_discriminator_s(img, mask, params):
    """img: (N, 3, H, W), mask: (N, 1, H, W), NCHW f32 -> (N, 64 * H/16 * W/16)."""
    n, ci, h, w = img.shape
    assert ci == 3 and mask.shape == (n, 1, h, w)
    assert h % 16 == 0 and w % 16 == 0, "spatial dims must be multiples of 16"

    cin0 = CHANNELS[0]
    hn1, wn1 = (h + 2 * PAD) // 2, (w + 2 * PAD) // 2

    # ---- input prep, all hoisted to XLA: concat + pad + 2x2 space-to-depth + bf16 ----
    x = jnp.concatenate([img, mask], axis=1)                  # (N, 4, H, W)
    x = jnp.transpose(x, (0, 2, 3, 1))                        # NHWC
    x = jnp.pad(x, ((0, 0), (PAD, PAD), (PAD, PAD), (0, 0)))
    q1 = x.reshape(n, hn1, 2, wn1, 2, cin0)
    q1 = jnp.transpose(q1, (0, 1, 3, 2, 4, 5)).reshape(n, hn1, wn1, 4 * cin0)
    q1 = q1.astype(jnp.bfloat16)

    # ---- layer geometry (static) ----
    out_hw, hh, ww = [], h, w
    for _ in range(4):
        hh, ww = hh // 2, ww // 2
        out_hw.append((hh, ww))
    h4, w4 = out_hw[-1]
    c4 = CHANNELS[-1]

    # ---- weights: parity-packed + bf16, all done in the wrapper ----
    args = [q1]
    in_specs = [pl.BlockSpec((1, hn1, wn1, 4 * cin0), lambda b: (b, 0, 0, 0))]
    for i in range(4):
        w_hwio, bias = params[f"layer{i + 1}"]
        cin, cout = CHANNELS[i], CHANNELS[i + 1]
        w6 = w_hwio.reshape(2, 2, 2, 2, cin, cout)            # (ay, pr, ax, pc, ci, co)
        w_par = jnp.transpose(w6, (0, 2, 1, 3, 4, 5)).reshape(4, 4 * cin, cout)
        w_par = w_par.astype(jnp.bfloat16)
        b2d = bias.reshape(1, cout).astype(jnp.float32)
        args += [w_par, b2d]
        in_specs += [_full_spec(w_par), _full_spec(b2d)]

    # VMEM scratch: parity-packed padded inputs of layers 2..4 (bf16).
    scratch_dims, scratch_shapes = [], []
    for i in range(3):
        ho, wo = out_hw[i]
        sdim = (ho // 2 + 1, wo // 2 + 1, 4 * CHANNELS[i + 1])
        scratch_dims.append(sdim)
        scratch_shapes.append(pltpu.VMEM(sdim, jnp.bfloat16))

    # ---- explicit VMEM budget ----
    est = 2 * _padded_bytes((1, hn1, wn1, 4 * cin0), jnp.bfloat16)   # double-buffered input
    est += 2 * _padded_bytes((1, 1, c4 * h4 * w4), jnp.float32)      # double-buffered output
    for a in args[1:]:
        est += 2 * _padded_bytes(a.shape, a.dtype)                   # weights / biases
    for sdim in scratch_dims:
        est += _padded_bytes(sdim, jnp.bfloat16)
    vmem_limit = min(100 << 20, max(32 << 20, int(1.5 * est) + (4 << 20)))

    out = pl.pallas_call(
        _make_kernel(tuple(out_hw)),
        out_shape=jax.ShapeDtypeStruct((n, 1, c4 * h4 * w4), jnp.float32),
        grid=(n,),
        in_specs=in_specs,
        out_specs=pl.BlockSpec((1, 1, c4 * h4 * w4), lambda b: (b, 0, 0)),
        scratch_shapes=scratch_shapes,
        compiler_params=pltpu.CompilerParams(
            dimension_semantics=("parallel",),
            vmem_limit_bytes=vmem_limit),
    )(*args)
    return out.reshape(n, -1)     # metadata-only reshape; layout already final


# ----------------------------------------------------------------------------
# Parameters (deterministic init + spectral normalisation of the conv weights)
# ----------------------------------------------------------------------------
def _spectral_normalize(wmat, n_iter=10, eps=1e-12):
    # TODO(synk): PyTorch's spectral_norm keeps a persistent `u` and does one power
    # iteration per forward; here a fixed power iteration computes weight / sigma_max
    # as wrapper-side weight preprocessing (same steady-state result).
    u = jnp.full((wmat.shape[-1],), 1.0, wmat.dtype)
    u = u / jnp.linalg.norm(u)
    v = wmat @ u
    for _ in range(n_iter):
        v = wmat @ u
        v = v / (jnp.linalg.norm(v) + eps)
        u = wmat.T @ v
        u = u / (jnp.linalg.norm(u) + eps)
    sigma = v @ (wmat @ u)
    return wmat / sigma


def make_params(key):
    params = {}
    for i in range(4):
        cin, cout = CHANNELS[i], CHANNELS[i + 1]
        key, kw, kb = jax.random.split(key, 3)
        bound = 1.0 / (cin * K * K) ** 0.5
        w = jax.random.uniform(kw, (K, K, cin, cout), jnp.float32, -bound, bound)
        b = jax.random.uniform(kb, (1, cout), jnp.float32, -bound, bound)
        wmat = _spectral_normalize(w.reshape(K * K * cin, cout))
        params[f"layer{i + 1}"] = (wmat.reshape(K, K, cin, cout), b)
    return params


# ----------------------------------------------------------------------------
# Pure-JAX reference (mirrors the kernel's bf16 operand / f32 accumulation scheme)
# ----------------------------------------------------------------------------
def _reference_forward(img, mask, params):
    x = jnp.concatenate([img, mask], axis=1)
    x = jnp.transpose(x, (0, 2, 3, 1)).astype(jnp.bfloat16)
    y = None
    for i in range(4):
        w_hwio, bias = params[f"layer{i + 1}"]
        y = jax.lax.conv_general_dilated(
            x, w_hwio.astype(jnp.bfloat16),
            window_strides=(STRIDE, STRIDE),
            padding=((PAD, PAD), (PAD, PAD)),
            dimension_numbers=("NHWC", "HWIO", "NHWC"),
            preferred_element_type=jnp.float32)
        y = y + bias.reshape(1, 1, 1, -1)
        y = jnp.maximum(y, NEG_SLOPE * y)
        x = y.astype(jnp.bfloat16)
    y = jnp.transpose(y, (0, 3, 1, 2))
    return y.reshape(y.shape[0], -1)


if __name__ == "__main__":
    key = jax.random.PRNGKey(0)
    k_img, k_mask, k_p = jax.random.split(key, 3)

    n, h, w = 2, 16, 16
    img = jax.random.normal(k_img, (n, 3, h, w), jnp.float32)
    mask = (jax.random.uniform(k_mask, (n, 1, h, w)) > 0.5).astype(jnp.float32)
    params = make_params(k_p)

    fwd = jax.jit(lambda a, b: deepfill_discriminator_s(a, b, params))
    y = fwd(img, mask)
    jax.block_until_ready(y)

    expected_shape = (n, CHANNELS[-1] * (h // 16) * (w // 16))
    assert y.shape == expected_shape, y.shape
    assert bool(jnp.all(jnp.isfinite(y)))

    y_ref = jax.jit(lambda a, b: _reference_forward(a, b, params))(img, mask)
    err = float(jnp.max(jnp.abs(y - y_ref)))
    assert bool(jnp.allclose(y, y_ref, atol=1e-2, rtol=1e-2)), err

    print("KERNEL_OK")
</pallas_src>

<mosaic_0001>
module attributes {stable_mosaic.version = 11 : i64} {
  func.func @kernel(%arg0: i32, %arg1: memref<1x9x9x16xbf16, #tpu.memory_space<vmem>>, %arg2: memref<4x16x16xbf16, #tpu.memory_space<vmem>>, %arg3: memref<1x16xf32, #tpu.memory_space<vmem>>, %arg4: memref<4x64x32xbf16, #tpu.memory_space<vmem>>, %arg5: memref<1x32xf32, #tpu.memory_space<vmem>>, %arg6: memref<4x128x64xbf16, #tpu.memory_space<vmem>>, %arg7: memref<1x64xf32, #tpu.memory_space<vmem>>, %arg8: memref<4x256x64xbf16, #tpu.memory_space<vmem>>, %arg9: memref<1x64xf32, #tpu.memory_space<vmem>>, %arg10: memref<1x1x64xf32, #tpu.memory_space<vmem>>, %arg11: memref<5x5x64xbf16, #tpu.memory_space<vmem>>, %arg12: memref<3x3x128xbf16, #tpu.memory_space<vmem>>, %arg13: memref<2x2x256xbf16, #tpu.memory_space<vmem>>) attributes {dimension_semantics = [#tpu.dimension_semantics<parallel>], iteration_bounds = array<i64: 2>, scalar_prefetch = 0 : i64, scratch_operands = 3 : i64, tpu.core_type = #tpu.core_type<tc>, window_params = [{transform_indices = @transform_0, window_bounds = array<i64: 1, 9, 9, 16>}, {pipeline_mode = #tpu.pipeline_mode<synchronous>, transform_indices = @transform_1, window_bounds = array<i64: 4, 16, 16>}, {pipeline_mode = #tpu.pipeline_mode<synchronous>, transform_indices = @transform_2, window_bounds = array<i64: 1, 16>}, {pipeline_mode = #tpu.pipeline_mode<synchronous>, transform_indices = @transform_3, window_bounds = array<i64: 4, 64, 32>}, {pipeline_mode = #tpu.pipeline_mode<synchronous>, transform_indices = @transform_4, window_bounds = array<i64: 1, 32>}, {pipeline_mode = #tpu.pipeline_mode<synchronous>, transform_indices = @transform_5, window_bounds = array<i64: 4, 128, 64>}, {pipeline_mode = #tpu.pipeline_mode<synchronous>, transform_indices = @transform_6, window_bounds = array<i64: 1, 64>}, {pipeline_mode = #tpu.pipeline_mode<synchronous>, transform_indices = @transform_7, window_bounds = array<i64: 4, 256, 64>}, {pipeline_mode = #tpu.pipeline_mode<synchronous>, transform_indices = @transform_8, window_bounds = array<i64: 1, 64>}, {transform_indices = @transform_9, window_bounds = array<i64: 1, 1, 64>}]} {
    %c0 = arith.constant 0 : index
    %c0_0 = arith.constant 0 : index
    %c0_1 = arith.constant 0 : index
    %c0_2 = arith.constant 0 : index
    %0 = vector.load %arg1[%c0, %c0_0, %c0_1, %c0_2] : memref<1x9x9x16xbf16, #tpu.memory_space<vmem>>, vector<1x9x9x16xbf16>
    %1 = vector.shape_cast %0 : vector<1x9x9x16xbf16> to vector<9x9x16xbf16>
    %2 = vector.extract_strided_slice %1 {offsets = [0, 0, 0], sizes = [8, 8, 16], strides = [1, 1, 1]} : vector<9x9x16xbf16> to vector<8x8x16xbf16>
    %3 = vector.shape_cast %2 : vector<8x8x16xbf16> to vector<64x16xbf16>
    %c0_3 = arith.constant 0 : index
    %c0_4 = arith.constant 0 : index
    %c0_5 = arith.constant 0 : index
    %4 = vector.load %arg2[%c0_3, %c0_4, %c0_5] : memref<4x16x16xbf16, #tpu.memory_space<vmem>>, vector<1x16x16xbf16>
    %5 = vector.shape_cast %4 : vector<1x16x16xbf16> to vector<16x16xbf16>
    %cst = arith.constant dense<0.000000e+00> : vector<64x16xf32>
    %6 = tpu.matmul %3, %5, %cst {dimension_numbers = #tpu.dot_dimension_numbers<[1], [0], [0], [1], [0, 0, 1, 1], [], []>} : vector<64x16xbf16>, vector<16x16xbf16>, vector<64x16xf32> -> vector<64x16xf32>
    %7 = vector.extract_strided_slice %1 {offsets = [0, 1, 0], sizes = [8, 8, 16], strides = [1, 1, 1]} : vector<9x9x16xbf16> to vector<8x8x16xbf16>
    %8 = vector.shape_cast %7 : vector<8x8x16xbf16> to vector<64x16xbf16>
    %c1 = arith.constant 1 : index
    %c0_6 = arith.constant 0 : index
    %c0_7 = arith.constant 0 : index
    %9 = vector.load %arg2[%c1, %c0_6, %c0_7] : memref<4x16x16xbf16, #tpu.memory_space<vmem>>, vector<1x16x16xbf16>
    %10 = vector.shape_cast %9 : vector<1x16x16xbf16> to vector<16x16xbf16>
    %cst_8 = arith.constant dense<0.000000e+00> : vector<64x16xf32>
    %11 = tpu.matmul %8, %10, %cst_8 {dimension_numbers = #tpu.dot_dimension_numbers<[1], [0], [0], [1], [0, 0, 1, 1], [], []>} : vector<64x16xbf16>, vector<16x16xbf16>, vector<64x16xf32> -> vector<64x16xf32>
    %12 = arith.addf %6, %11 : vector<64x16xf32>
    %13 = vector.extract_strided_slice %1 {offsets = [1, 0, 0], sizes = [8, 8, 16], strides = [1, 1, 1]} : vector<9x9x16xbf16> to vector<8x8x16xbf16>
    %14 = vector.shape_cast %13 : vector<8x8x16xbf16> to vector<64x16xbf16>
    %c2 = arith.constant 2 : index
    %c0_9 = arith.constant 0 : index
    %c0_10 = arith.constant 0 : index
    %15 = vector.load %arg2[%c2, %c0_9, %c0_10] : memref<4x16x16xbf16, #tpu.memory_space<vmem>>, vector<1x16x16xbf16>
    %16 = vector.shape_cast %15 : vector<1x16x16xbf16> to vector<16x16xbf16>
    %cst_11 = arith.constant dense<0.000000e+00> : vector<64x16xf32>
    %17 = tpu.matmul %14, %16, %cst_11 {dimension_numbers = #tpu.dot_dimension_numbers<[1], [0], [0], [1], [0, 0, 1, 1], [], []>} : vector<64x16xbf16>, vector<16x16xbf16>, vector<64x16xf32> -> vector<64x16xf32>
    %18 = arith.addf %12, %17 : vector<64x16xf32>
    %19 = vector.extract_strided_slice %1 {offsets = [1, 1, 0], sizes = [8, 8, 16], strides = [1, 1, 1]} : vector<9x9x16xbf16> to vector<8x8x16xbf16>
    %20 = vector.shape_cast %19 : vector<8x8x16xbf16> to vector<64x16xbf16>
    %c3 = arith.constant 3 : index
    %c0_12 = arith.constant 0 : index
    %c0_13 = arith.constant 0 : index
    %21 = vector.load %arg2[%c3, %c0_12, %c0_13] : memref<4x16x16xbf16, #tpu.memory_space<vmem>>, vector<1x16x16xbf16>
    %22 = vector.shape_cast %21 : vector<1x16x16xbf16> to vector<16x16xbf16>
    %cst_14 = arith.constant dense<0.000000e+00> : vector<64x16xf32>
    %23 = tpu.matmul %20, %22, %cst_14 {dimension_numbers = #tpu.dot_dimension_numbers<[1], [0], [0], [1], [0, 0, 1, 1], [], []>} : vector<64x16xbf16>, vector<16x16xbf16>, vector<64x16xf32> -> vector<64x16xf32>
    %24 = arith.addf %18, %23 : vector<64x16xf32>
    %c0_15 = arith.constant 0 : index
    %c0_16 = arith.constant 0 : index
    %25 = vector.load %arg3[%c0_15, %c0_16] : memref<1x16xf32, #tpu.memory_space<vmem>>, vector<1x16xf32>
    %26 = vector.broadcast %25 : vector<1x16xf32> to vector<64x16xf32>
    %27 = arith.addf %24, %26 : vector<64x16xf32>
    %cst_17 = arith.constant 2.000000e-01 : f32
    %28 = vector.broadcast %cst_17 : f32 to vector<64x16xf32>
    %29 = arith.mulf %28, %27 : vector<64x16xf32>
    %30 = arith.maximumf %27, %29 : vector<64x16xf32>
    %cst_18 = arith.constant 0.000000e+00 : bf16
    %31 = vector.broadcast %cst_18 : bf16 to vector<1x5x64xbf16>
    %cst_19 = arith.constant 0.000000e+00 : bf16
    %32 = vector.broadcast %cst_19 : bf16 to vector<5x1x64xbf16>
    %c0_20 = arith.constant 0 : index
    %c0_21 = arith.constant 0 : index
    %c0_22 = arith.constant 0 : index
    %33 = vector.load %arg11[%c0_20, %c0_21, %c0_22] : memref<5x5x64xbf16, #tpu.memory_space<vmem>>, vector<1x5x64xbf16>
    tpu.vector_store %arg11[%c0_20, %c0_21, %c0_22], %31 {strides = array<i32>} : memref<5x5x64xbf16, #tpu.memory_space<vmem>>, vector<1x5x64xbf16>,
    %c4 = arith.constant 4 : index
    %c0_23 = arith.constant 0 : index
    %c0_24 = arith.constant 0 : index
    %34 = vector.load %arg11[%c4, %c0_23, %c0_24] : memref<5x5x64xbf16, #tpu.memory_space<vmem>>, vector<1x5x64xbf16>
    tpu.vector_store %arg11[%c4, %c0_23, %c0_24], %31 {strides = array<i32>} : memref<5x5x64xbf16, #tpu.memory_space<vmem>>, vector<1x5x64xbf16>,
    %c0_25 = arith.constant 0 : index
    %c0_26 = arith.constant 0 : index
    %c0_27 = arith.constant 0 : index
    %35 = vector.load %arg11[%c0_25, %c0_26, %c0_27] : memref<5x5x64xbf16, #tpu.memory_space<vmem>>, vector<5x1x64xbf16>
    tpu.vector_store %arg11[%c0_25, %c0_26, %c0_27], %32 {strides = array<i32>} : memref<5x5x64xbf16, #tpu.memory_space<vmem>>, vector<5x1x64xbf16>,
    %c0_28 = arith.constant 0 : index
    %c4_29 = arith.constant 4 : index
    %c0_30 = arith.constant 0 : index
    %36 = vector.load %arg11[%c0_28, %c4_29, %c0_30] : memref<5x5x64xbf16, #tpu.memory_space<vmem>>, vector<5x1x64xbf16>
    tpu.vector_store %arg11[%c0_28, %c4_29, %c0_30], %32 {strides = array<i32>} : memref<5x5x64xbf16, #tpu.memory_space<vmem>>, vector<5x1x64xbf16>,
    %37 = arith.truncf %30 : vector<64x16xf32> to vector<64x16xbf16>
    %38 = vector.shape_cast %37 : vector<64x16xbf16> to vector<4x2x4x2x16xbf16>
    %39 = vector.extract_strided_slice %38 {offsets = [0, 1, 0, 1, 0], sizes = [4, 1, 4, 1, 16], strides = [1, 1, 1, 1, 1]} : vector<4x2x4x2x16xbf16> to vector<4x1x4x1x16xbf16>
    %40 = vector.shape_cast %39 : vector<4x1x4x1x16xbf16> to vector<4x4x16xbf16>
    %c1_31 = arith.constant 1 : index
    %c1_32 = arith.constant 1 : index
    %c0_33 = arith.constant 0 : index
    %41 = vector.load %arg11[%c1_31, %c1_32, %c0_33] : memref<5x5x64xbf16, #tpu.memory_space<vmem>>, vector<4x4x16xbf16>
    tpu.vector_store %arg11[%c1_31, %c1_32, %c0_33], %40 {strides = array<i32>} : memref<5x5x64xbf16, #tpu.memory_space<vmem>>, vector<4x4x16xbf16>,
    %42 = vector.extract_strided_slice %38 {offsets = [0, 1, 0, 0, 0], sizes = [4, 1, 4, 1, 16], strides = [1, 1, 1, 1, 1]} : vector<4x2x4x2x16xbf16> to vector<4x1x4x1x16xbf16>
    %43 = vector.shape_cast %42 : vector<4x1x4x1x16xbf16> to vector<4x4x16xbf16>
    %c1_34 = arith.constant 1 : index
    %c0_35 = arith.constant 0 : index
    %c16 = arith.constant 16 : index
    %44 = vector.load %arg11[%c1_34, %c0_35, %c16] : memref<5x5x64xbf16, #tpu.memory_space<vmem>>, vector<4x4x16xbf16>
    tpu.vector_store %arg11[%c1_34, %c0_35, %c16], %43 {strides = array<i32>} : memref<5x5x64xbf16, #tpu.memory_space<vmem>>, vector<4x4x16xbf16>,
    %45 = vector.extract_strided_slice %38 {offsets = [0, 0, 0, 1, 0], sizes = [4, 1, 4, 1, 16], strides = [1, 1, 1, 1, 1]} : vector<4x2x4x2x16xbf16> to vector<4x1x4x1x16xbf16>
    %46 = vector.shape_cast %45 : vector<4x1x4x1x16xbf16> to vector<4x4x16xbf16>
    %c0_36 = arith.constant 0 : index
    %c1_37 = arith.constant 1 : index
    %c32 = arith.constant 32 : index
    %47 = vector.load %arg11[%c0_36, %c1_37, %c32] : memref<5x5x64xbf16, #tpu.memory_space<vmem>>, vector<4x4x16xbf16>
    tpu.vector_store %arg11[%c0_36, %c1_37, %c32], %46 {strides = array<i32>} : memref<5x5x64xbf16, #tpu.memory_space<vmem>>, vector<4x4x16xbf16>,
    %48 = vector.extract_strided_slice %38 {offsets = [0, 0, 0, 0, 0], sizes = [4, 1, 4, 1, 16], strides = [1, 1, 1, 1, 1]} : vector<4x2x4x2x16xbf16> to vector<4x1x4x1x16xbf16>
    %49 = vector.shape_cast %48 : vector<4x1x4x1x16xbf16> to vector<4x4x16xbf16>
    %c0_38 = arith.constant 0 : index
    %c0_39 = arith.constant 0 : index
    %c48 = arith.constant 48 : index
    %50 = vector.load %arg11[%c0_38, %c0_39, %c48] : memref<5x5x64xbf16, #tpu.memory_space<vmem>>, vector<4x4x16xbf16>
    tpu.vector_store %arg11[%c0_38, %c0_39, %c48], %49 {strides = array<i32>} : memref<5x5x64xbf16, #tpu.memory_space<vmem>>, vector<4x4x16xbf16>,
    %c0_40 = arith.constant 0 : index
    %c0_41 = arith.constant 0 : index
    %c0_42 = arith.constant 0 : index
    %51 = vector.load %arg11[%c0_40, %c0_41, %c0_42] : memref<5x5x64xbf16, #tpu.memory_space<vmem>>, vector<5x5x64xbf16>
    %52 = vector.extract_strided_slice %51 {offsets = [0, 0, 0], sizes = [4, 4, 64], strides = [1, 1, 1]} : vector<5x5x64xbf16> to vector<4x4x64xbf16>
    %53 = vector.shape_cast %52 : vector<4x4x64xbf16> to vector<16x64xbf16>
    %c0_43 = arith.constant 0 : index
    %c0_44 = arith.constant 0 : index
    %c0_45 = arith.constant 0 : index
    %54 = vector.load %arg4[%c0_43, %c0_44, %c0_45] : memref<4x64x32xbf16, #tpu.memory_space<vmem>>, vector<1x64x32xbf16>
    %55 = vector.shape_cast %54 : vector<1x64x32xbf16> to vector<64x32xbf16>
    %cst_46 = arith.constant dense<0.000000e+00> : vector<16x32xf32>
    %56 = tpu.matmul %53, %55, %cst_46 {dimension_numbers = #tpu.dot_dimension_numbers<[1], [0], [0], [1], [0, 0, 1, 1], [], []>} : vector<16x64xbf16>, vector<64x32xbf16>, vector<16x32xf32> -> vector<16x32xf32>
    %57 = vector.extract_strided_slice %51 {offsets = [0, 1, 0], sizes = [4, 4, 64], strides = [1, 1, 1]} : vector<5x5x64xbf16> to vector<4x4x64xbf16>
    %58 = vector.shape_cast %57 : vector<4x4x64xbf16> to vector<16x64xbf16>
    %c1_47 = arith.constant 1 : index
    %c0_48 = arith.constant 0 : index
    %c0_49 = arith.constant 0 : index
    %59 = vector.load %arg4[%c1_47, %c0_48, %c0_49] : memref<4x64x32xbf16, #tpu.memory_space<vmem>>, vector<1x64x32xbf16>
    %60 = vector.shape_cast %59 : vector<1x64x32xbf16> to vector<64x32xbf16>
    %cst_50 = arith.constant dense<0.000000e+00> : vector<16x32xf32>
    %61 = tpu.matmul %58, %60, %cst_50 {dimension_numbers = #tpu.dot_dimension_numbers<[1], [0], [0], [1], [0, 0, 1, 1], [], []>} : vector<16x64xbf16>, vector<64x32xbf16>, vector<16x32xf32> -> vector<16x32xf32>
    %62 = arith.addf %56, %61 : vector<16x32xf32>
    %63 = vector.extract_strided_slice %51 {offsets = [1, 0, 0], sizes = [4, 4, 64], strides = [1, 1, 1]} : vector<5x5x64xbf16> to vector<4x4x64xbf16>
    %64 = vector.shape_cast %63 : vector<4x4x64xbf16> to vector<16x64xbf16>
    %c2_51 = arith.constant 2 : index
    %c0_52 = arith.constant 0 : index
    %c0_53 = arith.constant 0 : index
    %65 = vector.load %arg4[%c2_51, %c0_52, %c0_53] : memref<4x64x32xbf16, #tpu.memory_space<vmem>>, vector<1x64x32xbf16>
    %66 = vector.shape_cast %65 : vector<1x64x32xbf16> to vector<64x32xbf16>
    %cst_54 = arith.constant dense<0.000000e+00> : vector<16x32xf32>
    %67 = tpu.matmul %64, %66, %cst_54 {dimension_numbers = #tpu.dot_dimension_numbers<[1], [0], [0], [1], [0, 0, 1, 1], [], []>} : vector<16x64xbf16>, vector<64x32xbf16>, vector<16x32xf32> -> vector<16x32xf32>
    %68 = arith.addf %62, %67 : vector<16x32xf32>
    %69 = vector.extract_strided_slice %51 {offsets = [1, 1, 0], sizes = [4, 4, 64], strides = [1, 1, 1]} : vector<5x5x64xbf16> to vector<4x4x64xbf16>
    %70 = vector.shape_cast %69 : vector<4x4x64xbf16> to vector<16x64xbf16>
    %c3_55 = arith.constant 3 : index
    %c0_56 = arith.constant 0 : index
    %c0_57 = arith.constant 0 : index
    %71 = vector.load %arg4[%c3_55, %c0_56, %c0_57] : memref<4x64x32xbf16, #tpu.memory_space<vmem>>, vector<1x64x32xbf16>
    %72 = vector.shape_cast %71 : vector<1x64x32xbf16> to vector<64x32xbf16>
    %cst_58 = arith.constant dense<0.000000e+00> : vector<16x32xf32>
    %73 = tpu.matmul %70, %72, %cst_58 {dimension_numbers = #tpu.dot_dimension_numbers<[1], [0], [0], [1], [0, 0, 1, 1], [], []>} : vector<16x64xbf16>, vector<64x32xbf16>, vector<16x32xf32> -> vector<16x32xf32>
    %74 = arith.addf %68, %73 : vector<16x32xf32>
    %c0_59 = arith.constant 0 : index
    %c0_60 = arith.constant 0 : index
    %75 = vector.load %arg5[%c0_59, %c0_60] : memref<1x32xf32, #tpu.memory_space<vmem>>, vector<1x32xf32>
    %76 = vector.broadcast %75 : vector<1x32xf32> to vector<16x32xf32>
    %77 = arith.addf %74, %76 : vector<16x32xf32>
    %cst_61 = arith.constant 2.000000e-01 : f32
    %78 = vector.broadcast %cst_61 : f32 to vector<16x32xf32>
    %79 = arith.mulf %78, %77 : vector<16x32xf32>
    %80 = arith.maximumf %77, %79 : vector<16x32xf32>
    %cst_62 = arith.constant 0.000000e+00 : bf16
    %81 = vector.broadcast %cst_62 : bf16 to vector<1x3x128xbf16>
    %cst_63 = arith.constant 0.000000e+00 : bf16
    %82 = vector.broadcast %cst_63 : bf16 to vector<3x1x128xbf16>
    %c0_64 = arith.constant 0 : index
    %c0_65 = arith.constant 0 : index
    %c0_66 = arith.constant 0 : index
    %83 = vector.load %arg12[%c0_64, %c0_65, %c0_66] : memref<3x3x128xbf16, #tpu.memory_space<vmem>>, vector<1x3x128xbf16>
    tpu.vector_store %arg12[%c0_64, %c0_65, %c0_66], %81 {strides = array<i32>} : memref<3x3x128xbf16, #tpu.memory_space<vmem>>, vector<1x3x128xbf16>,
    %c2_67 = arith.constant 2 : index
    %c0_68 = arith.constant 0 : index
    %c0_69 = arith.constant 0 : index
    %84 = vector.load %arg12[%c2_67, %c0_68, %c0_69] : memref<3x3x128xbf16, #tpu.memory_space<vmem>>, vector<1x3x128xbf16>
    tpu.vector_store %arg12[%c2_67, %c0_68, %c0_69], %81 {strides = array<i32>} : memref<3x3x128xbf16, #tpu.memory_space<vmem>>, vector<1x3x128xbf16>,
    %c0_70 = arith.constant 0 : index
    %c0_71 = arith.constant 0 : index
    %c0_72 = arith.constant 0 : index
    %85 = vector.load %arg12[%c0_70, %c0_71, %c0_72] : memref<3x3x128xbf16, #tpu.memory_space<vmem>>, vector<3x1x128xbf16>
    tpu.vector_store %arg12[%c0_70, %c0_71, %c0_72], %82 {strides = array<i32>} : memref<3x3x128xbf16, #tpu.memory_space<vmem>>, vector<3x1x128xbf16>,
    %c0_73 = arith.constant 0 : index
    %c2_74 = arith.constant 2 : index
    %c0_75 = arith.constant 0 : index
    %86 = vector.load %arg12[%c0_73, %c2_74, %c0_75] : memref<3x3x128xbf16, #tpu.memory_space<vmem>>, vector<3x1x128xbf16>
    tpu.vector_store %arg12[%c0_73, %c2_74, %c0_75], %82 {strides = array<i32>} : memref<3x3x128xbf16, #tpu.memory_space<vmem>>, vector<3x1x128xbf16>,
    %87 = arith.truncf %80 : vector<16x32xf32> to vector<16x32xbf16>
    %88 = vector.shape_cast %87 : vector<16x32xbf16> to vector<2x2x2x2x32xbf16>
    %89 = vector.extract_strided_slice %88 {offsets = [0, 1, 0, 1, 0], sizes = [2, 1, 2, 1, 32], strides = [1, 1, 1, 1, 1]} : vector<2x2x2x2x32xbf16> to vector<2x1x2x1x32xbf16>
    %90 = vector.shape_cast %89 : vector<2x1x2x1x32xbf16> to vector<2x2x32xbf16>
    %c1_76 = arith.constant 1 : index
    %c1_77 = arith.constant 1 : index
    %c0_78 = arith.constant 0 : index
    %91 = vector.load %arg12[%c1_76, %c1_77, %c0_78] : memref<3x3x128xbf16, #tpu.memory_space<vmem>>, vector<2x2x32xbf16>
    tpu.vector_store %arg12[%c1_76, %c1_77, %c0_78], %90 {strides = array<i32>} : memref<3x3x128xbf16, #tpu.memory_space<vmem>>, vector<2x2x32xbf16>,
    %92 = vector.extract_strided_slice %88 {offsets = [0, 1, 0, 0, 0], sizes = [2, 1, 2, 1, 32], strides = [1, 1, 1, 1, 1]} : vector<2x2x2x2x32xbf16> to vector<2x1x2x1x32xbf16>
    %93 = vector.shape_cast %92 : vector<2x1x2x1x32xbf16> to vector<2x2x32xbf16>
    %c1_79 = arith.constant 1 : index
    %c0_80 = arith.constant 0 : index
    %c32_81 = arith.constant 32 : index
    %94 = vector.load %arg12[%c1_79, %c0_80, %c32_81] : memref<3x3x128xbf16, #tpu.memory_space<vmem>>, vector<2x2x32xbf16>
    tpu.vector_store %arg12[%c1_79, %c0_80, %c32_81], %93 {strides = array<i32>} : memref<3x3x128xbf16, #tpu.memory_space<vmem>>, vector<2x2x32xbf16>,
    %95 = vector.extract_strided_slice %88 {offsets = [0, 0, 0, 1, 0], sizes = [2, 1, 2, 1, 32], strides = [1, 1, 1, 1, 1]} : vector<2x2x2x2x32xbf16> to vector<2x1x2x1x32xbf16>
    %96 = vector.shape_cast %95 : vector<2x1x2x1x32xbf16> to vector<2x2x32xbf16>
    %c0_82 = arith.constant 0 : index
    %c1_83 = arith.constant 1 : index
    %c64 = arith.constant 64 : index
    %97 = vector.load %arg12[%c0_82, %c1_83, %c64] : memref<3x3x128xbf16, #tpu.memory_space<vmem>>, vector<2x2x32xbf16>
    tpu.vector_store %arg12[%c0_82, %c1_83, %c64], %96 {strides = array<i32>} : memref<3x3x128xbf16, #tpu.memory_space<vmem>>, vector<2x2x32xbf16>,
    %98 = vector.extract_strided_slice %88 {offsets = [0, 0, 0, 0, 0], sizes = [2, 1, 2, 1, 32], strides = [1, 1, 1, 1, 1]} : vector<2x2x2x2x32xbf16> to vector<2x1x2x1x32xbf16>
    %99 = vector.shape_cast %98 : vector<2x1x2x1x32xbf16> to vector<2x2x32xbf16>
    %c0_84 = arith.constant 0 : index
    %c0_85 = arith.constant 0 : index
    %c96 = arith.constant 96 : index
    %100 = vector.load %arg12[%c0_84, %c0_85, %c96] : memref<3x3x128xbf16, #tpu.memory_space<vmem>>, vector<2x2x32xbf16>
    tpu.vector_store %arg12[%c0_84, %c0_85, %c96], %99 {strides = array<i32>} : memref<3x3x128xbf16, #tpu.memory_space<vmem>>, vector<2x2x32xbf16>,
    %c0_86 = arith.constant 0 : index
    %c0_87 = arith.constant 0 : index
    %c0_88 = arith.constant 0 : index
    %101 = vector.load %arg12[%c0_86, %c0_87, %c0_88] : memref<3x3x128xbf16, #tpu.memory_space<vmem>>, vector<3x3x128xbf16>
    %102 = vector.extract_strided_slice %101 {offsets = [0, 0, 0], sizes = [2, 2, 128], strides = [1, 1, 1]} : vector<3x3x128xbf16> to vector<2x2x128xbf16>
    %103 = vector.shape_cast %102 : vector<2x2x128xbf16> to vector<4x128xbf16>
    %c0_89 = arith.constant 0 : index
    %c0_90 = arith.constant 0 : index
    %c0_91 = arith.constant 0 : index
    %104 = vector.load %arg6[%c0_89, %c0_90, %c0_91] : memref<4x128x64xbf16, #tpu.memory_space<vmem>>, vector<1x128x64xbf16>
    %105 = vector.shape_cast %104 : vector<1x128x64xbf16> to vector<128x64xbf16>
    %cst_92 = arith.constant dense<0.000000e+00> : vector<4x64xf32>
    %106 = tpu.matmul %103, %105, %cst_92 {dimension_numbers = #tpu.dot_dimension_numbers<[1], [0], [0], [1], [0, 0, 1, 1], [], []>} : vector<4x128xbf16>, vector<128x64xbf16>, vector<4x64xf32> -> vector<4x64xf32>
    %107 = vector.extract_strided_slice %101 {offsets = [0, 1, 0], sizes = [2, 2, 128], strides = [1, 1, 1]} : vector<3x3x128xbf16> to vector<2x2x128xbf16>
    %108 = vector.shape_cast %107 : vector<2x2x128xbf16> to vector<4x128xbf16>
    %c1_93 = arith.constant 1 : index
    %c0_94 = arith.constant 0 : index
    %c0_95 = arith.constant 0 : index
    %109 = vector.load %arg6[%c1_93, %c0_94, %c0_95] : memref<4x128x64xbf16, #tpu.memory_space<vmem>>, vector<1x128x64xbf16>
    %110 = vector.shape_cast %109 : vector<1x128x64xbf16> to vector<128x64xbf16>
    %cst_96 = arith.constant dense<0.000000e+00> : vector<4x64xf32>
    %111 = tpu.matmul %108, %110, %cst_96 {dimension_numbers = #tpu.dot_dimension_numbers<[1], [0], [0], [1], [0, 0, 1, 1], [], []>} : vector<4x128xbf16>, vector<128x64xbf16>, vector<4x64xf32> -> vector<4x64xf32>
    %112 = arith.addf %106, %111 : vector<4x64xf32>
    %113 = vector.extract_strided_slice %101 {offsets = [1, 0, 0], sizes = [2, 2, 128], strides = [1, 1, 1]} : vector<3x3x128xbf16> to vector<2x2x128xbf16>
    %114 = vector.shape_cast %113 : vector<2x2x128xbf16> to vector<4x128xbf16>
    %c2_97 = arith.constant 2 : index
    %c0_98 = arith.constant 0 : index
    %c0_99 = arith.constant 0 : index
    %115 = vector.load %arg6[%c2_97, %c0_98, %c0_99] : memref<4x128x64xbf16, #tpu.memory_space<vmem>>, vector<1x128x64xbf16>
    %116 = vector.shape_cast %115 : vector<1x128x64xbf16> to vector<128x64xbf16>
    %cst_100 = arith.constant dense<0.000000e+00> : vector<4x64xf32>
    %117 = tpu.matmul %114, %116, %cst_100 {dimension_numbers = #tpu.dot_dimension_numbers<[1], [0], [0], [1], [0, 0, 1, 1], [], []>} : vector<4x128xbf16>, vector<128x64xbf16>, vector<4x64xf32> -> vector<4x64xf32>
    %118 = arith.addf %112, %117 : vector<4x64xf32>
    %119 = vector.extract_strided_slice %101 {offsets = [1, 1, 0], sizes = [2, 2, 128], strides = [1, 1, 1]} : vector<3x3x128xbf16> to vector<2x2x128xbf16>
    %120 = vector.shape_cast %119 : vector<2x2x128xbf16> to vector<4x128xbf16>
    %c3_101 = arith.constant 3 : index
    %c0_102 = arith.constant 0 : index
    %c0_103 = arith.constant 0 : index
    %121 = vector.load %arg6[%c3_101, %c0_102, %c0_103] : memref<4x128x64xbf16, #tpu.memory_space<vmem>>, vector<1x128x64xbf16>
    %122 = vector.shape_cast %121 : vector<1x128x64xbf16> to vector<128x64xbf16>
    %cst_104 = arith.constant dense<0.000000e+00> : vector<4x64xf32>
    %123 = tpu.matmul %120, %122, %cst_104 {dimension_numbers = #tpu.dot_dimension_numbers<[1], [0], [0], [1], [0, 0, 1, 1], [], []>} : vector<4x128xbf16>, vector<128x64xbf16>, vector<4x64xf32> -> vector<4x64xf32>
    %124 = arith.addf %118, %123 : vector<4x64xf32>
    %c0_105 = arith.constant 0 : index
    %c0_106 = arith.constant 0 : index
    %125 = vector.load %arg7[%c0_105, %c0_106] : memref<1x64xf32, #tpu.memory_space<vmem>>, vector<1x64xf32>
    %126 = vector.broadcast %125 : vector<1x64xf32> to vector<4x64xf32>
    %127 = arith.addf %124, %126 : vector<4x64xf32>
    %cst_107 = arith.constant 2.000000e-01 : f32
    %128 = vector.broadcast %cst_107 : f32 to vector<4x64xf32>
    %129 = arith.mulf %128, %127 : vector<4x64xf32>
    %130 = arith.maximumf %127, %129 : vector<4x64xf32>
    %cst_108 = arith.constant 0.000000e+00 : bf16
    %131 = vector.broadcast %cst_108 : bf16 to vector<1x2x256xbf16>
    %cst_109 = arith.constant 0.000000e+00 : bf16
    %132 = vector.broadcast %cst_109 : bf16 to vector<2x1x256xbf16>
    %c0_110 = arith.constant 0 : index
    %c0_111 = arith.constant 0 : index
    %c0_112 = arith.constant 0 : index
    %133 = vector.load %arg13[%c0_110, %c0_111, %c0_112] : memref<2x2x256xbf16, #tpu.memory_space<vmem>>, vector<1x2x256xbf16>
    tpu.vector_store %arg13[%c0_110, %c0_111, %c0_112], %131 {strides = array<i32>} : memref<2x2x256xbf16, #tpu.memory_space<vmem>>, vector<1x2x256xbf16>,
    %c1_113 = arith.constant 1 : index
    %c0_114 = arith.constant 0 : index
    %c0_115 = arith.constant 0 : index
    %134 = vector.load %arg13[%c1_113, %c0_114, %c0_115] : memref<2x2x256xbf16, #tpu.memory_space<vmem>>, vector<1x2x256xbf16>
    tpu.vector_store %arg13[%c1_113, %c0_114, %c0_115], %131 {strides = array<i32>} : memref<2x2x256xbf16, #tpu.memory_space<vmem>>, vector<1x2x256xbf16>,
    %c0_116 = arith.constant 0 : index
    %c0_117 = arith.constant 0 : index
    %c0_118 = arith.constant 0 : index
    %135 = vector.load %arg13[%c0_116, %c0_117, %c0_118] : memref<2x2x256xbf16, #tpu.memory_space<vmem>>, vector<2x1x256xbf16>
    tpu.vector_store %arg13[%c0_116, %c0_117, %c0_118], %132 {strides = array<i32>} : memref<2x2x256xbf16, #tpu.memory_space<vmem>>, vector<2x1x256xbf16>,
    %c0_119 = arith.constant 0 : index
    %c1_120 = arith.constant 1 : index
    %c0_121 = arith.constant 0 : index
    %136 = vector.load %arg13[%c0_119, %c1_120, %c0_121] : memref<2x2x256xbf16, #tpu.memory_space<vmem>>, vector<2x1x256xbf16>
    tpu.vector_store %arg13[%c0_119, %c1_120, %c0_121], %132 {strides = array<i32>} : memref<2x2x256xbf16, #tpu.memory_space<vmem>>, vector<2x1x256xbf16>,
    %137 = arith.truncf %130 : vector<4x64xf32> to vector<4x64xbf16>
    %138 = vector.shape_cast %137 : vector<4x64xbf16> to vector<1x2x1x2x64xbf16>
    %139 = vector.extract_strided_slice %138 {offsets = [0, 1, 0, 1, 0], sizes = [1, 1, 1, 1, 64], strides = [1, 1, 1, 1, 1]} : vector<1x2x1x2x64xbf16> to vector<1x1x1x1x64xbf16>
    %140 = vector.shape_cast %139 : vector<1x1x1x1x64xbf16> to vector<1x1x64xbf16>
    %c1_122 = arith.constant 1 : index
    %c1_123 = arith.constant 1 : index
    %c0_124 = arith.constant 0 : index
    %141 = vector.load %arg13[%c1_122, %c1_123, %c0_124] : memref<2x2x256xbf16, #tpu.memory_space<vmem>>, vector<1x1x64xbf16>
    tpu.vector_store %arg13[%c1_122, %c1_123, %c0_124], %140 {strides = array<i32>} : memref<2x2x256xbf16, #tpu.memory_space<vmem>>, vector<1x1x64xbf16>,
    %142 = vector.extract_strided_slice %138 {offsets = [0, 1, 0, 0, 0], sizes = [1, 1, 1, 1, 64], strides = [1, 1, 1, 1, 1]} : vector<1x2x1x2x64xbf16> to vector<1x1x1x1x64xbf16>
    %143 = vector.shape_cast %142 : vector<1x1x1x1x64xbf16> to vector<1x1x64xbf16>
    %c1_125 = arith.constant 1 : index
    %c0_126 = arith.constant 0 : index
    %c64_127 = arith.constant 64 : index
    %144 = vector.load %arg13[%c1_125, %c0_126, %c64_127] : memref<2x2x256xbf16, #tpu.memory_space<vmem>>, vector<1x1x64xbf16>
    tpu.vector_store %arg13[%c1_125, %c0_126, %c64_127], %143 {strides = array<i32>} : memref<2x2x256xbf16, #tpu.memory_space<vmem>>, vector<1x1x64xbf16>,
    %145 = vector.extract_strided_slice %138 {offsets = [0, 0, 0, 1, 0], sizes = [1, 1, 1, 1, 64], strides = [1, 1, 1, 1, 1]} : vector<1x2x1x2x64xbf16> to vector<1x1x1x1x64xbf16>
    %146 = vector.shape_cast %145 : vector<1x1x1x1x64xbf16> to vector<1x1x64xbf16>
    %c0_128 = arith.constant 0 : index
    %c1_129 = arith.constant 1 : index
    %c128 = arith.constant 128 : index
    %147 = vector.load %arg13[%c0_128, %c1_129, %c128] : memref<2x2x256xbf16, #tpu.memory_space<vmem>>, vector<1x1x64xbf16>
    tpu.vector_store %arg13[%c0_128, %c1_129, %c128], %146 {strides = array<i32>} : memref<2x2x256xbf16, #tpu.memory_space<vmem>>, vector<1x1x64xbf16>,
    %148 = vector.extract_strided_slice %138 {offsets = [0, 0, 0, 0, 0], sizes = [1, 1, 1, 1, 64], strides = [1, 1, 1, 1, 1]} : vector<1x2x1x2x64xbf16> to vector<1x1x1x1x64xbf16>
    %149 = vector.shape_cast %148 : vector<1x1x1x1x64xbf16> to vector<1x1x64xbf16>
    %c0_130 = arith.constant 0 : index
    %c0_131 = arith.constant 0 : index
    %c192 = arith.constant 192 : index
    %150 = vector.load %arg13[%c0_130, %c0_131, %c192] : memref<2x2x256xbf16, #tpu.memory_space<vmem>>, vector<1x1x64xbf16>
    tpu.vector_store %arg13[%c0_130, %c0_131, %c192], %149 {strides = array<i32>} : memref<2x2x256xbf16, #tpu.memory_space<vmem>>, vector<1x1x64xbf16>,
    %c0_132 = arith.constant 0 : index
    %c0_133 = arith.constant 0 : index
    %c0_134 = arith.constant 0 : index
    %151 = vector.load %arg13[%c0_132, %c0_133, %c0_134] : memref<2x2x256xbf16, #tpu.memory_space<vmem>>, vector<2x2x256xbf16>
    %152 = vector.extract_strided_slice %151 {offsets = [0, 0, 0], sizes = [1, 1, 256], strides = [1, 1, 1]} : vector<2x2x256xbf16> to vector<1x1x256xbf16>
    %153 = vector.shape_cast %152 : vector<1x1x256xbf16> to vector<1x256xbf16>
    %c0_135 = arith.constant 0 : index
    %c0_136 = arith.constant 0 : index
    %c0_137 = arith.constant 0 : index
    %154 = vector.load %arg8[%c0_135, %c0_136, %c0_137] : memref<4x256x64xbf16, #tpu.memory_space<vmem>>, vector<1x256x64xbf16>
    %155 = vector.shape_cast %154 : vector<1x256x64xbf16> to vector<256x64xbf16>
    %cst_138 = arith.constant dense<0.000000e+00> : vector<1x64xf32>
    %156 = tpu.matmul %153, %155, %cst_138 {dimension_numbers = #tpu.dot_dimension_numbers<[1], [0], [0], [1], [0, 0, 1, 1], [], []>} : vector<1x256xbf16>, vector<256x64xbf16>, vector<1x64xf32> -> vector<1x64xf32>
    %157 = vector.extract_strided_slice %151 {offsets = [0, 1, 0], sizes = [1, 1, 256], strides = [1, 1, 1]} : vector<2x2x256xbf16> to vector<1x1x256xbf16>
    %158 = vector.shape_cast %157 : vector<1x1x256xbf16> to vector<1x256xbf16>
    %c1_139 = arith.constant 1 : index
    %c0_140 = arith.constant 0 : index
    %c0_141 = arith.constant 0 : index
    %159 = vector.load %arg8[%c1_139, %c0_140, %c0_141] : memref<4x256x64xbf16, #tpu.memory_space<vmem>>, vector<1x256x64xbf16>
    %160 = vector.shape_cast %159 : vector<1x256x64xbf16> to vector<256x64xbf16>
    %cst_142 = arith.constant dense<0.000000e+00> : vector<1x64xf32>
    %161 = tpu.matmul %158, %160, %cst_142 {dimension_numbers = #tpu.dot_dimension_numbers<[1], [0], [0], [1], [0, 0, 1, 1], [], []>} : vector<1x256xbf16>, vector<256x64xbf16>, vector<1x64xf32> -> vector<1x64xf32>
    %162 = arith.addf %156, %161 : vector<1x64xf32>
    %163 = vector.extract_strided_slice %151 {offsets = [1, 0, 0], sizes = [1, 1, 256], strides = [1, 1, 1]} : vector<2x2x256xbf16> to vector<1x1x256xbf16>
    %164 = vector.shape_cast %163 : vector<1x1x256xbf16> to vector<1x256xbf16>
    %c2_143 = arith.constant 2 : index
    %c0_144 = arith.constant 0 : index
    %c0_145 = arith.constant 0 : index
    %165 = vector.load %arg8[%c2_143, %c0_144, %c0_145] : memref<4x256x64xbf16, #tpu.memory_space<vmem>>, vector<1x256x64xbf16>
    %166 = vector.shape_cast %165 : vector<1x256x64xbf16> to vector<256x64xbf16>
    %cst_146 = arith.constant dense<0.000000e+00> : vector<1x64xf32>
    %167 = tpu.matmul %164, %166, %cst_146 {dimension_numbers = #tpu.dot_dimension_numbers<[1], [0], [0], [1], [0, 0, 1, 1], [], []>} : vector<1x256xbf16>, vector<256x64xbf16>, vector<1x64xf32> -> vector<1x64xf32>
    %168 = arith.addf %162, %167 : vector<1x64xf32>
    %169 = vector.extract_strided_slice %151 {offsets = [1, 1, 0], sizes = [1, 1, 256], strides = [1, 1, 1]} : vector<2x2x256xbf16> to vector<1x1x256xbf16>
    %170 = vector.shape_cast %169 : vector<1x1x256xbf16> to vector<1x256xbf16>
    %c3_147 = arith.constant 3 : index
    %c0_148 = arith.constant 0 : index
    %c0_149 = arith.constant 0 : index
    %171 = vector.load %arg8[%c3_147, %c0_148, %c0_149] : memref<4x256x64xbf16, #tpu.memory_space<vmem>>, vector<1x256x64xbf16>
    %172 = vector.shape_cast %171 : vector<1x256x64xbf16> to vector<256x64xbf16>
    %cst_150 = arith.constant dense<0.000000e+00> : vector<1x64xf32>
    %173 = tpu.matmul %170, %172, %cst_150 {dimension_numbers = #tpu.dot_dimension_numbers<[1], [0], [0], [1], [0, 0, 1, 1], [], []>} : vector<1x256xbf16>, vector<256x64xbf16>, vector<1x64xf32> -> vector<1x64xf32>
    %174 = arith.addf %168, %173 : vector<1x64xf32>
    %c0_151 = arith.constant 0 : index
    %c0_152 = arith.constant 0 : index
    %175 = vector.load %arg9[%c0_151, %c0_152] : memref<1x64xf32, #tpu.memory_space<vmem>>, vector<1x64xf32>
    %176 = arith.addf %174, %175 : vector<1x64xf32>
    %cst_153 = arith.constant 2.000000e-01 : f32
    %177 = vector.broadcast %cst_153 : f32 to vector<1x64xf32>
    %178 = arith.mulf %177, %176 : vector<1x64xf32>
    %179 = arith.maximumf %176, %178 : vector<1x64xf32>
    %180 = tpu.transpose %179, [1, 0] : vector<1x64xf32> -> vector<64x1xf32>
    %181 = vector.shape_cast %180 : vector<64x1xf32> to vector<1x1x64xf32>
    %c0_154 = arith.constant 0 : index
    %c0_155 = arith.constant 0 : index
    %c0_156 = arith.constant 0 : index
    %182 = vector.load %arg10[%c0_154, %c0_155, %c0_156] : memref<1x1x64xf32, #tpu.memory_space<vmem>>, vector<1x1x64xf32>
    tpu.vector_store %arg10[%c0_154, %c0_155, %c0_156], %181 {strides = array<i32>} : memref<1x1x64xf32, #tpu.memory_space<vmem>>, vector<1x1x64xf32>,
    return
  }
  func.func @transform_0(%arg0: i32) -> (i32, i32, i32, i32) {
    %c0_i32 = arith.constant 0 : i32
    %c0_i32_0 = arith.constant 0 : i32
    %c0_i32_1 = arith.constant 0 : i32
    %c0_i32_2 = arith.constant 0 : i32
    return %arg0, %c0_i32, %c0_i32_0, %c0_i32_1 : i32, i32, i32, i32
  }
  func.func @transform_1(%arg0: i32) -> (i32, i32, i32) {
    %c0_i32 = arith.constant 0 : i32
    %c0_i32_0 = arith.constant 0 : i32
    %c0_i32_1 = arith.constant 0 : i32
    %c0_i32_2 = arith.constant 0 : i32
    return %c0_i32, %c0_i32_0, %c0_i32_1 : i32, i32, i32
  }
  func.func @transform_2(%arg0: i32) -> (i32, i32) {
    %c0_i32 = arith.constant 0 : i32
    %c0_i32_0 = arith.constant 0 : i32
    %c0_i32_1 = arith.constant 0 : i32
    return %c0_i32, %c0_i32_0 : i32, i32
  }
  func.func @transform_3(%arg0: i32) -> (i32, i32, i32) {
    %c0_i32 = arith.constant 0 : i32
    %c0_i32_0 = arith.constant 0 : i32
    %c0_i32_1 = arith.constant 0 : i32
    %c0_i32_2 = arith.constant 0 : i32
    return %c0_i32, %c0_i32_0, %c0_i32_1 : i32, i32, i32
  }
  func.func @transform_4(%arg0: i32) -> (i32, i32) {
    %c0_i32 = arith.constant 0 : i32
    %c0_i32_0 = arith.constant 0 : i32
    %c0_i32_1 = arith.constant 0 : i32
    return %c0_i32, %c0_i32_0 : i32, i32
  }
  func.func @transform_5(%arg0: i32) -> (i32, i32, i32) {
    %c0_i32 = arith.constant 0 : i32
    %c0_i32_0 = arith.constant 0 : i32
    %c0_i32_1 = arith.constant 0 : i32
    %c0_i32_2 = arith.constant 0 : i32
    return %c0_i32, %c0_i32_0, %c0_i32_1 : i32, i32, i32
  }
  func.func @transform_6(%arg0: i32) -> (i32, i32) {
    %c0_i32 = arith.constant 0 : i32
    %c0_i32_0 = arith.constant 0 : i32
    %c0_i32_1 = arith.constant 0 : i32
    return %c0_i32, %c0_i32_0 : i32, i32
  }
  func.func @transform_7(%arg0: i32) -> (i32, i32, i32) {
    %c0_i32 = arith.constant 0 : i32
    %c0_i32_0 = arith.constant 0 : i32
    %c0_i32_1 = arith.constant 0 : i32
    %c0_i32_2 = arith.constant 0 : i32
    return %c0_i32, %c0_i32_0, %c0_i32_1 : i32, i32, i32
  }
  func.func @transform_8(%arg0: i32) -> (i32, i32) {
    %c0_i32 = arith.constant 0 : i32
    %c0_i32_0 = arith.constant 0 : i32
    %c0_i32_1 = arith.constant 0 : i32
    return %c0_i32, %c0_i32_0 : i32, i32
  }
  func.func @transform_9(%arg0: i32) -> (i32, i32, i32) {
    %c0_i32 = arith.constant 0 : i32
    %c0_i32_0 = arith.constant 0 : i32
    %c0_i32_1 = arith.constant 0 : i32
    return %arg0, %c0_i32, %c0_i32_0 : i32, i32, i32
  }
}

</mosaic_0001>

<bundles_post_ra>
// kernel: _lambda_.1
= control target key start
LH: loop header
LB: loop body
LE: loop exit
PB: predicated region body
PF: predicated region fallthrough
CT: control target
= control target key end

     0   :  { %14 = vsyncpa [#allocation6], 0  ;;  %s5506_s0 = inlined_call_operand.vmem [shape: bf16[2,9,9,16], index: 0, kind: input, shape index: {}]   ;;  %s5507_s1 = inlined_call_operand.vmem [shape: bf16[4,16,16], index: 1, kind: input, shape index: {}]   ;;  %s5508_s2 = inlined_call_operand.vmem [shape: f32[1,16], index: 2, kind: input, shape index: {}]   ;;  %s5509_s3 = inlined_call_operand.vmem [shape: bf16[4,64,32], index: 3, kind: input, shape index: {}]   ;;  %s5510_s4 = inlined_call_operand.vmem [shape: f32[1,32], index: 4, kind: input, shape index: {}]   ;;  %s5511_s5 = inlined_call_operand.vmem [shape: bf16[4,128,64], index: 5, kind: input, shape index: {}]   ;;  %s5512_s6 = inlined_call_operand.vmem [shape: f32[1,64], index: 6, kind: input, shape index: {}]   ;;  %s5513_s7 = inlined_call_operand.vmem [shape: bf16[4,256,64], index: 7, kind: input, shape index: {}]   ;;  %s5514_s8 = inlined_call_operand.vmem [shape: f32[1,64], index: 8, kind: input, shape index: {}]   ;;  %s5515_s9 = inlined_call_operand.hbm [shape: f32[2,1,64], index: 9, kind: output, shape index: {}]  }
   0x1   :  { %16 = vsyncpa [#allocation6 + $0x1], 0  ;;  %s4340_s30 = smov 0   ;;  %s4342_s10 = smov 0  }
   0x2   :  { %s4344_s11 = smov 0   ;;  %s4346_s12 = smov 0  }
   0x3 LB: > { %s4361_s13 = sadd.s32 4294967295, %s4282_s12   ;;  %s3383_s14 = sadd.s32 4294967294, %s4282_s12   ;;  %s4282_s12 = sphi %s4346_s12, %s5555_s12   ;;  %s4278_s11 = sphi %s4344_s11, %s5554_s11   ;;  %s4274_s10 = sphi %s4342_s10, %s5553_s10   ;;  %s4270_s30 = sphi %s4340_s30, %s5552_s30  }
   0x4   : > { %s4365_s15 = sadd.s32 1, %s4282_s12   ;;  %s223_s16 = sadd.s32 1, %s4278_s11 }
   0x5   : > { %s220_s17 = ssub.s32 %s4282_s12, %s4365_s15  ;;  %p233_p0 = scmp.ne.s32.totalorder %s4278_s11, %s4274_s10 }
   0x6   : > { %p221_p1 = scmp.eq.s32.totalorder %s220_s17, 0  ;;  %p234_p2 = scmp.eq.s32.totalorder %s4361_s13, 1 }
   0x7   : > { %p239_p3 = scmp.ne.s32.totalorder %s4274_s10, %s4270_s30  ;;  %p240_p4 = scmp.eq.s32.totalorder %s3383_s14, 1 }
   0x8   : > { %s4376_s18 = scalar_select %p221_p1, %s4278_s11, %s223_s16  }
   0x9   : > { %p4378_p5 = por %p234_p2, %p233_p0  ;;  %p4382_p6 = por %p240_p4, %p239_p3 }
   0xa   : > { %p3386_p7 = scmp.ge.s32.totalorder %s4282_s12, 1  ;;  %p290_p8 = scmp.lt.s32.totalorder %s4282_s12, 3 }
   0xc   : > { %p291_p9 = pnand %p3386_p7, %p290_p8 }
   0xd   : > { %p325_p10 = scmp.lt.s32.totalorder (!%p291_p9), %s4361_s13, 1  ;;  %s4284_s24 = smov (!%p291_p9), 16  }
   0xe   : > { %294 = sbr.rel (%p291_p9) target bundleno = 1800 (0x708), region = 56  ;;  %s4285_s25 = smov (!%p291_p9), 32  }
   0xf   : > { %s4286_s26 = smov (!%p291_p9), 48   ;;  %s4287_s28 = smov (!%p291_p9), 64  }
  0x10   : > { %s3324_s22 = scalar_lea.hbm (!%p291_p9), %s5515_s9, %s4361_s13  ;;  %s4240_s16 = scalar_lea.hbm (!%p291_p9), %s5515_s9, 2 }
  0x13   : > { %v4053_v0 = vld [vmem:[%s5507_s1 + $0x10] sm:$0xff]  ;;  %v4051_v1 = vld [vmem:[%s5507_s1] sm:$0xff]  ;;  %v4052_v2 = vld [vmem:[%s5507_s1 + $0x8] sm:$0xff]  ;;  %s326_s29 = scalar_select %p325_p10, %s4361_s13, 1  ;;  %vm487_vm0 = vcmask 130048   ;;  %vm775_vm5 = vcmask 516096  }
  0x14   : > { %v4054_v3 = vld [vmem:[%s5507_s1 + $0x18] sm:$0xff]  ;;  %630 = vmatpush.bf16.msra.mxu2 %v4053_v0  ;;  %574 = vmatpush.bf16.msra.mxu1 %v4051_v1  ;;  %vm351_vm1 = vsmask.f32 3328  ;;  %vm352_vm2 = vsmask.f32 7440  ;;  %vm793_vm8 = vcmask 518146  }
  0x15   : > { %507 = vmatpush.bf16.msra.mxu0 %v4052_v2  ;;  %707 = vmatpush.bf16.msra.mxu3 %v4054_v3  ;;  %s4167_s14 = smul.u32 72, %s326_s29  ;;  %vm4424_vm3 = vmor %vm351_vm1, %vm352_vm2  ;;  %vm766_vm4 = vsmask.f32 2304  ;;  %vm5516_vm6 = vsmask.f32 256  ;;  %vm834_vm10 = vcmask 1040384  }
  0x16   : > { %vm4494_vm7 = vmand %vm775_vm5, %vm5516_vm6  ;;  %vm838_vm11 = vcmask 1041409   ;;  %vm842_vm12 = vcmask 1042434   ;;  %vm846_vm13 = vcmask 1043459   ;;  %vm1016_vm14 = vcmask 1044484   ;;  %s4288_s29 = smov 96  }
  0x17   : > { %s4405_s21 = scalar_lea.vmem %s5506_s0, %s4167_s14  ;;  %vm4501_vm9 = vmand %vm793_vm8, %vm766_vm4  ;;  %vm1045_vm15 = vcmask 124928   ;;  %vm765_vm1 = vcmask 518144  }
  0x18   : > { %v333_v4 = vld [vmem:[%s4405_s21 + $0x8] sm:$0xf]  ;;  %v4409_v5 = vld [vmem:[%s4405_s21 + $0x10] sm:$0xf]  ;;  %v331_v6 = vld [vmem:[%s4405_s21] sm:$0xf] }
  0x19   : > { %v369_v7 = vshrl.u32 %v333_v4, 16  ;;  %v372_v8 = vshll.u32 %v333_v4, 16  ;;  %v383_v9 = vshrl.u32 %v4409_v5, 16  ;;  %v386_v10 = vshll.u32 %v4409_v5, 16  ;;  %v332_v11 = vld [vmem:[%s4405_s21 + $0x4] sm:$0x1] }
  0x1a   : > { %v538_v12 = vunpack.c.l.b16 %v333_v4  ;;  %v539_v13 = vunpack.c.l.b16 %v4409_v5  ;;  %v355_v14 = vshrl.u32 %v331_v6, 16  ;;  %v358_v15 = vshll.u32 %v331_v6, 16  ;;  %v334_v16 = vld [vmem:[%s4405_s21 + $0xc] sm:$0x1]  ;;  %v336_v17 = vld [vmem:[%s4405_s21 + $0x14] sm:$0x1] }
  0x1b   : > { %v371_v18 = vrot.slane %v369_v7, 4  ;;  %v374_v19 = vrot.slane %v372_v8, 5  ;;  %v385_v20 = vrot.slane %v383_v9, 4  ;;  %v388_v21 = vrot.slane %v386_v10, 5  ;;  %v337_v22 = vld [vmem:[%s4405_s21 + $0x18] sm:$0xf] }
  0x1c   : > { %v601_v23 = vpack.c.b16 %v539_v13, %v538_v12  ;;  %v357_v24 = vrot.slane %v355_v14, 4  ;;  %v360_v25 = vrot.slane %v358_v15, 5  ;;  %v537_v26 = vunpack.c.l.b16 %v331_v6  ;;  %v4429_v35 = vld [vmem:[%s4405_s21 + $0x20] sm:$0xf]  ;;  %v338_v48 = vld [vmem:[%s4405_s21 + $0x1c] sm:$0x1] }
  0x1d   : > { %v364_v27 = vshll.u32 %v332_v11, 16  ;;  %v375_v28 = vor.u32 %v374_v19, %v371_v18  ;;  %v378_v29 = vshll.u32 %v334_v16, 16  ;;  %v389_v30 = vor.u32 %v388_v21, %v385_v20  ;;  %v340_v53 = vld [vmem:[%s4405_s21 + $0x24] sm:$0x1]  ;;  %v341_v7 = vld [vmem:[%s4405_s21 + $0x28] sm:$0xf] }
  0x1e   : > { %3412 = vmatmul.msk.bf16.vlgmr.msra.gmra.mxu2 %vm487_vm0, %v601_v23  ;;  %v545_v31 = vpack.c.b16 %v538_v12, %v537_v26  ;;  %v361_v33 = vor.u32 %v360_v25, %v357_v24  ;;  %v392_v34 = vshll.u32 %v336_v17, 16  ;;  %v397_v36 = vshrl.u32 %v337_v22, 16  ;;  %v4447_v8 = vld [vmem:[%s4405_s21 + $0x30] sm:$0xf]  ;;  %v344_v23 = vld [vmem:[%s4405_s21 + $0x34] sm:$0x1] }
  0x1f   : > { %v366_v37 = vrot.slane %v364_v27, 5  ;;  %v376_v38 = vrot.slane %v375_v28, 4  ;;  %v380_v39 = vrot.slane %v378_v29, 5  ;;  %v390_v40 = vrot.slane %v389_v30, 4 }
  0x20   : > { %3402 = vmatmul.msk.bf16.vlgmr.msra.gmra.mxu1 %vm487_vm0, %v545_v31  ;;  %v362_v41 = vrot.slane %v361_v33, 4  ;;  %v394_v42 = vrot.slane %v392_v34, 5  ;;  %v399_v43 = vrot.slane %v397_v36, 4  ;;  %v400_v44 = vshll.u32 %v337_v22, 16 }
  0x21   : > { %v381_v45 = vsel %vm4424_vm3, %v376_v38, %v380_v39  ;;  %v411_v46 = vshrl.u32 %v4429_v35, 16  ;;  %v414_v47 = vshll.u32 %v4429_v35, 16  ;;  %v406_v59 = vshll.u32 %v338_v48, 16  ;;  %v347_v38 = vld [vmem:[%s4405_s21 + $0x40] sm:$0xf] }
  0x22   : > { %v367_v49 = vsel %vm4424_vm3, %v362_v41, %v366_v37  ;;  %v470_v50 = vunpack.c.l.b16 %v381_v45  ;;  %v395_v51 = vsel %vm4424_vm3, %v390_v40, %v394_v42  ;;  %v402_v52 = vrot.slane %v400_v44, 5  ;;  %v345_v37 = vld [vmem:[%s4405_s21 + $0x38] sm:$0xf] }
  0x23   : > { %v469_v54 = vunpack.c.l.b16 %v367_v49  ;;  %v471_v55 = vunpack.c.l.b16 %v395_v51  ;;  %v413_v56 = vrot.slane %v411_v46, 4  ;;  %v416_v57 = vrot.slane %v414_v47, 5 }
  0x24   : > { %v403_v58 = vor.u32 %v402_v52, %v399_v43  ;;  %v420_v63 = vshll.u32 %v340_v53, 16  ;;  %v540_v0 = vunpack.c.l.b16 %v337_v22  ;;  %v541_v1 = vunpack.c.l.b16 %v4429_v35  ;;  %v342_v22 = vld [vmem:[%s4405_s21 + $0x2c] sm:$0x1]  ;;  %v346_v53 = vld [vmem:[%s4405_s21 + $0x3c] sm:$0x1] }
  0x25   : > { %v477_v60 = vpack.c.b16 %v470_v50, %v469_v54  ;;  %v678_v61 = vpack.c.b16 %v471_v55, %v470_v50  ;;  %v417_v62 = vor.u32 %v416_v57, %v413_v56  ;;  %v408_v3 = vrot.slane %v406_v59, 5  ;;  %v348_v54 = vld [vmem:[%s4405_s21 + $0x44] sm:$0x1] }
  0x26   : > { %v404_v2 = vrot.slane %v403_v58, 4  ;;  %v422_v6 = vrot.slane %v420_v63, 5  ;;  %v602_v9 = vpack.c.b16 %v541_v1, %v540_v0  ;;  %v546_v10 = vpack.c.b16 %v540_v0, %v539_v13 }
  0x27   : > { %3394 = vmatmul.msk.bf16.vlgmr.msra.gmra.mxu0 %vm487_vm0, %v477_v60  ;;  %3422 = vmatmul.msk.bf16.vlgmr.msra.gmra.mxu3 %vm487_vm0, %v678_v61  ;;  %v418_v4 = vrot.slane %v417_v62, 4  ;;  %v425_v11 = vshrl.u32 %v341_v7, 16  ;;  %v428_v12 = vshll.u32 %v341_v7, 16  ;;  %v439_v16 = vshrl.u32 %v4447_v8, 16 }
  0x28   : > { %v409_v14 = vsel %vm4424_vm3, %v404_v2, %v408_v3  ;;  %v442_v17 = vshll.u32 %v4447_v8, 16  ;;  %v434_v27 = vshll.u32 %v342_v22, 16  ;;  %v448_v29 = vshll.u32 %v344_v23, 16 }
  0x29   : > { %v423_v15 = vsel %vm4424_vm3, %v418_v4, %v422_v6  ;;  %v472_v18 = vunpack.c.l.b16 %v409_v14  ;;  %v427_v5 = vrot.slane %v425_v11, 4  ;;  %v430_v13 = vrot.slane %v428_v12, 5 }
  0x2a   : > { %v473_v19 = vunpack.c.l.b16 %v423_v15  ;;  %v441_v20 = vrot.slane %v439_v16, 4  ;;  %v444_v21 = vrot.slane %v442_v17, 5  ;;  %v542_v30 = vunpack.c.l.b16 %v341_v7 }
  0x2b   : > { %v478_v24 = vpack.c.b16 %v472_v18, %v471_v55  ;;  %v431_v26 = vor.u32 %v430_v13, %v427_v5  ;;  %v543_v31 = vunpack.c.l.b16 %v4447_v8  ;;  %v436_v34 = vrot.slane %v434_v27, 5 }
  0x2c   : > { %v679_v25 = vpack.c.b16 %v473_v19, %v472_v18  ;;  %v445_v28 = vor.u32 %v444_v21, %v441_v20  ;;  %v450_v36 = vrot.slane %v448_v29, 5  ;;  %v547_v40 = vpack.c.b16 %v542_v30, %v541_v1  ;;  %v798_v29 = vld [vmem:[#allocation2 + $0x4] sm:$0x4] }
  0x2d   : > { %v432_v33 = vrot.slane %v431_v26, 4  ;;  %v603_v39 = vpack.c.b16 %v543_v31, %v542_v30  ;;  %v453_v41 = vshrl.u32 %v345_v37, 16  ;;  %v456_v42 = vshll.u32 %v345_v37, 16 }
  0x2e   : > { %3413 = vmatmul.msk.bf16.gmra.mxu2 %vm487_vm0, %v602_v9  ;;  %v446_v35 = vrot.slane %v445_v28, 4  ;;  %v661_v45 = vshrl.u32 %v347_v38, 16  ;;  %v664_v46 = vshll.u32 %v347_v38, 16  ;;  %v462_v58 = vshll.u32 %v346_v53, 16  ;;  %v781_v28 = vld [vmem:[#allocation2 + $0x4] sm:$0x1] }
  0x2f   : > { %v437_v43 = vsel %vm4424_vm3, %v432_v33, %v436_v34  ;;  %v455_v49 = vrot.slane %v453_v41, 4  ;;  %v458_v50 = vrot.slane %v456_v42, 5  ;;  %v670_v60 = vshll.u32 %v348_v54, 16 }
  0x30   : > { %3403 = vmatmul.msk.bf16.gmra.mxu1 %vm487_vm0, %v546_v10  ;;  %v451_v44 = vsel %vm4424_vm3, %v446_v35, %v450_v36  ;;  %v474_v47 = vunpack.c.l.b16 %v437_v43  ;;  %v663_v51 = vrot.slane %v661_v45, 4  ;;  %v666_v52 = vrot.slane %v664_v46, 5 }
  0x31   : > { %v475_v48 = vunpack.c.l.b16 %v451_v44  ;;  %v459_v57 = vor.u32 %v458_v50, %v455_v49  ;;  %v544_v61 = vunpack.c.l.b16 %v345_v37  ;;  %v600_v62 = vunpack.c.l.b16 %v347_v38 }
  0x32   : > { %v479_v55 = vpack.c.b16 %v474_v47, %v473_v19  ;;  %v667_v59 = vor.u32 %v666_v52, %v663_v51  ;;  %v464_v0 = vrot.slane %v462_v58, 5  ;;  %v672_v2 = vrot.slane %v670_v60, 5  ;;  %v4487_v19 = vld [vmem:[%s5508_s2] ss:$0 sm:$0xff]  ;;  %v784_v58 = vld [vmem:[#allocation2 + $0x8] sm:$0x1] }
  0x33   : > { %v680_v56 = vpack.c.b16 %v475_v48, %v474_v47  ;;  %v460_v63 = vrot.slane %v459_v57, 4  ;;  %v604_v3 = vpack.c.b16 %v600_v62, %v544_v61  ;;  %v548_v4 = vpack.c.b16 %v544_v61, %v543_v31 }
  0x34   : > { %v668_v1 = vrot.slane %v667_v59, 4  ;;  %v782_v31 = vsel %vm4494_vm7, 0, %v781_v28  ;;  %v799_v35 = vsel %vm4501_vm9, 0, %v798_v29  ;;  %v801_v59 = vld [vmem:[#allocation2 + $0x8] sm:$0x4]  ;;  %v785_v62 = vsel %vm4494_vm7, 0, %v784_v58 }
  0x35   : > { %v465_v6 = vsel %vm4424_vm3, %v460_v63, %v464_v0  ;;  %783 = vst [vmem:[#allocation2 + $0x4] sm:$0x1] %v782_v31  ;;  %v802_v63 = vsel %vm4501_vm9, 0, %v801_v59 }
  0x36   : > { %v673_v7 = vsel %vm4424_vm3, %v668_v1, %v672_v2  ;;  %v476_v8 = vunpack.c.l.b16 %v465_v6  ;;  %800 = vst [vmem:[#allocation2 + $0x4] sm:$0x4] %v799_v35  ;;  %vm4576_vm3 = vmand %vm765_vm1, %vm766_vm4  ;;  %vm1165_vm4 = vcmask 255104   ;;  %vm1459_vm1 = vsmask.f32 3336 }
  0x37   : > { %3395 = vmatmul.msk.bf16.gmra.mxu0 %vm487_vm0, %v478_v24  ;;  %3423 = vmatmul.msk.bf16.gmra.mxu3 %vm487_vm0, %v679_v25  ;;  %v677_v9 = vunpack.c.l.b16 %v673_v7  ;;  %786 = vst [vmem:[#allocation2 + $0x8] sm:$0x1] %v785_v62 }
  0x38   : > { %v480_v10 = vpack.c.b16 %v476_v8, %v475_v48  ;;  %803 = vst [vmem:[#allocation2 + $0x8] sm:$0x4] %v802_v63 }
  0x39   : > { %v681_v11 = vpack.c.b16 %v677_v9, %v476_v8 }
  0x3d   : > { %v1048_v59 = vld [vmem:[#allocation2 + $0x4] sm:$0x7] }
  0x3e   : > { %3414 = vmatmul.msk.bf16.gmra.mxu2 %vm487_vm0, %v603_v39 }
  0x40   : > { %3404 = vmatmul.msk.bf16.gmra.mxu1 %vm487_vm0, %v547_v40 }
  0x47   : > { %3396 = vmatmul.msk.bf16.gmra.mxu0 %vm487_vm0, %v479_v55  ;;  %3424 = vmatmul.msk.bf16.gmra.mxu3 %vm487_vm0, %v680_v56 }
  0x4e   : > { %3415 = vmatmul.msk.bf16.gmra.mxu2 %vm487_vm0, %v604_v3 }
  0x50   : > { %3405 = vmatmul.msk.bf16.gmra.mxu1 %vm487_vm0, %v548_v4 }
  0x57   : > { %3397 = vmatmul.msk.bf16.gmra.mxu0 %vm487_vm0, %v480_v10  ;;  %3425 = vmatmul.msk.bf16.gmra.mxu3 %vm487_vm0, %v681_v11  ;;  %vm1046_vm0 = vsmask.f32 2306 }
  0x58   : > { %vm4569_vm2 = vmand %vm1045_vm15, %vm1046_vm0  ;;  %vm1436_vm15 = vcmask 1043458  }
  0x9d   : > { %v576_v12 = vpop.f32.mrf.mxu1 }
  0xa1   : > { %v632_v14 = vpop.f32.mrf.mxu2 }
  0xa4   : > { %v509_v15 = vpop.f32.mrf.mxu0 }
  0xa5   : > { %v577_v16 = vadd.f32 %v576_v12, %v509_v15  ;;  %v578_v17 = vpop.f32.mrf.mxu1 }
  0xa7   : > { %v652_v18 = vadd.f32 %v632_v14, %v577_v16 }
  0xa9   : > { %v634_v32 = vpop.f32.mrf.mxu2 }
  0xaa   : > { %v709_v5 = vpop.f32.mrf.mxu3 }
  0xab   : > { %v729_v13 = vadd.f32 %v709_v5, %v652_v18 }
  0xac   : > { %v511_v20 = vpop.f32.mrf.mxu0 }
  0xad   : > { %v4490_v21 = vadd.f32 %v4487_v19, %v729_v13  ;;  %v579_v22 = vadd.f32 %v578_v17, %v511_v20  ;;  %v581_v23 = vpop.f32.mrf.mxu1 }
  0xaf   : > { %v653_v25 = vadd.f32 %v634_v32, %v579_v22 }
  0xb1   : > { %v637_v24 = vpop.f32.mrf.mxu2 }
  0xb2   : > { %v711_v26 = vpop.f32.mrf.mxu3 }
  0xb3   : > { %v730_v30 = vadd.f32 %v711_v26, %v653_v25 }
  0xb4   : > { %v514_v34 = vpop.f32.mrf.mxu0 }
  0xb5   : > { %v742_v36 = vadd.f32 %v4487_v19, %v730_v30  ;;  %v582_v37 = vadd.f32 %v581_v23, %v514_v34  ;;  %v583_v38 = vpop.f32.mrf.mxu1 }
  0xb7   : > { %v750_v39 = vmul.f32 0.2, %v742_v36  ;;  %v654_v41 = vadd.f32 %v637_v24, %v582_v37  ;;  %v804_v37 = vld [vmem:[#allocation2 + $0xc] sm:$0x4] }
  0xb9   : > { %v639_v40 = vpop.f32.mrf.mxu2  ;;  %v758_v42 = vmax.f32 %v742_v36, %v750_v39  ;;  %v787_v36 = vld [vmem:[#allocation2 + $0xc] sm:$0x1] }
  0xba   : > { %v714_v43 = vpop.f32.mrf.mxu3 }
  0xbb   : > { %v731_v44 = vadd.f32 %v714_v43, %v654_v41  ;;  %v811_v45 = vpack.c.bf16 %v758_v42, %v758_v42  ;;  %v805_v41 = vsel %vm4501_vm9, 0, %v804_v37 }
  0xbc   : > { %v516_v46 = vpop.f32.mrf.mxu0  ;;  %806 = vst [vmem:[#allocation2 + $0xc] sm:$0x4] %v805_v41 }
  0xbd   : > { %v4509_v47 = vadd.f32 %v4487_v19, %v731_v44  ;;  %v584_v48 = vadd.f32 %v583_v38, %v516_v46  ;;  %v827_v49 = vrot.slane %v811_v45, 3  ;;  %v586_v50 = vpop.f32.mrf.mxu1 }
  0xbf   : > { %v4512_v51 = vsel %vm834_vm10, %v811_v45, %v827_v49  ;;  %v4515_v52 = vsel %vm838_vm11, %v811_v45, %v827_v49  ;;  %v655_v54 = vadd.f32 %v639_v40, %v584_v48  ;;  %v4522_v60 = vsel %vm842_vm12, %v811_v45, %v827_v49 }
  0xc0   : > { %v855_v53 = vrot.slane %v4515_v52, 1  ;;  %934 = vst [vmem:[#allocation1] ss:$4 sm:$0xff] %v4512_v51  ;;  %v4530_v2 = vsel %vm846_vm13, %v811_v45, %v827_v49  ;;  %v858_v3 = vrot.slane %v4522_v60, 2  ;;  %v788_v40 = vsel %vm4494_vm7, 0, %v787_v36 }
  0xc1   : > { %v642_v55 = vpop.f32.mrf.mxu2  ;;  %v861_v8 = vrot.slane %v4530_v2, 3  ;;  %789 = vst [vmem:[#allocation2 + $0xc] sm:$0x1] %v788_v40 }
  0xc2   : > { %v716_v56 = vpop.f32.mrf.mxu3  ;;  %939 = vst [vmem:[#allocation1 + $0x20] ss:$4 sm:$0xff] %v855_v53 }
  0xc3   : > { %v732_v57 = vadd.f32 %v716_v56, %v655_v54 }
  0xc4   : > { %v519_v61 = vpop.f32.mrf.mxu0 }
  0xc5   : > { %v744_v0 = vadd.f32 %v4487_v19, %v732_v57  ;;  %v587_v1 = vadd.f32 %v586_v50, %v519_v61  ;;  %v588_v6 = vpop.f32.mrf.mxu1 }
  0xc7   : > { %v935_v4 = vld [vmem:[#allocation1] sm:$0xf]  ;;  %v656_v7 = vadd.f32 %v642_v55, %v587_v1  ;;  %v752_v9 = vmul.f32 0.2, %v744_v0 }
  0xc8   : > { %943 = vst [vmem:[#allocation1] ss:$4 sm:$0xff] %v858_v3  ;;  %v995_v39 = vunpack.c.l.b16 %v935_v4  ;;  %v772_v4 = vld [vmem:[#allocation2 + $0x10] sm:$0x7] }
  0xc9   : > { %v940_v10 = vld [vmem:[#allocation1 + $0x20] sm:$0xf]  ;;  %v760_v12 = vmax.f32 %v744_v0, %v752_v9  ;;  %v644_v15 = vpop.f32.mrf.mxu2 }
  0xca   : > { %v719_v11 = vpop.f32.mrf.mxu3  ;;  %947 = vst [vmem:[#allocation1 + $0x20] ss:$4 sm:$0xff] %v861_v8  ;;  %v996_v5 = vunpack.c.l.b16 %v940_v10 }
  0xcb   : > { %v733_v14 = vadd.f32 %v719_v11, %v656_v7  ;;  %v813_v17 = vpack.c.bf16 %v760_v12, %v760_v12 }
  0xcc   : > { %v521_v16 = vpop.f32.mrf.mxu0  ;;  %v1011_v30 = vrot.slane %v996_v5, 7 }
  0xcd   : > { %v4539_v18 = vadd.f32 %v4487_v19, %v733_v14  ;;  %v589_v32 = vadd.f32 %v588_v6, %v521_v16  ;;  %v829_v13 = vrot.slane %v813_v17, 3  ;;  %v591_v28 = vpop.f32.mrf.mxu1 }
  0xce   : > { %v1012_v48 = vsel %vm842_vm12, %v1011_v30, %v995_v39 }
  0xcf   : > { %v944_v20 = vld [vmem:[#allocation1] sm:$0xf]  ;;  %v4542_v22 = vsel %vm834_vm10, %v813_v17, %v829_v13  ;;  %v4545_v23 = vsel %vm838_vm11, %v813_v17, %v829_v13  ;;  %v657_v24 = vadd.f32 %v644_v15, %v589_v32  ;;  %v4557_v45 = vsel %vm842_vm12, %v813_v17, %v829_v13 }
  0xd0   : > { %v879_v26 = vrot.slane %v4545_v23, 1  ;;  %950 = vst [vmem:[#allocation1] ss:$4 sm:$0xff] %v4542_v22  ;;  %v997_v34 = vunpack.c.l.b16 %v944_v20  ;;  %v4561_v50 = vsel %vm846_vm13, %v813_v17, %v829_v13  ;;  %v882_v57 = vrot.slane %v4557_v45, 2 }
  0xd1   : > { %v948_v25 = vld [vmem:[#allocation1 + $0x20] sm:$0xf]  ;;  %v647_v46 = vpop.f32.mrf.mxu2  ;;  %v885_v61 = vrot.slane %v4561_v50, 3  ;;  %v773_v15 = vsel %vm4576_vm3, 0, %v772_v4  ;;  %v1051_v4 = vld [vmem:[#allocation2 + $0x8] sm:$0x7] }
  0xd2   : > { %v721_v29 = vpop.f32.mrf.mxu3  ;;  %v998_v35 = vunpack.c.l.b16 %v948_v25  ;;  %954 = vst [vmem:[#allocation1 + $0x20] ss:$4 sm:$0xff] %v879_v26  ;;  %v1013_v44 = vrot.slane %v997_v34, 6 }
  0xd3   : > { %v734_v31 = vadd.f32 %v721_v29, %v657_v24  ;;  %774 = vst [vmem:[#allocation2 + $0x10] sm:$0x7] %v773_v15 }
  0xd4   : > { %v524_v38 = vpop.f32.mrf.mxu0  ;;  %v1015_v49 = vrot.slane %v998_v35, 5  ;;  %v1014_v56 = vsel %vm846_vm13, %v1013_v44, %v1012_v48 }
  0xd5   : > { %v746_v42 = vadd.f32 %v4487_v19, %v734_v31  ;;  %v592_v43 = vadd.f32 %v591_v28, %v524_v38  ;;  %v593_v12 = vpop.f32.mrf.mxu1 }
  0xd6   : > { %v1017_v0 = vsel %vm1016_vm14, %v1015_v49, %v1014_v56 }
  0xd7   : > { %v754_v54 = vmul.f32 0.2, %v746_v42  ;;  %v658_v55 = vadd.f32 %v647_v46, %v592_v43  ;;  %v951_v62 = vld [vmem:[#allocation1] sm:$0xf]  ;;  %v1036_v11 = vpack.c.b16 %v1017_v0, %v1017_v0 }
  0xd8   : > { %958 = vst [vmem:[#allocation1] ss:$4 sm:$0xff] %v882_v57  ;;  %v999_v38 = vunpack.c.l.b16 %v951_v62 }
  0xd9   : > { %v762_v58 = vmax.f32 %v746_v42, %v754_v54  ;;  %v955_v6 = vld [vmem:[#allocation1 + $0x20] sm:$0xf]  ;;  %v1049_v5 = vsel %vm4569_vm2, %v1036_v11, %v1048_v59  ;;  %v649_v28 = vpop.f32.mrf.mxu2 }
  0xda   : > { %v724_v63 = vpop.f32.mrf.mxu3  ;;  %962 = vst [vmem:[#allocation1 + $0x20] ss:$4 sm:$0xff] %v885_v61  ;;  %v1000_v13 = vunpack.c.l.b16 %v955_v6  ;;  %v790_v40 = vld [vmem:[#allocation2 + $0x10] sm:$0x1]  ;;  %v807_v41 = vld [vmem:[#allocation2 + $0x10] sm:$0x4] }
  0xdb   : > { %v815_v7 = vpack.c.bf16 %v762_v58, %v762_v58  ;;  %v735_v9 = vadd.f32 %v724_v63, %v658_v55  ;;  %1050 = vst [vmem:[#allocation2 + $0x4] sm:$0x7] %v1049_v5  ;;  %v791_v44 = vsel %vm4494_vm7, 0, %v790_v40  ;;  %v808_v46 = vsel %vm4501_vm9, 0, %v807_v41  ;;  %v1054_v41 = vld [vmem:[#allocation2 + $0xc] sm:$0x7] }
  0xdc   : > { %v526_v14 = vpop.f32.mrf.mxu0  ;;  %v1018_v34 = vrot.slane %v1000_v13, 7  ;;  %792 = vst [vmem:[#allocation2 + $0x10] sm:$0x1] %v791_v44 }
  0xdd   : > { %v831_v16 = vrot.slane %v815_v7, 3  ;;  %v4585_v17 = vadd.f32 %v4487_v19, %v735_v9  ;;  %v594_v32 = vadd.f32 %v593_v12, %v526_v14  ;;  %809 = vst [vmem:[#allocation2 + $0x10] sm:$0x4] %v808_v46 }
  0xde   : > { %v1019_v49 = vsel %vm842_vm12, %v1018_v34, %v999_v38 }
  0xdf   : > { %v4590_v20 = vsel %vm838_vm11, %v815_v7, %v831_v16  ;;  %v4593_v24 = vsel %vm834_vm10, %v815_v7, %v831_v16  ;;  %v659_v29 = vadd.f32 %v649_v28, %v594_v32  ;;  %v959_v30 = vld [vmem:[#allocation1] sm:$0xf]  ;;  %v4605_v48 = vsel %vm842_vm12, %v815_v7, %v831_v16 }
  0xe0   : > { %v903_v25 = vrot.slane %v4590_v20, 1  ;;  %965 = vst [vmem:[#allocation1] ss:$4 sm:$0xff] %v4593_v24  ;;  %v1001_v37 = vunpack.c.l.b16 %v959_v30  ;;  %v4609_v55 = vsel %vm846_vm13, %v815_v7, %v831_v16  ;;  %v906_v58 = vrot.slane %v4605_v48, 2 }
  0xe1   : > { %v963_v35 = vld [vmem:[#allocation1 + $0x20] sm:$0xf]  ;;  %v909_v62 = vrot.slane %v4609_v55, 3 }
  0xe2   : > { %v726_v31 = vpop.f32.mrf.mxu3  ;;  %969 = vst [vmem:[#allocation1 + $0x20] ss:$4 sm:$0xff] %v903_v25  ;;  %v1002_v39 = vunpack.c.l.b16 %v963_v35  ;;  %v1020_v43 = vrot.slane %v1001_v37, 6 }
  0xe3   : > { %v736_v36 = vadd.f32 %v726_v31, %v659_v29 }
  0xe4   : > { %v1022_v54 = vrot.slane %v1002_v39, 5 }
  0xe5   : > { %v748_v42 = vadd.f32 %v4487_v19, %v736_v36  ;;  %v1021_v19 = vsel %vm846_vm13, %v1020_v43, %v1019_v49 }
  0xe6   : > { %v1023_v0 = vsel %vm1016_vm14, %v1022_v54, %v1021_v19 }
  0xe7   : > { %v756_v56 = vmul.f32 0.2, %v748_v42  ;;  %v966_v63 = vld [vmem:[#allocation1] sm:$0xf]  ;;  %v1037_v7 = vpack.c.b16 %v1023_v0, %v1023_v0 }
  0xe8   : > { %973 = vst [vmem:[#allocation1] ss:$4 sm:$0xff] %v906_v58  ;;  %v1003_v30 = vunpack.c.l.b16 %v966_v63 }
  0xe9   : > { %v764_v59 = vmax.f32 %v748_v42, %v756_v56  ;;  %v970_v6 = vld [vmem:[#allocation1 + $0x20] sm:$0xf]  ;;  %v1052_v12 = vsel %vm4569_vm2, %v1037_v7, %v1051_v4 }
  0xea   : > { %977 = vst [vmem:[#allocation1 + $0x20] ss:$4 sm:$0xff] %v909_v62  ;;  %v1004_v14 = vunpack.c.l.b16 %v970_v6 }
  0xeb   : > { %v817_v9 = vpack.c.bf16 %v764_v59, %v764_v59  ;;  %1053 = vst [vmem:[#allocation2 + $0x8] sm:$0x7] %v1052_v12 }
  0xec   : > { %v1024_v13 = vrot.slane %v1004_v14, 7  ;;  %v1057_v14 = vld [vmem:[#allocation2 + $0x10] sm:$0x7] }
  0xed   : > { %v833_v11 = vrot.slane %v817_v9, 3 }
  0xee   : > { %v1025_v36 = vsel %vm842_vm12, %v1024_v13, %v1003_v30 }
  0xef   : > { %v4622_v15 = vsel %vm838_vm11, %v817_v9, %v833_v11  ;;  %v4625_v16 = vsel %vm834_vm10, %v817_v9, %v833_v11  ;;  %v974_v5 = vld [vmem:[#allocation1] sm:$0xf]  ;;  %v4632_v35 = vsel %vm842_vm12, %v817_v9, %v833_v11  ;;  %v4636_v38 = vsel %vm846_vm13, %v817_v9, %v833_v11 }
  0xf0   : > { %v927_v32 = vrot.slane %v4622_v15, 1  ;;  %980 = vst [vmem:[#allocation1] ss:$4 sm:$0xff] %v4625_v16  ;;  %v1005_v29 = vunpack.c.l.b16 %v974_v5  ;;  %v930_v42 = vrot.slane %v4632_v35, 2  ;;  %v933_v44 = vrot.slane %v4636_v38, 3 }
  0xf1   : > { %v978_v28 = vld [vmem:[#allocation1 + $0x20] sm:$0xf] }
  0xf2   : > { %984 = vst [vmem:[#allocation1 + $0x20] ss:$4 sm:$0xff] %v927_v32  ;;  %v1006_v31 = vunpack.c.l.b16 %v978_v28  ;;  %v1026_v34 = vrot.slane %v1005_v29, 6 }
  0xf4   : > { %v1028_v37 = vrot.slane %v1006_v31, 5  ;;  %v1027_v39 = vsel %vm846_vm13, %v1026_v34, %v1025_v36 }
  0xf6   : > { %v1029_v40 = vsel %vm1016_vm14, %v1028_v37, %v1027_v39 }
  0xf7   : > { %v1038_v43 = vpack.c.b16 %v1029_v40, %v1029_v40  ;;  %v981_v46 = vld [vmem:[#allocation1] sm:$0xf] }
  0xf8   : > { %988 = vst [vmem:[#allocation1] ss:$4 sm:$0xff] %v930_v42  ;;  %v1007_v4 = vunpack.c.l.b16 %v981_v46 }
  0xf9   : > { %v985_v49 = vld [vmem:[#allocation1 + $0x20] sm:$0xf]  ;;  %v1055_v54 = vsel %vm4569_vm2, %v1038_v43, %v1054_v41 }
  0xfa   : > { %992 = vst [vmem:[#allocation1 + $0x20] ss:$4 sm:$0xff] %v933_v44  ;;  %v1008_v56 = vunpack.c.l.b16 %v985_v49 }
  0xfb   : > { %1056 = vst [vmem:[#allocation2 + $0xc] sm:$0x7] %v1055_v54 }
  0xfc   : > { %v1030_v59 = vrot.slane %v1008_v56, 7 }
  0xfe   : > { %v1031_v7 = vsel %vm842_vm12, %v1030_v59, %v1007_v4 }
  0xff   : > { %v989_v19 = vld [vmem:[#allocation1] sm:$0xf] }
 0x100   : > { %1060 = vst [vmem:[#allocation1] ss:$4 sm:$0xff] %v4512_v51  ;;  %v1009_v0 = vunpack.c.l.b16 %v989_v19 }
 0x101   : > { %v993_v63 = vld [vmem:[#allocation1 + $0x20] sm:$0xf] }
 0x102   : > { %1064 = vst [vmem:[#allocation1 + $0x20] ss:$4 sm:$0xff] %v855_v53  ;;  %v1010_v6 = vunpack.c.l.b16 %v993_v63  ;;  %v1032_v9 = vrot.slane %v1009_v0, 6 }
 0x104   : > { %v1034_v11 = vrot.slane %v1010_v6, 5  ;;  %v1033_v12 = vsel %vm846_vm13, %v1032_v9, %v1031_v7 }
 0x106   : > { %v1035_v5 = vsel %vm1016_vm14, %v1034_v11, %v1033_v12 }
 0x107   : > { %v1039_v13 = vpack.c.b16 %v1035_v5, %v1035_v5  ;;  %v1061_v28 = vld [vmem:[#allocation1] sm:$0xf] }
 0x108   : > { %1067 = vst [vmem:[#allocation1] ss:$4 sm:$0xff] %v858_v3  ;;  %v1109_v36 = vunpack.c.l.b16 %v1061_v28 }
 0x109   : > { %v1065_v29 = vld [vmem:[#allocation1 + $0x20] sm:$0xf]  ;;  %v1058_v51 = vsel %vm4569_vm2, %v1039_v13, %v1057_v14 }
 0x10a   : > { %1070 = vst [vmem:[#allocation1 + $0x20] ss:$4 sm:$0xff] %v861_v8  ;;  %v1110_v52 = vunpack.c.l.b16 %v1065_v29 }
 0x10b   : > { %1059 = vst [vmem:[#allocation2 + $0x10] sm:$0x7] %v1058_v51 }
 0x10c   : > { %v1125_v30 = vrot.slane %v1110_v52, 7 }
 0x10e   : > { %v1126_v1 = vsel %vm838_vm11, %v1125_v30, %v1109_v36 }
 0x10f   : > { %v1068_v53 = vld [vmem:[#allocation1] sm:$0xf] }
 0x110   : > { %1073 = vst [vmem:[#allocation1] ss:$4 sm:$0xff] %v4542_v22  ;;  %v1111_v34 = vunpack.c.l.b16 %v1068_v53 }
 0x111   : > { %v1071_v31 = vld [vmem:[#allocation1 + $0x20] sm:$0xf] }
 0x112   : > { %1076 = vst [vmem:[#allocation1 + $0x20] ss:$4 sm:$0xff] %v879_v26  ;;  %v1112_v60 = vunpack.c.l.b16 %v1071_v31  ;;  %v1127_v3 = vrot.slane %v1111_v34, 6 }
 0x114   : > { %v1129_v37 = vrot.slane %v1112_v60, 5  ;;  %v1128_v2 = vsel %vm842_vm12, %v1127_v3, %v1126_v1  ;;  %v753_v3 = vmul.f32 0.2, %v4539_v18 }
 0x116   : > { %v1130_v8 = vsel %vm846_vm13, %v1129_v37, %v1128_v2 }
 0x117   : > { %v1149_v39 = vpack.c.b16 %v1130_v8, %v1130_v8  ;;  %v1074_v40 = vld [vmem:[#allocation1] sm:$0xf] }
 0x118   : > { %1079 = vst [vmem:[#allocation1] ss:$4 sm:$0xff] %v882_v57  ;;  %v1113_v49 = vunpack.c.l.b16 %v1074_v40 }
 0x119   : > { %v1077_v41 = vld [vmem:[#allocation1 + $0x20] sm:$0xf]  ;;  %1153 = vrot.lane.b32.xlu0 %v1149_v39, %s4284_s24  ;;  %v761_v39 = vmax.f32 %v4539_v18, %v753_v3 }
 0x11a   : > { %1082 = vst [vmem:[#allocation1 + $0x20] ss:$4 sm:$0xff] %v885_v61  ;;  %v1114_v22 = vunpack.c.l.b16 %v1077_v41 }
 0x11b   : > { %v814_v18 = vpack.c.bf16 %v761_v39, %v761_v39 }
 0x11c   : > { %v1131_v26 = vrot.slane %v1114_v22, 7 }
 0x11e   : > { %v1132_v57 = vsel %vm838_vm11, %v1131_v26, %v1113_v49 }
 0x11f   : > { %v1080_v23 = vld [vmem:[#allocation1] sm:$0xf] }
 0x120   : > { %1085 = vst [vmem:[#allocation1] ss:$4 sm:$0xff] %v4593_v24  ;;  %v1115_v46 = vunpack.c.l.b16 %v1080_v23  ;;  %v749_v24 = vmul.f32 0.2, %v4490_v21 }
 0x121   : > { %v1083_v43 = vld [vmem:[#allocation1 + $0x20] sm:$0xf] }
 0x122   : > { %1088 = vst [vmem:[#allocation1 + $0x20] ss:$4 sm:$0xff] %v903_v25  ;;  %v1116_v54 = vunpack.c.l.b16 %v1083_v43  ;;  %v1133_v45 = vrot.slane %v1115_v46, 6  ;;  %v757_v4 = vmax.f32 %v4490_v21, %v749_v24 }
 0x124   : > { %v1135_v56 = vrot.slane %v1116_v54, 5  ;;  %v1134_v19 = vsel %vm842_vm12, %v1133_v45, %v1132_v57  ;;  %v810_v11 = vpack.c.bf16 %v757_v4, %v757_v4 }
 0x126   : > { %v1136_v50 = vsel %vm846_vm13, %v1135_v56, %v1134_v19  ;;  %v826_v13 = vrot.slane %v810_v11, 3 }
 0x127   : > { %v1150_v61 = vpack.c.b16 %v1136_v50, %v1136_v50  ;;  %v1086_v59 = vld [vmem:[#allocation1] sm:$0xf] }
 0x128   : > { %1091 = vst [vmem:[#allocation1] ss:$4 sm:$0xff] %v906_v58  ;;  %v1117_v48 = vunpack.c.l.b16 %v1086_v59  ;;  %v4700_v15 = vsel %vm838_vm11, %v810_v11, %v826_v13  ;;  %v4704_v28 = vsel %vm834_vm10, %v810_v11, %v826_v13  ;;  %v4716_v38 = vsel %vm842_vm12, %v810_v11, %v826_v13 }
 0x129   : > { %v1089_v63 = vld [vmem:[#allocation1 + $0x20] sm:$0xf]  ;;  %1155 = vrot.lane.b32.xlu0 %v1150_v61, %s4284_s24  ;;  %v841_v29 = vrot.slane %v4700_v15, 1  ;;  %v845_v53 = vrot.slane %v4716_v38, 2  ;;  %v830_v59 = vrot.slane %v814_v18, 3 }
 0x12a   : > { %1094 = vst [vmem:[#allocation1 + $0x20] ss:$4 sm:$0xff] %v909_v62  ;;  %v1118_v20 = vunpack.c.l.b16 %v1089_v63 }
 0x12c   : > { %v1137_v0 = vrot.slane %v1118_v20, 7  ;;  %v755_v20 = vmul.f32 0.2, %v4585_v17 }
 0x12e   : > { %v1138_v55 = vsel %vm838_vm11, %v1137_v0, %v1117_v48  ;;  %v4760_v0 = vsel %vm834_vm10, %v814_v18, %v830_v59 }
 0x12f   : > { %v1092_v25 = vld [vmem:[#allocation1] sm:$0xf] }
 0x130   : > { %1097 = vst [vmem:[#allocation1] ss:$4 sm:$0xff] %v4625_v16  ;;  %v1119_v9 = vunpack.c.l.b16 %v1092_v25  ;;  %v4757_v25 = vsel %vm838_vm11, %v814_v18, %v830_v59 }
 0x131   : > { %v1095_v6 = vld [vmem:[#allocation1 + $0x20] sm:$0xf]  ;;  %v891_v4 = vrot.slane %v4757_v25, 1 }
 0x132   : > { %1100 = vst [vmem:[#allocation1 + $0x20] ss:$4 sm:$0xff] %v927_v32  ;;  %v1120_v58 = vunpack.c.l.b16 %v1095_v6  ;;  %v1139_v7 = vrot.slane %v1119_v9, 6  ;;  %v751_v32 = vmul.f32 0.2, %v4509_v47  ;;  %v763_v6 = vmax.f32 %v4585_v17, %v755_v20 }
 0x133   : > { %v4772_v17 = vsel %vm846_vm13, %v814_v18, %v830_v59 }
 0x134   : > { %v1141_v62 = vrot.slane %v1120_v58, 5  ;;  %v1140_v12 = vsel %vm842_vm12, %v1139_v7, %v1138_v55  ;;  %v759_v35 = vmax.f32 %v4509_v47, %v751_v32 }
 0x136   : > { %v1142_v14 = vsel %vm846_vm13, %v1141_v62, %v1140_v12  ;;  %v812_v52 = vpack.c.bf16 %v759_v35, %v759_v35  ;;  %v4768_v12 = vsel %vm842_vm12, %v814_v18, %v830_v59 }
 0x137   : > { %v1151_v5 = vpack.c.b16 %v1142_v14, %v1142_v14  ;;  %v4690_v21 = vld [vmem:[#allocation1] sm:$0xf]  ;;  %v816_v14 = vpack.c.bf16 %v763_v6, %v763_v6 }
 0x138   : > { %1103 = vst [vmem:[#allocation1] ss:$4 sm:$0xff] %v930_v42  ;;  %v828_v47 = vrot.slane %v812_v52, 3 }
 0x139   : > { %v4692_v16 = vld [vmem:[#allocation1 + $0x20] sm:$0xf]  ;;  %1157 = vrot.lane.b32.xlu1 %v1151_v5, %s4284_s24 }
 0x13a   : > { %1106 = vst [vmem:[#allocation1 + $0x20] ss:$4 sm:$0xff] %v933_v44  ;;  %v4719_v44 = vsel %vm846_vm13, %v810_v11, %v826_v13  ;;  %v4728_v60 = vsel %vm838_vm11, %v812_v52, %v828_v47  ;;  %v4732_v1 = vsel %vm834_vm10, %v812_v52, %v828_v47  ;;  %v4740_v43 = vsel %vm842_vm12, %v812_v52, %v828_v47 }
 0x13b   : > { %v849_v30 = vrot.slane %v4719_v44, 3  ;;  %v867_v37 = vrot.slane %v4728_v60, 1  ;;  %v4744_v54 = vsel %vm846_vm13, %v812_v52, %v828_v47  ;;  %v870_v56 = vrot.slane %v4740_v43, 2 }
 0x13c   : > { %v873_v50 = vrot.slane %v4744_v54, 3  ;;  %v894_v52 = vrot.slane %v4768_v12, 2  ;;  %v897_v47 = vrot.slane %v4772_v17, 3 }
 0x13f   : > { %v4707_v51 = vld [vmem:[#allocation1] sm:$0xf] }
 0x140   : > { %1170 = vst [vmem:[#allocation1] ss:$4 sm:$0xff] %v4704_v28 }
 0x141   : > { %v4710_v42 = vld [vmem:[#allocation1 + $0x20] sm:$0xf] }
 0x142   : > { %1175 = vst [vmem:[#allocation1 + $0x20] ss:$4 sm:$0xff] %v841_v29 }
 0x147   : > { %v1171_v31 = vld [vmem:[#allocation1] sm:$0xf] }
 0x148   : > { %1179 = vst [vmem:[#allocation1] ss:$4 sm:$0xff] %v845_v53  ;;  %v1231_v22 = vunpack.c.l.b16 %v1171_v31 }
 0x149   : > { %v1176_v34 = vld [vmem:[#allocation1 + $0x20] sm:$0xf] }
 0x14a   : > { %1183 = vst [vmem:[#allocation1 + $0x20] ss:$4 sm:$0xff] %v849_v30  ;;  %v1232_v36 = vunpack.c.l.b16 %v1176_v34  ;;  %v832_v34 = vrot.slane %v816_v14, 3 }
 0x14c   : > { %v1247_v8 = vrot.slane %v1232_v36, 7  ;;  %v4804_v6 = vsel %vm846_vm13, %v816_v14, %v832_v34 }
 0x14d   : > { %v921_v33 = vrot.slane %v4804_v6, 3 }
 0x14e   : > { %v1248_v46 = vsel %vm842_vm12, %v1247_v8, %v1231_v22 }
 0x14f   : > { %v1180_v2 = vld [vmem:[#allocation1] sm:$0xf] }
 0x150   : > { %1186 = vst [vmem:[#allocation1] ss:$4 sm:$0xff] %v4732_v1  ;;  %v1233_v41 = vunpack.c.l.b16 %v1180_v2  ;;  %v768_v2 = vld [vmem:[#allocation2] sm:$0x7] }
 0x151   : > { %v1184_v40 = vld [vmem:[#allocation1 + $0x20] sm:$0xf]  ;;  %v769_v8 = vsel %vm4576_vm3, 0, %v768_v2  ;;  %vm1461_vm3 = vsmask.f32 5392 }
 0x152   : > { %v1234_v23 = vunpack.c.l.b16 %v1184_v40  ;;  %1190 = vst [vmem:[#allocation1 + $0x20] ss:$4 sm:$0xff] %v867_v37  ;;  %v1249_v26 = vrot.slane %v1233_v41, 6  ;;  %v4786_v40 = vsel %vm838_vm11, %v816_v14, %v832_v34  ;;  %v4789_v41 = vsel %vm834_vm10, %v816_v14, %v832_v34 }
 0x153   : > { %770 = vst [vmem:[#allocation2] sm:$0x7] %v769_v8  ;;  %v915_v22 = vrot.slane %v4786_v40, 1 }
 0x154   : > { %v1251_v49 = vrot.slane %v1234_v23, 5  ;;  %v1250_v45 = vsel %vm846_vm13, %v1249_v26, %v1248_v46 }
 0x156   : > { %v1252_v57 = vsel %vm1016_vm14, %v1251_v49, %v1250_v45 }
 0x157   : > { %v1271_v19 = vpack.c.b16 %v1252_v57, %v1252_v57  ;;  %v1187_v61 = vld [vmem:[#allocation1] sm:$0xf] }
 0x158   : > { %1194 = vst [vmem:[#allocation1] ss:$4 sm:$0xff] %v870_v56  ;;  %v1235_v55 = vunpack.c.l.b16 %v1187_v61 }
 0x159   : > { %1275 = vrot.lane.b32.xlu1 %v1271_v19, %s4285_s25  ;;  %v1191_v63 = vld [vmem:[#allocation1 + $0x20] sm:$0xf] }
 0x15a   : > { %1198 = vst [vmem:[#allocation1 + $0x20] ss:$4 sm:$0xff] %v873_v50  ;;  %v1236_v24 = vunpack.c.l.b16 %v1191_v63  ;;  %v778_v10 = vld [vmem:[#allocation2] sm:$0x1]  ;;  %v795_v57 = vld [vmem:[#allocation2] sm:$0x4]  ;;  %v4800_v63 = vsel %vm842_vm12, %v816_v14, %v832_v34 }
 0x15b   : > { %v779_v61 = vsel %vm4494_vm7, 0, %v778_v10  ;;  %v796_v59 = vsel %vm4501_vm9, 0, %v795_v57  ;;  %v918_v27 = vrot.slane %v4800_v63, 2  ;;  %vm1287_vm7 = vcmask 387328  }
 0x15c   : > { %v1253_v48 = vrot.slane %v1236_v24, 7  ;;  %780 = vst [vmem:[#allocation2] sm:$0x1] %v779_v61  ;;  %vm4871_vm8 = vmand %vm1287_vm7, %vm1046_vm0  ;;  %vm1406_vm9 = vcmask 517504   ;;  %vm1458_vm0 = vsmask.f32 1280 }
 0x15d   : > { %797 = vst [vmem:[#allocation2] sm:$0x4] %v796_v59  ;;  %vm1460_vm2 = vmor %vm1458_vm0, %vm1459_vm1 }
 0x15e   : > { %v1254_v5 = vsel %vm842_vm12, %v1253_v48, %v1235_v55  ;;  %vm1462_vm7 = vmor %vm1460_vm2, %vm1461_vm3  ;;  %vm1890_vm3 = vsmask.f32 1282 }
 0x15f   : > { %v1195_v9 = vld [vmem:[#allocation1] sm:$0xf]  ;;  %vm5008_vm1 = vmand %vm834_vm10, %vm5516_vm6 }
 0x160   : > { %v1237_v7 = vunpack.c.l.b16 %v1195_v9  ;;  %1201 = vst [vmem:[#allocation1] ss:$4 sm:$0xff] %v4760_v0  ;;  %vm5016_vm2 = vmand %vm838_vm11, %vm1458_vm0 }
 0x161   : > { %v1199_v58 = vld [vmem:[#allocation1 + $0x20] sm:$0xf] }
 0x162   : > { %v1238_v62 = vunpack.c.l.b16 %v1199_v58  ;;  %1205 = vst [vmem:[#allocation1 + $0x20] ss:$4 sm:$0xff] %v891_v4  ;;  %v1255_v11 = vrot.slane %v1237_v7, 6 }
 0x164   : > { %v1257_v13 = vrot.slane %v1238_v62, 5  ;;  %v1256_v32 = vsel %vm846_vm13, %v1255_v11, %v1254_v5 }
 0x166   : > { %v1258_v35 = vsel %vm1016_vm14, %v1257_v13, %v1256_v32 }
 0x167   : > { %v1272_v31 = vpack.c.b16 %v1258_v35, %v1258_v35  ;;  %v1202_v36 = vld [vmem:[#allocation1] sm:$0xf] }
 0x168   : > { %1209 = vst [vmem:[#allocation1] ss:$4 sm:$0xff] %v894_v52  ;;  %v1239_v18 = vunpack.c.l.b16 %v1202_v36 }
 0x169   : > { %1277 = vrot.lane.b32.xlu2 %v1272_v31, %s4285_s25  ;;  %v1206_v3 = vld [vmem:[#allocation1 + $0x20] sm:$0xf] }
 0x16a   : > { %1213 = vst [vmem:[#allocation1 + $0x20] ss:$4 sm:$0xff] %v897_v47  ;;  %v1240_v39 = vunpack.c.l.b16 %v1206_v3 }
 0x16c   : > { %v1259_v26 = vrot.slane %v1240_v39, 7 }
 0x16e   : > { %v1260_v20 = vsel %vm842_vm12, %v1259_v26, %v1239_v18 }
 0x16f   : > { %v1210_v23 = vld [vmem:[#allocation1] sm:$0xf] }
 0x170   : > { %v1241_v49 = vunpack.c.l.b16 %v1210_v23  ;;  %1216 = vst [vmem:[#allocation1] ss:$4 sm:$0xff] %v4789_v41 }
 0x171   : > { %v1214_v46 = vld [vmem:[#allocation1 + $0x20] sm:$0xf] }
 0x172   : > { %v1242_v45 = vunpack.c.l.b16 %v1214_v46  ;;  %1220 = vst [vmem:[#allocation1 + $0x20] ss:$4 sm:$0xff] %v915_v22  ;;  %v1261_v19 = vrot.slane %v1241_v49, 6 }
 0x174   : > { %v1263_v24 = vrot.slane %v1242_v45, 5  ;;  %v1262_v9 = vsel %vm846_vm13, %v1261_v19, %v1260_v20  ;;  %v1122_v20 = vunpack.c.l.b16 %v4692_v16 }
 0x176   : > { %v1264_v48 = vsel %vm1016_vm14, %v1263_v24, %v1262_v9 }
 0x177   : > { %v1273_v58 = vpack.c.b16 %v1264_v48, %v1264_v48  ;;  %v1217_v7 = vld [vmem:[#allocation1] sm:$0xf]  ;;  %v1123_v48 = vunpack.c.l.b16 %v4707_v51 }
 0x178   : > { %1224 = vst [vmem:[#allocation1] ss:$4 sm:$0xff] %v918_v27  ;;  %v1243_v32 = vunpack.c.l.b16 %v1217_v7  ;;  %v1124_v7 = vunpack.c.l.b16 %v4710_v42 }
 0x179   : > { %1279 = vrot.lane.b32.xlu2 %v1273_v58, %s4285_s25  ;;  %v1221_v55 = vld [vmem:[#allocation1 + $0x20] sm:$0xf] }
 0x17a   : > { %1228 = vst [vmem:[#allocation1 + $0x20] ss:$4 sm:$0xff] %v921_v33  ;;  %v1244_v62 = vunpack.c.l.b16 %v1221_v55  ;;  %v1143_v55 = vrot.slane %v1122_v20, 7 }
 0x17c   : > { %v1265_v14 = vrot.slane %v1244_v62, 7  ;;  %v1145_v62 = vrot.slane %v1123_v48, 6 }
 0x17e   : > { %v1266_v34 = vsel %vm842_vm12, %v1265_v14, %v1243_v32 }
 0x17f   : > { %v1225_v11 = vld [vmem:[#allocation1] sm:$0xf] }
 0x180   : > { %v1245_v13 = vunpack.c.l.b16 %v1225_v11  ;;  %1301 = vst [vmem:[#allocation1] ss:$4 sm:$0xff] %v4704_v28 }
 0x181   : > { %v1229_v5 = vld [vmem:[#allocation1 + $0x20] sm:$0xf] }
 0x182   : > { %v1246_v35 = vunpack.c.l.b16 %v1229_v5  ;;  %1305 = vst [vmem:[#allocation1 + $0x20] ss:$4 sm:$0xff] %v841_v29  ;;  %v1267_v31 = vrot.slane %v1245_v13, 6  ;;  %v1147_v5 = vrot.slane %v1124_v7, 5 }
 0x184   : > { %v1269_v36 = vrot.slane %v1246_v35, 5  ;;  %v1268_v3 = vsel %vm846_vm13, %v1267_v31, %v1266_v34 }
 0x186   : > { %v1270_v2 = vsel %vm1016_vm14, %v1269_v36, %v1268_v3  ;;  %vm1432_vm14 = vcmask 1041408  }
 0x187   : > { %v1274_v8 = vpack.c.b16 %v1270_v2, %v1270_v2  ;;  %v1302_v39 = vld [vmem:[#allocation1] sm:$0xf] }
 0x188   : > { %1308 = vst [vmem:[#allocation1] ss:$4 sm:$0xff] %v845_v53  ;;  %v1350_v18 = vunpack.c.l.b16 %v1302_v39 }
 0x189   : > { %1281 = vrot.lane.b32.xlu0 %v1274_v8, %s4285_s25  ;;  %v1306_v23 = vld [vmem:[#allocation1 + $0x20] sm:$0xf] }
 0x18a   : > { %1311 = vst [vmem:[#allocation1 + $0x20] ss:$4 sm:$0xff] %v849_v30  ;;  %v1351_v28 = vunpack.c.l.b16 %v1306_v23 }
 0x18b   : > { %v1154_v15 = vpop.permute.xlu0 %1153 }
 0x18c   : > { %1166 = vst.msk [vmem:[#allocation2 + $0x4] sm:$0x3] %vm1165_vm4, %v1154_v15  ;;  %v1366_v26 = vrot.slane %v1351_v28, 7 }
 0x18e   : > { %v1367_v53 = vsel %vm838_vm11, %v1366_v26, %v1350_v18 }
 0x18f   : > { %v1309_v29 = vld [vmem:[#allocation1] sm:$0xf] }
 0x190   : > { %v1352_v49 = vunpack.c.l.b16 %v1309_v29  ;;  %1314 = vst [vmem:[#allocation1] ss:$4 sm:$0xff] %v4732_v1 }
 0x191   : > { %v1312_v46 = vld [vmem:[#allocation1 + $0x20] sm:$0xf] }
 0x192   : > { %v1353_v45 = vunpack.c.l.b16 %v1312_v46  ;;  %1317 = vst [vmem:[#allocation1 + $0x20] ss:$4 sm:$0xff] %v867_v37  ;;  %v1368_v38 = vrot.slane %v1352_v49, 6 }
 0x194   : > { %v1370_v44 = vrot.slane %v1353_v45, 5  ;;  %v1369_v30 = vsel %vm842_vm12, %v1368_v38, %v1367_v53  ;;  %v1292_v45 = vld [vmem:[#allocation2 + $0x4] sm:$0x7] }
 0x196   : > { %v1371_v10 = vsel %vm846_vm13, %v1370_v44, %v1369_v30 }
 0x197   : > { %v1390_v57 = vpack.c.b16 %v1371_v10, %v1371_v10  ;;  %v1315_v19 = vld [vmem:[#allocation1] sm:$0xf]  ;;  %v1289_v10 = vld [vmem:[#allocation2] sm:$0x7] }
 0x198   : > { %1320 = vst [vmem:[#allocation1] ss:$4 sm:$0xff] %v870_v56  ;;  %v1354_v58 = vunpack.c.l.b16 %v1315_v19 }
 0x199   : > { %1394 = vrot.lane.b32.xlu1 %v1390_v57, %s4286_s26  ;;  %v1318_v61 = vld [vmem:[#allocation1 + $0x20] sm:$0xf] }
 0x19a   : > { %1323 = vst [vmem:[#allocation1 + $0x20] ss:$4 sm:$0xff] %v873_v50  ;;  %v1355_v1 = vunpack.c.l.b16 %v1318_v61 }
 0x19b   : > { %v1156_v60 = vpop.permute.xlu0 %1155 }
 0x19c   : > { %1167 = vst.msk [vmem:[#allocation2 + $0x8] sm:$0x3] %vm1165_vm4, %v1156_v60  ;;  %v1372_v59 = vrot.slane %v1355_v1, 7 }
 0x19e   : > { %v1373_v56 = vsel %vm838_vm11, %v1372_v59, %v1354_v58 }
 0x19f   : > { %v1321_v37 = vld [vmem:[#allocation1] sm:$0xf] }
 0x1a0   : > { %v1356_v9 = vunpack.c.l.b16 %v1321_v37  ;;  %1326 = vst [vmem:[#allocation1] ss:$4 sm:$0xff] %v4760_v0  ;;  %v1121_v0 = vunpack.c.l.b16 %v4690_v21 }
 0x1a1   : > { %v1324_v24 = vld [vmem:[#allocation1 + $0x20] sm:$0xf] }
 0x1a2   : > { %v1357_v43 = vunpack.c.l.b16 %v1324_v24  ;;  %1329 = vst [vmem:[#allocation1 + $0x20] ss:$4 sm:$0xff] %v891_v4  ;;  %v1374_v54 = vrot.slane %v1356_v9, 6  ;;  %v1144_v14 = vsel %vm838_vm11, %v1143_v55, %v1121_v0 }
 0x1a3   : > { %v1146_v4 = vsel %vm842_vm12, %v1145_v62, %v1144_v14  ;;  %v1295_v61 = vld [vmem:[#allocation2 + $0x8] sm:$0x7] }
 0x1a4   : > { %v1376_v50 = vrot.slane %v1357_v43, 5  ;;  %v1375_v16 = vsel %vm842_vm12, %v1374_v54, %v1373_v56  ;;  %v1148_v21 = vsel %vm846_vm13, %v1147_v5, %v1146_v4 }
 0x1a5   : > { %v1152_v35 = vpack.c.b16 %v1148_v21, %v1148_v21 }
 0x1a6   : > { %v1377_v11 = vsel %vm846_vm13, %v1376_v50, %v1375_v16 }
 0x1a7   : > { %v1391_v51 = vpack.c.b16 %v1377_v11, %v1377_v11  ;;  %v1327_v25 = vld [vmem:[#allocation1] sm:$0xf] }
 0x1a8   : > { %1332 = vst [vmem:[#allocation1] ss:$4 sm:$0xff] %v894_v52  ;;  %v1358_v12 = vunpack.c.l.b16 %v1327_v25 }
 0x1a9   : > { %1396 = vrot.lane.b32.xlu2 %v1391_v51, %s4286_s26  ;;  %v1330_v13 = vld [vmem:[#allocation1 + $0x20] sm:$0xf] }
 0x1aa   : > { %1335 = vst [vmem:[#allocation1 + $0x20] ss:$4 sm:$0xff] %v897_v47  ;;  %v1359_v32 = vunpack.c.l.b16 %v1330_v13 }
 0x1ab   : > { %v1158_v42 = vpop.permute.xlu1 %1157 }
 0x1ac   : > { %1168 = vst.msk [vmem:[#allocation2 + $0xc] sm:$0x3] %vm1165_vm4, %v1158_v42  ;;  %v1378_v34 = vrot.slane %v1359_v32, 7 }
 0x1ae   : > { %v1379_v47 = vsel %vm838_vm11, %v1378_v34, %v1358_v12 }
 0x1af   : > { %v1333_v31 = vld [vmem:[#allocation1] sm:$0xf] }
 0x1b0   : > { %v1360_v3 = vunpack.c.l.b16 %v1333_v31  ;;  %1338 = vst [vmem:[#allocation1] ss:$4 sm:$0xff] %v4789_v41 }
 0x1b1   : > { %1159 = vrot.lane.b32.xlu2 %v1152_v35, %s4284_s24  ;;  %v1336_v36 = vld [vmem:[#allocation1 + $0x20] sm:$0xf] }
 0x1b2   : > { %v1361_v52 = vunpack.c.l.b16 %v1336_v36  ;;  %1341 = vst [vmem:[#allocation1 + $0x20] ss:$4 sm:$0xff] %v915_v22  ;;  %v1380_v17 = vrot.slane %v1360_v3, 6 }
 0x1b3   : > { %v1298_v37 = vld [vmem:[#allocation2 + $0xc] sm:$0x7] }
 0x1b4   : > { %v1382_v2 = vrot.slane %v1361_v52, 5  ;;  %v1381_v8 = vsel %vm842_vm12, %v1380_v17, %v1379_v47 }
 0x1b6   : > { %v1383_v39 = vsel %vm846_vm13, %v1382_v2, %v1381_v8 }
 0x1b7   : > { %v1392_v23 = vpack.c.b16 %v1383_v39, %v1383_v39  ;;  %v1339_v15 = vld [vmem:[#allocation1] sm:$0xf] }
 0x1b8   : > { %1344 = vst [vmem:[#allocation1] ss:$4 sm:$0xff] %v918_v27  ;;  %v1362_v49 = vunpack.c.l.b16 %v1339_v15 }
 0x1b9   : > { %1398 = vrot.lane.b32.xlu0 %v1392_v23, %s4286_s26  ;;  %v1342_v28 = vld [vmem:[#allocation1 + $0x20] sm:$0xf] }
 0x1ba   : > { %1347 = vst [vmem:[#allocation1 + $0x20] ss:$4 sm:$0xff] %v921_v33  ;;  %v1363_v40 = vunpack.c.l.b16 %v1342_v28 }
 0x1bc   : > { %v1384_v22 = vrot.slane %v1363_v40, 7 }
 0x1be   : > { %v1385_v27 = vsel %vm838_vm11, %v1384_v22, %v1362_v49 }
 0x1bf   : > { %v1345_v41 = vld [vmem:[#allocation1] sm:$0xf] }
 0x1c0   : > { %v1364_v46 = vunpack.c.l.b16 %v1345_v41 }
 0x1c1   : > { %v1348_v26 = vld [vmem:[#allocation1 + $0x20] sm:$0xf] }
 0x1c2   : > { %v1365_v18 = vunpack.c.l.b16 %v1348_v26  ;;  %v1386_v63 = vrot.slane %v1364_v46, 6 }
 0x1c3   : > { %v1278_v38 = vpop.permute.xlu2 %1277 }
 0x1c4   : > { %v1293_v6 = vsel %vm4871_vm8, %v1278_v38, %v1292_v45  ;;  %v1388_v33 = vrot.slane %v1365_v18, 5  ;;  %v1387_v53 = vsel %vm842_vm12, %v1386_v63, %v1385_v27  ;;  %v4066_v18 = vld [vmem:[%s5509_s3 + $0x58] sm:$0xff] }
 0x1c5   : > { %1294 = vst [vmem:[#allocation2 + $0x4] sm:$0x7] %v1293_v6  ;;  %v4070_v45 = vld [vmem:[%s5509_s3 + $0x78] sm:$0xff]  ;;  %1675 = vmatpush.bf16.msrb.mxu2 %v4066_v18 }
 0x1c6   : > { %v1389_v44 = vsel %vm846_vm13, %v1388_v33, %v1387_v53  ;;  %v4062_v38 = vld [vmem:[%s5509_s3 + $0x38] sm:$0xff]  ;;  %1755 = vmatpush.bf16.msrb.mxu3 %v4070_v45  ;;  %v4061_v33 = vld [vmem:[%s5509_s3 + $0x30] sm:$0xff] }
 0x1c7   : > { %v1393_v30 = vpack.c.b16 %v1389_v44, %v1389_v44  ;;  %v4058_v63 = vld [vmem:[%s5509_s3 + $0x18] sm:$0xff]  ;;  %1569 = vmatpush.bf16.msrb.mxu0 %v4062_v38  ;;  %v4065_v53 = vld [vmem:[%s5509_s3 + $0x50] sm:$0xff] }
 0x1c8   : > { %1617 = vmatpush.bf16.msrb.mxu1 %v4058_v63  ;;  %v4069_v44 = vld [vmem:[%s5509_s3 + $0x70] sm:$0xff]  ;;  %v1791_v45 = vld [vmem:[#allocation3 + $0x2] sm:$0x1]  ;;  %v1802_v38 = vld [vmem:[#allocation3 + $0x2] sm:$0x2] }
 0x1c9   : > { %1400 = vrot.lane.b32.xlu1 %v1393_v30, %s4286_s26  ;;  %v4057_v30 = vld [vmem:[%s5509_s3 + $0x10] sm:$0xff]  ;;  %1676 = vmatpush.bf16.msrb.mxu2 %v4065_v53  ;;  %s3328_s26 = sshll.u32 %s3324_s22, 4  ;;  %s3329_s26 = int_to_ptr.hbm [resolvable:$true] %s3328_s26 }
 0x1ca   : > { %1756 = vmatpush.bf16.msrb.mxu3 %v4069_v44  ;;  %s4234_s27 = sshra.s32 %s3329_s26, 4  ;;  %s4235_s27 = int_to_ptr.hbm [resolvable:$true] %s4234_s27 }
 0x1cb   : > { %v1276_v57 = vpop.permute.xlu1 %1275  ;;  %1570 = vmatpush.bf16.msrb.mxu0 %v4061_v33  ;;  %p4241_p0 = scmp.lt.s32.totalorder %s4235_s27, %s5515_s9 }
 0x1cc   : > { %v1290_v19 = vsel %vm4871_vm8, %v1276_v57, %v1289_v10  ;;  %v4060_v10 = vld [vmem:[%s5509_s3 + $0x28] sm:$0xff]  ;;  %1618 = vmatpush.bf16.msrb.mxu1 %v4057_v30  ;;  %v1803_v30 = vsel %vm5016_vm2, 0, %v1802_v38 }
 0x1cd   : > { %1291 = vst [vmem:[#allocation2] sm:$0x7] %v1290_v19  ;;  %v4064_v57 = vld [vmem:[%s5509_s3 + $0x48] sm:$0xff] }
 0x1ce   : > { %v4068_v19 = vld [vmem:[%s5509_s3 + $0x68] sm:$0xff]  ;;  %1677 = vmatpush.bf16.msrb.mxu2 %v4064_v57  ;;  %1804 = vst [vmem:[#allocation3 + $0x2] sm:$0x2] %v1803_v30 }
 0x1cf   : > { %1571 = vmatpush.bf16.msrb.mxu0 %v4060_v10  ;;  %1757 = vmatpush.bf16.msrb.mxu3 %v4068_v19 }
 0x1d3   : > { %v1280_v60 = vpop.permute.xlu2 %1279 }
 0x1d4   : > { %v1296_v1 = vsel %vm4871_vm8, %v1280_v60, %v1295_v61  ;;  %v4056_v60 = vld [vmem:[%s5509_s3 + $0x8] sm:$0xff] }
 0x1d5   : > { %1297 = vst [vmem:[#allocation2 + $0x8] sm:$0x7] %v1296_v1  ;;  %1619 = vmatpush.bf16.msrb.mxu1 %v4056_v60 }
 0x1fb   : > { %v1282_v59 = vpop.permute.xlu0 %1281 }
 0x1fc   : > { %v1299_v20 = vsel %vm4871_vm8, %v1282_v59, %v1298_v37  ;;  %vm1463_vm8 = vsmask.f32 7448  ;;  %v4059_v37 = vld [vmem:[%s5509_s3 + $0x20] sm:$0xff] }
 0x1fd   : > { %1300 = vst [vmem:[#allocation2 + $0xc] sm:$0x7] %v1299_v20  ;;  %1572 = vmatpush.bf16.msrb.mxu0 %v4059_v37 }
 0x203   : > { %v1397_v24 = vpop.permute.xlu2 %1396 }
 0x204   : > { %1408 = vst.msk [vmem:[#allocation2 + $0x4] sm:$0x3] %vm1406_vm9, %v1397_v24 }
 0x20b   : > { %v4888_v9 = vld [vmem:[#allocation2 + $0x4] sm:$0x7]  ;;  %v1395_v48 = vpop.permute.xlu1 %1394  ;;  %v1160_v58 = vpop.permute.xlu2 %1159 }
 0x20c   : > { %v1429_v43 = vrot.slane %v4888_v9, 2  ;;  %1407 = vst.msk [vmem:[#allocation2] sm:$0x3] %vm1406_vm9, %v1395_v48 }
 0x20d   : > { %1169 = vst.msk [vmem:[#allocation2 + $0x10] sm:$0x3] %vm1165_vm4, %v1160_v58  ;;  %vm4900_vm4 = vmor %vm1462_vm7, %vm1463_vm8  ;;  %vm1950_vm8 = vcmask 516352  }
 0x20e   : > { %v1442_v54 = vsel %vm1432_vm14, %v4888_v9, %v1429_v43  ;;  %v1443_v56 = vsel %vm1436_vm15, %v4888_v9, %v1429_v43 }
 0x20f   : > { %v1445_v50 = vrot.slane %v1443_v56, 2  ;;  %v1478_v7 = vshrl.u32 %v1442_v54, 16  ;;  %v1481_v55 = vshll.u32 %v1442_v54, 16 }
 0x211   : > { %v1480_v16 = vrot.slane %v1478_v7, 6  ;;  %v1483_v62 = vrot.slane %v1481_v55, 7  ;;  %v1487_v11 = vshll.u32 %v1445_v50, 16  ;;  %v4055_v55 = vld [vmem:[%s5509_s3] sm:$0xff] }
 0x212   : > { %1620 = vmatpush.bf16.msrb.mxu1 %v4055_v55 }
 0x213   : > { %v1484_v0 = vor.u32 %v1483_v62, %v1480_v16  ;;  %v4898_v51 = vld [vmem:[#allocation2] sm:$0x7]  ;;  %v1489_v13 = vrot.slane %v1487_v11, 7  ;;  %v4063_v16 = vld [vmem:[%s5509_s3 + $0x40] sm:$0xff] }
 0x214   : > { %v1428_v5 = vrot.slane %v4898_v51, 2  ;;  %v4905_v25 = vld [vmem:[#allocation2 + $0x10] sm:$0x7]  ;;  %1678 = vmatpush.bf16.msrb.mxu2 %v4063_v16 }
 0x215   : > { %v1485_v4 = vrot.slane %v1484_v0, 2  ;;  %v1688_v42 = vrot.slane %v4905_v25, 2 }
 0x216   : > { %v1435_v21 = vsel %vm1432_vm14, %v4898_v51, %v1428_v5  ;;  %v1437_v32 = vsel %vm1436_vm15, %v4898_v51, %v1428_v5 }
 0x217   : > { %v4914_v35 = vsel %vm4900_vm4, %v1485_v4, %v1489_v13  ;;  %v1439_v31 = vrot.slane %v1437_v32, 2  ;;  %v1465_v34 = vshrl.u32 %v1435_v21, 16  ;;  %v1468_v36 = vshll.u32 %v1435_v21, 16  ;;  %v4067_v21 = vld [vmem:[%s5509_s3 + $0x60] sm:$0xff] }
 0x218   : > { %1530 = vst [vmem:[#allocation1 + $0x1] ss:$4 sm:$0xff] %v4914_v35  ;;  %v1690_v3 = vsel %vm1432_vm14, %v4905_v25, %v1688_v42  ;;  %v1691_v12 = vsel %vm1436_vm15, %v4905_v25, %v1688_v42  ;;  %1758 = vmatpush.bf16.msrb.mxu3 %v4067_v21 }
 0x219   : > { %v1467_v52 = vrot.slane %v1465_v34, 6  ;;  %v1470_v17 = vrot.slane %v1468_v36, 7  ;;  %v1474_v47 = vshll.u32 %v1439_v31, 16  ;;  %v1693_v2 = vrot.slane %v1691_v12, 2 }
 0x21a   : > { %v1694_v8 = vshrl.u32 %v1690_v3, 16  ;;  %v1697_v39 = vshll.u32 %v1690_v3, 16 }
 0x21b   : > { %v1471_v23 = vor.u32 %v1470_v17, %v1467_v52  ;;  %v1703_v15 = vshll.u32 %v1693_v2, 16  ;;  %v1476_v22 = vrot.slane %v1474_v47, 7 }
 0x21c   : > { %v1696_v28 = vrot.slane %v1694_v8, 6  ;;  %v1699_v40 = vrot.slane %v1697_v39, 7 }
 0x21d   : > { %v1472_v41 = vrot.slane %v1471_v23, 2  ;;  %v1705_v46 = vrot.slane %v1703_v15, 7 }
 0x21e   : > { %v1700_v29 = vor.u32 %v1699_v40, %v1696_v28 }
 0x21f   : > { %v1477_v26 = vsel %vm4900_vm4, %v1472_v41, %v1476_v22 }
 0x220   : > { %1527 = vst [vmem:[#allocation1] ss:$4 sm:$0xff] %v1477_v26  ;;  %v1701_v49 = vrot.slane %v1700_v29, 2  ;;  %v1783_v26 = vld [vmem:[#allocation3 + $0x4] sm:$0x3] }
 0x222   : > { %v4937_v6 = vsel %vm4900_vm4, %v1701_v49, %v1705_v46 }
 0x22b   : > { %v1399_v27 = vpop.permute.xlu0 %1398 }
 0x22c   : > { %1409 = vst.msk [vmem:[#allocation2 + $0x8] sm:$0x3] %vm1406_vm9, %v1399_v27  ;;  %v1792_v27 = vsel %vm5008_vm1, 0, %v1791_v45 }
 0x22d   : > { %1793 = vst [vmem:[#allocation3 + $0x2] sm:$0x1] %v1792_v27 }
 0x233   : > { %v1413_v61 = vld [vmem:[#allocation2 + $0x8] sm:$0x7] }
 0x234   : > { %v1430_v1 = vrot.slane %v1413_v61, 2 }
 0x236   : > { %v1448_v59 = vsel %vm1432_vm14, %v1413_v61, %v1430_v1  ;;  %v1449_v20 = vsel %vm1436_vm15, %v1413_v61, %v1430_v1 }
 0x237   : > { %v1451_v24 = vrot.slane %v1449_v20, 2  ;;  %v1491_v48 = vshrl.u32 %v1448_v59, 16  ;;  %v1494_v58 = vshll.u32 %v1448_v59, 16 }
 0x239   : > { %v1493_v43 = vrot.slane %v1491_v48, 6  ;;  %v1496_v54 = vrot.slane %v1494_v58, 7  ;;  %v1500_v56 = vshll.u32 %v1451_v24, 16 }
 0x23b   : > { %v1497_v50 = vor.u32 %v1496_v54, %v1493_v43  ;;  %v1401_v7 = vpop.permute.xlu1 %1400  ;;  %v1502_v11 = vrot.slane %v1500_v56, 7 }
 0x23c   : > { %1410 = vst.msk [vmem:[#allocation2 + $0xc] sm:$0x3] %vm1406_vm9, %v1401_v7  ;;  %vm1562_vm9 = vcmask 523264  }
 0x23d   : > { %v1498_v62 = vrot.slane %v1497_v50, 2 }
 0x23f   : > { %v1503_v0 = vsel %vm4900_vm4, %v1498_v62, %v1502_v11 }
 0x240   : > { %1533 = vst [vmem:[#allocation1 + $0x2] ss:$4 sm:$0xff] %v1503_v0 }
 0x243   : > { %v1414_v5 = vld [vmem:[#allocation2 + $0xc] sm:$0x7] }
 0x244   : > { %v1431_v4 = vrot.slane %v1414_v5, 2 }
 0x246   : > { %v1454_v13 = vsel %vm1432_vm14, %v1414_v5, %v1431_v4  ;;  %v1455_v42 = vsel %vm1436_vm15, %v1414_v5, %v1431_v4  ;;  %vm5000_vm15 = vmand %vm1432_vm14, %vm1458_vm0  ;;  %vm1889_vm0 = vcmask 254976  }
 0x247   : > { %v1457_v32 = vrot.slane %v1455_v42, 2  ;;  %v1504_v31 = vshrl.u32 %v1454_v13, 16  ;;  %v1507_v34 = vshll.u32 %v1454_v13, 16  ;;  %v1784_v49 = vsel %vm5000_vm15, 0, %v1783_v26  ;;  %vm5050_vm7 = vmand %vm1889_vm0, %vm1890_vm3 }
 0x248   : > { %1785 = vst [vmem:[#allocation3 + $0x4] sm:$0x3] %v1784_v49 }
 0x249   : > { %v1506_v36 = vrot.slane %v1504_v31, 6  ;;  %v1509_v3 = vrot.slane %v1507_v34, 7  ;;  %v1513_v12 = vshll.u32 %v1457_v32, 16 }
 0x24b   : > { %v1510_v52 = vor.u32 %v1509_v3, %v1506_v36  ;;  %v1515_v47 = vrot.slane %v1513_v12, 7 }
 0x24d   : > { %v1511_v17 = vrot.slane %v1510_v52, 2 }
 0x24f   : > { %v1516_v2 = vsel %vm4900_vm4, %v1511_v17, %v1515_v47  ;;  %v1794_v59 = vld [vmem:[#allocation3 + $0x4] sm:$0x1]  ;;  %v1805_v20 = vld [vmem:[#allocation3 + $0x4] sm:$0x2]  ;;  %v1892_v47 = vld [vmem:[#allocation3 + $0x2] sm:$0x3] }
 0x250   : > { %1536 = vst [vmem:[#allocation1 + $0x3] ss:$4 sm:$0xff] %v1516_v2  ;;  %v1795_v24 = vsel %vm5008_vm1, 0, %v1794_v59  ;;  %v1806_v48 = vsel %vm5016_vm2, 0, %v1805_v20  ;;  %vm2007_vm4 = vcmask 779776  }
 0x251   : > { %1796 = vst [vmem:[#allocation3 + $0x4] sm:$0x1] %v1795_v24 }
 0x252   : > { %1807 = vst [vmem:[#allocation3 + $0x4] sm:$0x2] %v1806_v48 }
 0x257   : > { %v1537_v8 = vld.sshfl [vmem:[#allocation1] sm:$0xff pattern:$0x73625140] }
 0x258   : > { %3450 = vmatmul.msk.bf16.vlgmr.msrb.gmra.mxu0 %vm1562_vm9, %v1537_v8  ;;  %1579 = vst [vmem:[#allocation1] ss:$4 sm:$0xff] %v4898_v51 }
 0x259   : > { %1581 = vst [vmem:[#allocation1 + $0x1] ss:$4 sm:$0xff] %v4888_v9 }
 0x25a   : > { %1583 = vst [vmem:[#allocation1 + $0x2] ss:$4 sm:$0xff] %v1413_v61 }
 0x25b   : > { %1585 = vst [vmem:[#allocation1 + $0x3] ss:$4 sm:$0xff] %v1414_v5 }
 0x262   : > { %v1586_v39 = vld.sshfl [vmem:[#allocation1] sm:$0xff pattern:$0x73625140] }
 0x263   : > { %3467 = vmatmul.msk.bf16.vlgmr.msrb.gmra.mxu1 %vm1562_vm9, %v1586_v39  ;;  %1636 = vst [vmem:[#allocation1] ss:$4 sm:$0xff] %v4888_v9 }
 0x264   : > { %1638 = vst [vmem:[#allocation1 + $0x1] ss:$4 sm:$0xff] %v1413_v61 }
 0x265   : > { %1640 = vst [vmem:[#allocation1 + $0x2] ss:$4 sm:$0xff] %v1414_v5 }
 0x266   : > { %1643 = vst [vmem:[#allocation1 + $0x3] ss:$4 sm:$0xff] %v4905_v25  ;;  %v4218_v25 = vld [vmem:[%s5510_s4] ss:$0 sm:$0xff] }
 0x26d   : > { %v1644_v14 = vld.sshfl [vmem:[#allocation1] sm:$0xff pattern:$0x73625140] }
 0x26e   : > { %3492 = vmatmul.msk.bf16.vlgmr.msrb.gmra.mxu2 %vm1562_vm9, %v1644_v14  ;;  %1716 = vst [vmem:[#allocation1] ss:$4 sm:$0xff] %v4914_v35  ;;  %v4086_v35 = vld [vmem:[%s5511_s5 + $0x78] sm:$0xff] }
 0x26f   : > { %1718 = vst [vmem:[#allocation1 + $0x1] ss:$4 sm:$0xff] %v1503_v0  ;;  %2224 = vmatpush.bf16.msra.mxu0 %v4086_v35 }
 0x270   : > { %1720 = vst [vmem:[#allocation1 + $0x2] ss:$4 sm:$0xff] %v1516_v2 }
 0x271   : > { %1723 = vst [vmem:[#allocation1 + $0x3] ss:$4 sm:$0xff] %v4937_v6 }
 0x278   : > { %v1724_v51 = vld.sshfl [vmem:[#allocation1] sm:$0xff pattern:$0x73625140] }
 0x279   : > { %3517 = vmatmul.msk.bf16.vlgmr.msrb.gmra.mxu3 %vm1562_vm9, %v1724_v51  ;;  %vm5099_vm9 = vmand %vm2007_vm4, %vm1890_vm3  ;;  %vm2124_vm3 = vsmask.f32 2312  ;;  %vm2126_vm4 = vsmask.f32 3340 }
 0x2d5   : > { %v1574_v15 = vpop.f32.mrf.mxu0 }
 0x2dd   : > { %v1576_v63 = vpop.f32.mrf.mxu0 }
 0x2e0   : > { %v1622_v23 = vpop.f32.mrf.mxu1 }
 0x2e1   : > { %v1623_v9 = vadd.f32 %v1622_v23, %v1574_v15 }
 0x2e8   : > { %v1624_v29 = vpop.f32.mrf.mxu1 }
 0x2e9   : > { %v1625_v53 = vadd.f32 %v1624_v29, %v1576_v63  ;;  %v1895_v63 = vld [vmem:[#allocation3 + $0x4] sm:$0x3] }
 0x2f1   : > { %v1680_v28 = vpop.f32.mrf.mxu2 }
 0x2f2   : > { %v1685_v40 = vadd.f32 %v1680_v28, %v1623_v9 }
 0x2f9   : > { %v1682_v6 = vpop.f32.mrf.mxu2 }
 0x2fa   : > { %v1686_v10 = vadd.f32 %v1682_v6, %v1625_v53 }
 0x2fc   : > { %v1760_v41 = vpop.f32.mrf.mxu3 }
 0x2fd   : > { %v1765_v22 = vadd.f32 %v1760_v41, %v1685_v40 }
 0x2ff   : > { %v1771_v46 = vadd.f32 %v4218_v25, %v1765_v22 }
 0x301   : > { %v1773_v44 = vmul.f32 0.2, %v1771_v46 }
 0x303   : > { %v1775_v57 = vmax.f32 %v1771_v46, %v1773_v44 }
 0x304   : > { %v1762_v19 = vpop.f32.mrf.mxu3 }
 0x305   : > { %v5022_v61 = vpack.c.bf16 %v1775_v57, %v1775_v57  ;;  %v1766_v60 = vadd.f32 %v1762_v19, %v1686_v10 }
 0x307   : > { %v5025_v1 = vrot.slane %v5022_v61, 3  ;;  %v1772_v37 = vadd.f32 %v4218_v25, %v1766_v60 }
 0x309   : > { %v1820_v58 = vsel %vm842_vm12, %v5022_v61, %v5025_v1  ;;  %v1823_v43 = vsel %vm846_vm13, %v5022_v61, %v5025_v1  ;;  %v1774_v50 = vmul.f32 0.2, %v1772_v37  ;;  %v1817_v28 = vsel %vm838_vm11, %v5022_v61, %v5025_v1 }
 0x30a   : > { %v1822_v54 = vrot.slane %v1820_v58, 2  ;;  %v1825_v56 = vrot.slane %v1823_v43, 3  ;;  %v1819_v41 = vrot.slane %v1817_v28, 1  ;;  %v1816_v6 = vsel %vm834_vm10, %v5022_v61, %v5025_v1 }
 0x30b   : > { %v1776_v7 = vmax.f32 %v1772_v37, %v1774_v50 }
 0x30c   : > { %1843 = vst [vmem:[#allocation1 + $0x10] ss:$2 sm:$0xff] %v1825_v56 }
 0x30d   : > { %1839 = vst [vmem:[#allocation1] ss:$2 sm:$0xff] %v1822_v54  ;;  %v5037_v55 = vpack.c.bf16 %v1776_v7, %v1776_v7 }
 0x30f   : > { %v5040_v16 = vrot.slane %v5037_v55, 3 }
 0x311   : > { %v1832_v62 = vsel %vm842_vm12, %v5037_v55, %v5040_v16  ;;  %v1835_v11 = vsel %vm846_vm13, %v5037_v55, %v5040_v16  ;;  %v1829_v10 = vsel %vm838_vm11, %v5037_v55, %v5040_v16  ;;  %v1828_v1 = vsel %vm834_vm10, %v5037_v55, %v5040_v16 }
 0x312   : > { %v1834_v5 = vrot.slane %v1832_v62, 2  ;;  %v1837_v4 = vrot.slane %v1835_v11, 3  ;;  %v1831_v61 = vrot.slane %v1829_v10, 1  ;;  %v1779_v10 = vld [vmem:[#allocation3] sm:$0x3] }
 0x313   : > { %v1844_v0 = vld [vmem:[#allocation1 + $0x10] sm:$0xff] }
 0x314   : > { %1857 = vst [vmem:[#allocation1 + $0x10] ss:$2 sm:$0xff] %v1844_v0  ;;  %v1840_v13 = vld [vmem:[#allocation1] sm:$0xff] }
 0x315   : > { %1847 = vst [vmem:[#allocation1 + $0x20] ss:$2 sm:$0xff] %v1834_v5 }
 0x316   : > { %1851 = vst [vmem:[#allocation1 + $0x30] ss:$2 sm:$0xff] %v1837_v4 }
 0x317   : > { %1853 = vst [vmem:[#allocation1] ss:$2 sm:$0xff] %v1840_v13 }
 0x31b   : > { %v1858_v42 = vld.sshfl [vmem:[#allocation1 + $0x10] sm:$0xff pattern:$0x75643120] }
 0x31c   : > { %1901 = vst [vmem:[#allocation1 + $0x10] ss:$2 sm:$0xff] %v1825_v56  ;;  %v1848_v21 = vld [vmem:[#allocation1 + $0x20] sm:$0xff]  ;;  %v1869_v32 = vunpack.c.l.b16 %v1858_v42 }
 0x31d   : > { %v1852_v31 = vld [vmem:[#allocation1 + $0x30] sm:$0xff]  ;;  %1861 = vst [vmem:[#allocation1 + $0x20] ss:$2 sm:$0xff] %v1848_v21 }
 0x31e   : > { %1865 = vst [vmem:[#allocation1 + $0x30] ss:$2 sm:$0xff] %v1852_v31  ;;  %v1854_v34 = vld.sshfl [vmem:[#allocation1] sm:$0xff pattern:$0x75643120]  ;;  %v1872_v36 = vrot.slane %v1869_v32, 7 }
 0x31f   : > { %1898 = vst [vmem:[#allocation1] ss:$2 sm:$0xff] %v1822_v54  ;;  %v1868_v3 = vunpack.c.l.b16 %v1854_v34 }
 0x321   : > { %v1873_v12 = vsel %vm842_vm12, %v1872_v36, %v1868_v3 }
 0x322   : > { %v1876_v52 = vpack.c.b16 %v1873_v12, %v1873_v12 }
 0x323   : > { %v1902_v17 = vld [vmem:[#allocation1 + $0x10] sm:$0xff] }
 0x324   : > { %1913 = vst [vmem:[#allocation1 + $0x10] ss:$2 sm:$0xff] %v1902_v17  ;;  %v1862_v2 = vld.sshfl [vmem:[#allocation1 + $0x20] sm:$0xff pattern:$0x75643120]  ;;  %v1878_v8 = vrot.slane %v1876_v52, 2 }
 0x325   : > { %v1866_v14 = vld.sshfl [vmem:[#allocation1 + $0x30] sm:$0xff pattern:$0x75643120]  ;;  %1904 = vst [vmem:[#allocation1 + $0x20] ss:$2 sm:$0xff] %v1834_v5  ;;  %v1870_v40 = vunpack.c.l.b16 %v1862_v2 }
 0x326   : > { %1907 = vst [vmem:[#allocation1 + $0x30] ss:$2 sm:$0xff] %v1837_v4  ;;  %v1899_v51 = vld [vmem:[#allocation1] sm:$0xff]  ;;  %v1871_v23 = vunpack.c.l.b16 %v1866_v14  ;;  %v1882_v15 = vsel %vm1432_vm14, %v1876_v52, %v1878_v8 }
 0x327   : > { %1909 = vst [vmem:[#allocation1] ss:$2 sm:$0xff] %v1899_v51  ;;  %v1893_v9 = vsel %vm5050_vm7, %v1882_v15, %v1892_v47 }
 0x328   : > { %v1874_v25 = vrot.slane %v1871_v23, 7  ;;  %1894 = vst [vmem:[#allocation3 + $0x2] sm:$0x3] %v1893_v9 }
 0x32a   : > { %v1875_v22 = vsel %vm842_vm12, %v1874_v25, %v1870_v40 }
 0x32b   : > { %v1914_v29 = vld.sshfl [vmem:[#allocation1 + $0x10] sm:$0xff pattern:$0x75643120]  ;;  %v1877_v26 = vpack.c.b16 %v1875_v22, %v1875_v22 }
 0x32c   : > { %1957 = vst [vmem:[#allocation1 + $0x10] ss:$2 sm:$0xff] %v1819_v41  ;;  %v1905_v46 = vld [vmem:[#allocation1 + $0x20] sm:$0xff]  ;;  %v1925_v49 = vunpack.c.l.b16 %v1914_v29 }
 0x32d   : > { %v1908_v45 = vld [vmem:[#allocation1 + $0x30] sm:$0xff]  ;;  %1917 = vst [vmem:[#allocation1 + $0x20] ss:$2 sm:$0xff] %v1905_v46  ;;  %v1879_v38 = vrot.slane %v1877_v26, 2 }
 0x32e   : > { %1921 = vst [vmem:[#allocation1 + $0x30] ss:$2 sm:$0xff] %v1908_v45  ;;  %v1910_v27 = vld.sshfl [vmem:[#allocation1] sm:$0xff pattern:$0x75643120]  ;;  %v1928_v53 = vrot.slane %v1925_v49, 7 }
 0x32f   : > { %v1924_v44 = vunpack.c.l.b16 %v1910_v27  ;;  %1953 = vst [vmem:[#allocation1] ss:$2 sm:$0xff] %v1816_v6  ;;  %v1885_v30 = vsel %vm1432_vm14, %v1877_v26, %v1879_v38 }
 0x330   : > { %v1896_v57 = vsel %vm5050_vm7, %v1885_v30, %v1895_v63  ;;  %vm2067_vm7 = vcmask 1041152  }
 0x331   : > { %v1929_v19 = vsel %vm838_vm11, %v1928_v53, %v1924_v44  ;;  %1897 = vst [vmem:[#allocation3 + $0x4] sm:$0x3] %v1896_v57  ;;  %v1780_v57 = vsel %vm5000_vm15, 0, %v1779_v10  ;;  %vm2122_vm15 = vsmask.f32 1284 }
 0x332   : > { %v1932_v60 = vpack.c.b16 %v1929_v19, %v1929_v19  ;;  %1781 = vst [vmem:[#allocation3] sm:$0x3] %v1780_v57  ;;  %vm2123_vm0 = vmor %vm5516_vm6, %vm2122_vm15  ;;  %vm2128_vm15 = vsmask.f32 4368  ;;  %vm2106_vm6 = vcmask 1042433  }
 0x333   : > { %v1958_v37 = vld [vmem:[#allocation1 + $0x10] sm:$0xff] }
 0x334   : > { %1970 = vst [vmem:[#allocation1 + $0x10] ss:$2 sm:$0xff] %v1958_v37  ;;  %v1918_v59 = vld.sshfl [vmem:[#allocation1 + $0x20] sm:$0xff pattern:$0x75643120]  ;;  %v1934_v20 = vrot.slane %v1932_v60, 2 }
 0x335   : > { %v1922_v24 = vld.sshfl [vmem:[#allocation1 + $0x30] sm:$0xff pattern:$0x75643120]  ;;  %1960 = vst [vmem:[#allocation1 + $0x20] ss:$2 sm:$0xff] %v1828_v1  ;;  %v1926_v52 = vunpack.c.l.b16 %v1918_v59 }
 0x336   : > { %1964 = vst [vmem:[#allocation1 + $0x30] ss:$2 sm:$0xff] %v1831_v61  ;;  %v1938_v48 = vsel %vm1432_vm14, %v1932_v60, %v1934_v20  ;;  %v1954_v58 = vld [vmem:[#allocation1] sm:$0xff]  ;;  %v1927_v13 = vunpack.c.l.b16 %v1922_v24  ;;  %v4085_v24 = vld [vmem:[%s5511_s5 + $0x70] sm:$0xff] }
 0x337   : > { %1944 = vrot.lane.b32.xlu0 %v1938_v48, %s4285_s25  ;;  %1966 = vst [vmem:[#allocation1] ss:$2 sm:$0xff] %v1954_v58  ;;  %2225 = vmatpush.bf16.msra.mxu0 %v4085_v24 }
 0x338   : > { %v1930_v3 = vrot.slane %v1927_v13, 7  ;;  %v4075_v13 = vld [vmem:[%s5511_s5 + $0x20] sm:$0xff] }
 0x339   : > { %v1788_v19 = vld [vmem:[#allocation3] sm:$0x1]  ;;  %v1799_v60 = vld [vmem:[#allocation3] sm:$0x2] }
 0x33a   : > { %v1931_v8 = vsel %vm838_vm11, %v1930_v3, %v1926_v52  ;;  %v1789_v37 = vsel %vm5008_vm1, 0, %v1788_v19  ;;  %v4073_v3 = vld [vmem:[%s5511_s5 + $0x10] sm:$0xff] }
 0x33b   : > { %v1971_v43 = vld.sshfl [vmem:[#allocation1 + $0x10] sm:$0xff pattern:$0x75643120]  ;;  %v1933_v40 = vpack.c.b16 %v1931_v8, %v1931_v8  ;;  %1790 = vst [vmem:[#allocation3] sm:$0x1] %v1789_v37  ;;  %v4100_v8 = vld [vmem:[%s5511_s5 + $0xe8] sm:$0xff] }
 0x33c   : > { %2018 = vst [vmem:[#allocation1 + $0x10] ss:$2 sm:$0xff] %v1819_v41  ;;  %v1961_v54 = vld [vmem:[#allocation1 + $0x20] sm:$0xff]  ;;  %v1982_v56 = vunpack.c.l.b16 %v1971_v43  ;;  %v4101_v52 = vld [vmem:[%s5511_s5 + $0xf0] sm:$0xff] }
 0x33d   : > { %v1965_v50 = vld [vmem:[#allocation1 + $0x30] sm:$0xff]  ;;  %1974 = vst [vmem:[#allocation1 + $0x20] ss:$2 sm:$0xff] %v1961_v54  ;;  %v1935_v22 = vrot.slane %v1933_v40, 2  ;;  %v4084_v54 = vld [vmem:[%s5511_s5 + $0x68] sm:$0xff] }
 0x33e   : > { %1978 = vst [vmem:[#allocation1 + $0x30] ss:$2 sm:$0xff] %v1965_v50  ;;  %v1967_v7 = vld.sshfl [vmem:[#allocation1] sm:$0xff pattern:$0x75643120]  ;;  %v1985_v55 = vrot.slane %v1982_v56, 7  ;;  %2226 = vmatpush.bf16.msra.mxu0 %v4084_v54 }
 0x33f   : > { %v1981_v16 = vunpack.c.l.b16 %v1967_v7  ;;  %2015 = vst [vmem:[#allocation1] ss:$2 sm:$0xff] %v1816_v6  ;;  %v1942_v38 = vsel %vm1432_vm14, %v1933_v40, %v1935_v22  ;;  %v4078_v56 = vld [vmem:[%s5511_s5 + $0x38] sm:$0xff]  ;;  %v4083_v7 = vld [vmem:[%s5511_s5 + $0x60] sm:$0xff] }
 0x340   : > { %2290 = vmatpush.bf16.msra.mxu1 %v4078_v56 }
 0x341   : > { %v1986_v62 = vsel %vm842_vm12, %v1985_v55, %v1981_v16  ;;  %v4077_v55 = vld [vmem:[%s5511_s5 + $0x30] sm:$0xff] }
 0x342   : > { %v1989_v11 = vpack.c.b16 %v1986_v62, %v1986_v62  ;;  %2227 = vmatpush.bf16.msra.mxu0 %v4083_v7 }
 0x343   : > { %v2019_v0 = vld [vmem:[#allocation1 + $0x10] sm:$0xff] }
 0x344   : > { %2030 = vst [vmem:[#allocation1 + $0x10] ss:$2 sm:$0xff] %v2019_v0  ;;  %v1991_v5 = vrot.slane %v1989_v11, 2  ;;  %v1975_v4 = vld.sshfl [vmem:[#allocation1 + $0x20] sm:$0xff pattern:$0x75643120]  ;;  %2291 = vmatpush.bf16.msra.mxu1 %v4077_v55 }
 0x345   : > { %v1979_v42 = vld.sshfl [vmem:[#allocation1 + $0x30] sm:$0xff pattern:$0x75643120]  ;;  %2021 = vst [vmem:[#allocation1 + $0x20] ss:$2 sm:$0xff] %v1828_v1  ;;  %v1983_v34 = vunpack.c.l.b16 %v1975_v4  ;;  %v4076_v0 = vld [vmem:[%s5511_s5 + $0x28] sm:$0xff] }
 0x346   : > { %2024 = vst [vmem:[#allocation1 + $0x30] ss:$2 sm:$0xff] %v1831_v61  ;;  %v1995_v21 = vsel %vm1432_vm14, %v1989_v11, %v1991_v5  ;;  %v1984_v32 = vunpack.c.l.b16 %v1979_v42  ;;  %v2016_v31 = vld [vmem:[#allocation1] sm:$0xff]  ;;  %v1800_v61 = vsel %vm5016_vm2, 0, %v1799_v60  ;;  %v4082_v11 = vld [vmem:[%s5511_s5 + $0x58] sm:$0xff]  ;;  %v4081_v4 = vld [vmem:[%s5511_s5 + $0x50] sm:$0xff] }
 0x347   : > { %2001 = vrot.lane.b32.xlu1 %v1995_v21, %s4287_s28  ;;  %2026 = vst [vmem:[#allocation1] ss:$2 sm:$0xff] %v2016_v31  ;;  %v4094_v5 = vld [vmem:[%s5511_s5 + $0xb8] sm:$0xff]  ;;  %2228 = vmatpush.bf16.msra.mxu0 %v4082_v11  ;;  %v4093_v42 = vld [vmem:[%s5511_s5 + $0xb0] sm:$0xff]  ;;  %v4080_v21 = vld [vmem:[%s5511_s5 + $0x48] sm:$0xff] }
 0x348   : > { %v1987_v36 = vrot.slane %v1984_v32, 7  ;;  %1801 = vst [vmem:[#allocation3] sm:$0x2] %v1800_v61  ;;  %2292 = vmatpush.bf16.msra.mxu1 %v4076_v0  ;;  %2374 = vmatpush.bf16.msra.mxu2 %v4094_v5  ;;  %v4074_v32 = vld [vmem:[%s5511_s5 + $0x18] sm:$0xff]  ;;  %v4092_v31 = vld [vmem:[%s5511_s5 + $0xa8] sm:$0xff] }
 0x34a   : > { %v1988_v12 = vsel %vm842_vm12, %v1987_v36, %v1983_v34  ;;  %v4102_v34 = vld [vmem:[%s5511_s5 + $0xf8] sm:$0xff]  ;;  %v4079_v36 = vld [vmem:[%s5511_s5 + $0x40] sm:$0xff] }
 0x34b   : > { %v1990_v17 = vpack.c.b16 %v1988_v12, %v1988_v12  ;;  %v2031_v47 = vld.sshfl [vmem:[#allocation1 + $0x10] sm:$0xff pattern:$0x75643120]  ;;  %2229 = vmatpush.bf16.msra.mxu0 %v4081_v4  ;;  %v4091_v12 = vld [vmem:[%s5511_s5 + $0xa0] sm:$0xff]  ;;  %2482 = vmatpush.bf16.msra.mxu3 %v4102_v34 }
 0x34c   : > { %v2042_v2 = vunpack.c.l.b16 %v2031_v47  ;;  %v2022_v39 = vld [vmem:[#allocation1 + $0x20] sm:$0xff]  ;;  %2293 = vmatpush.bf16.msra.mxu1 %v4075_v13  ;;  %2375 = vmatpush.bf16.msra.mxu2 %v4093_v42  ;;  %v4072_v47 = vld [vmem:[%s5511_s5 + $0x8] sm:$0xff] }
 0x34d   : > { %v2025_v14 = vld [vmem:[#allocation1 + $0x30] sm:$0xff]  ;;  %v1992_v51 = vrot.slane %v1990_v17, 2  ;;  %2034 = vst [vmem:[#allocation1 + $0x20] ss:$2 sm:$0xff] %v2022_v39  ;;  %v4071_v39 = vld [vmem:[%s5511_s5] sm:$0xff] }
 0x34e   : > { %2038 = vst [vmem:[#allocation1 + $0x30] ss:$2 sm:$0xff] %v2025_v14  ;;  %v2027_v23 = vld.sshfl [vmem:[#allocation1] sm:$0xff pattern:$0x75643120]  ;;  %v2045_v15 = vrot.slane %v2042_v2, 7 }
 0x34f   : > { %v1999_v28 = vsel %vm1432_vm14, %v1990_v17, %v1992_v51  ;;  %v2041_v9 = vunpack.c.l.b16 %v2027_v23  ;;  %v2009_v50 = vld [vmem:[#allocation3] sm:$0x3]  ;;  %2230 = vmatpush.bf16.msra.mxu0 %v4080_v21  ;;  %2483 = vmatpush.bf16.msra.mxu3 %v4101_v52  ;;  %v4089_v14 = vld [vmem:[%s5511_s5 + $0x90] sm:$0xff]  ;;  %v4099_v51 = vld [vmem:[%s5511_s5 + $0xe0] sm:$0xff] }
 0x350   : > { %2003 = vrot.lane.b32.xlu2 %v1999_v28, %s4287_s28  ;;  %2294 = vmatpush.bf16.msra.mxu1 %v4074_v32  ;;  %v4090_v2 = vld [vmem:[%s5511_s5 + $0x98] sm:$0xff] }
 0x351   : > { %v2046_v25 = vsel %vm838_vm11, %v2045_v15, %v2041_v9  ;;  %2376 = vmatpush.bf16.msra.mxu2 %v4092_v31 }
 0x352   : > { %v2049_v41 = vpack.c.b16 %v2046_v25, %v2046_v25  ;;  %v4126_v25 = vld [vmem:[%s5513_s7 + $0xb8] sm:$0xff] }
 0x353   : > { %2231 = vmatpush.bf16.msra.mxu0 %v4079_v36  ;;  %2484 = vmatpush.bf16.msra.mxu3 %v4100_v8 }
 0x354   : > { %v2051_v29 = vrot.slane %v2049_v41, 2  ;;  %v2035_v26 = vld.sshfl [vmem:[#allocation1 + $0x20] sm:$0xff pattern:$0x75643120]  ;;  %2295 = vmatpush.bf16.msra.mxu1 %v4073_v3 }
 0x355   : > { %v2039_v46 = vld.sshfl [vmem:[#allocation1 + $0x30] sm:$0xff pattern:$0x75643120]  ;;  %v2043_v63 = vunpack.c.l.b16 %v2035_v26  ;;  %2377 = vmatpush.bf16.msra.mxu2 %v4091_v12 }
 0x356   : > { %v2055_v49 = vsel %vm1432_vm14, %v2049_v41, %v2051_v29  ;;  %v2044_v45 = vunpack.c.l.b16 %v2039_v46 }
 0x357   : > { %2061 = vrot.lane.b32.xlu0 %v2055_v49, %s4288_s29  ;;  %2485 = vmatpush.bf16.msra.mxu3 %v4099_v51 }
 0x358   : > { %1946 = vrot.lane.b32.xlu2 %v1942_v38, %s4285_s25  ;;  %v2047_v6 = vrot.slane %v2044_v45, 7  ;;  %2296 = vmatpush.bf16.msra.mxu1 %v4072_v47  ;;  %v4088_v45 = vld [vmem:[%s5511_s5 + $0x88] sm:$0xff]  ;;  %v4098_v38 = vld [vmem:[%s5511_s5 + $0xd8] sm:$0xff] }
 0x359   : > { %2378 = vmatpush.bf16.msra.mxu2 %v4090_v2  ;;  %2733 = vmatpush.bf16.msrb.mxu0 %v4126_v25  ;;  %v4165_v25 = vld [vmem:[%s5513_s7 + $0x1f0] sm:$0xff] }
 0x35a   : > { %v2048_v27 = vsel %vm838_vm11, %v2047_v6, %v2043_v63  ;;  %v4087_v6 = vld [vmem:[%s5511_s5 + $0x80] sm:$0xff] }
 0x35b   : > { %v2050_v53 = vpack.c.b16 %v2048_v27, %v2048_v27  ;;  %2486 = vmatpush.bf16.msra.mxu3 %v4098_v38 }
 0x35c   : > { %2297 = vmatpush.bf16.msra.mxu1 %v4071_v39 }
 0x35d   : > { %v2052_v44 = vrot.slane %v2050_v53, 2  ;;  %2379 = vmatpush.bf16.msra.mxu2 %v4089_v14 }
 0x35f   : > { %v2059_v30 = vsel %vm1432_vm14, %v2050_v53, %v2052_v44  ;;  %v4097_v44 = vld [vmem:[%s5511_s5 + $0xd0] sm:$0xff] }
 0x360   : > { %2063 = vrot.lane.b32.xlu1 %v2059_v30, %s4288_s29  ;;  %2487 = vmatpush.bf16.msra.mxu3 %v4097_v44  ;;  %v4124_v30 = vld [vmem:[%s5513_s7 + $0xa8] sm:$0xff]  ;;  %s4236_s29 = scalar_lea.hbm %s4235_s27, 1 }
 0x361   : > { %2380 = vmatpush.bf16.msra.mxu2 %v4088_v45  ;;  %p4237_p11 = scmp.ne.s32.totalorder %s4235_s27, %s4236_s29  ;;  %p4242_p1 = scmp.lt.s32.totalorder %s4240_s16, %s4236_s29 }
 0x363   : > { %p4238_p12 = pnand %p4237_p11, %p4378_p5  ;;  %p4243_p2 = por %p4242_p1, %p4241_p0 }
 0x365   : > { %2381 = vmatpush.bf16.msra.mxu2 %v4087_v6  ;;  %v4109_v6 = vld [vmem:[%s5513_s7 + $0x30] sm:$0xff]  ;;  %p4239_p13 = pneg %p4238_p12 }
 0x367   : > { %p4244_p3 = pnand %p4243_p2, %p4239_p13 }
 0x3a9   : > { %v1945_v1 = vpop.permute.xlu0 %1944 }
 0x3aa   : > { %1951 = vst.msk [vmem:[#allocation3 + $0x2] sm:$0x1] %vm1950_vm8, %v1945_v1  ;;  %v2004_v59 = vpop.permute.xlu2 %2003 }
 0x3b1   : > { %v2012_v48 = vld [vmem:[#allocation3 + $0x2] sm:$0x3] }
 0x3b2   : > { %v2013_v58 = vsel %vm5099_vm9, %v2004_v59, %v2012_v48  ;;  %v1947_v43 = vpop.permute.xlu2 %1946  ;;  %v4096_v48 = vld [vmem:[%s5511_s5 + $0xc8] sm:$0xff] }
 0x3b3   : > { %2014 = vst [vmem:[#allocation3 + $0x2] sm:$0x3] %v2013_v58  ;;  %2488 = vmatpush.bf16.msra.mxu3 %v4096_v48 }
 0x3b4   : > { %1952 = vst.msk [vmem:[#allocation3 + $0x4] sm:$0x1] %vm1950_vm8, %v1947_v43  ;;  %vm2125_vm8 = vmor %vm2123_vm0, %vm2124_vm3  ;;  %vm2130_vm3 = vsmask.f32 5396  ;;  %v4095_v43 = vld [vmem:[%s5511_s5 + $0xc0] sm:$0xff] }
 0x3b7   : > { %2489 = vmatpush.bf16.msra.mxu3 %v4095_v43 }
 0x3b9   : > { %v2002_v16 = vpop.permute.xlu1 %2001 }
 0x3ba   : > { %v2010_v62 = vsel %vm5099_vm9, %v2002_v16, %v2009_v50  ;;  %vm2127_vm9 = vmor %vm2125_vm8, %vm2126_vm4  ;;  %vm2132_vm4 = vsmask.f32 6424 }
 0x3bb   : > { %2011 = vst [vmem:[#allocation3] sm:$0x3] %v2010_v62  ;;  %vm2129_vm0 = vmor %vm2127_vm9, %vm2128_vm15  ;;  %vm2134_vm9 = vsmask.f32 7452  ;;  %v2072_v7 = vld [vmem:[#allocation3 + $0x4] sm:$0x3] }
 0x3bc   : > { %vm5184_vm8 = vmor %vm2129_vm0, %vm2130_vm3  ;;  %v2389_v16 = vrot.slane %v2072_v7, 1  ;;  %v2390_v62 = vrot.slane %v2072_v7, 2  ;;  %v2391_v11 = vrot.slane %v2072_v7, 3 }
 0x3be   : > { %v2398_v0 = vsel %vm838_vm11, %v2072_v7, %v2389_v16  ;;  %v2399_v5 = vsel %vm846_vm13, %v2390_v62, %v2391_v11  ;;  %v2393_v42 = vsel %vm834_vm10, %v2072_v7, %v2389_v16  ;;  %v2396_v21 = vsel %vm842_vm12, %v2390_v62, %v2391_v11  ;;  %v4114_v16 = vld [vmem:[%s5513_s7 + $0x58] sm:$0xff]  ;;  %v4121_v11 = vld [vmem:[%s5513_s7 + $0x90] sm:$0xff] }
 0x3bf   : > { %v2400_v4 = vsel %vm2106_vm6, %v2398_v0, %v2399_v5  ;;  %v2397_v31 = vsel %vm1432_vm14, %v2393_v42, %v2396_v21  ;;  %v4129_v0 = vld [vmem:[%s5513_s7 + $0xd0] sm:$0xff] }
 0x3c0   : > { %v2402_v32 = vrot.slane %v2400_v4, 1  ;;  %v2403_v36 = vshrl.u32 %v2397_v31, 16  ;;  %v4120_v4 = vld [vmem:[%s5513_s7 + $0x88] sm:$0xff]  ;;  %v4119_v31 = vld [vmem:[%s5513_s7 + $0x80] sm:$0xff] }
 0x3c2   : > { %v2408_v34 = vshll.u32 %v2402_v32, 16 }
 0x3c9   : > { %v2062_v17 = vpop.permute.xlu0 %2061 }
 0x3ca   : > { %2068 = vst.msk [vmem:[#allocation3] sm:$0x1] %vm2067_vm7, %v2062_v17  ;;  %v4289_v17 = vmov 0  }
 0x3cb   : > { %2503 = vst [vmem:[#allocation4] sm:$0x3] %v4289_v17  ;;  %4214 = vset.pattern.permute.xlu0 %v4289_v17  ;;  %4215 = vset.pattern.permute.xlu1 %v4289_v17 }
 0x3cc   : > { %2505 = vst [vmem:[#allocation4 + $0x2] sm:$0x3] %v4289_v17 }
 0x3d1   : > { %v2070_v23 = vld [vmem:[#allocation3] sm:$0x3] }
 0x3d2   : > { %v2091_v15 = vrot.slane %v2070_v23, 1  ;;  %v2092_v28 = vrot.slane %v2070_v23, 2  ;;  %v2093_v9 = vrot.slane %v2070_v23, 3  ;;  %v2064_v40 = vpop.permute.xlu1 %2063  ;;  %v2507_v47 = vld [vmem:[#allocation4] sm:$0x3] }
 0x3d3   : > { %2069 = vst.msk [vmem:[#allocation3 + $0x2] sm:$0x1] %vm2067_vm7, %v2064_v40  ;;  %vm2133_vm7 = vmor %vm5184_vm8, %vm2132_vm4  ;;  %v2510_v39 = vld [vmem:[#allocation4 + $0x2] sm:$0x3]  ;;  %vm3286_vm8 = vcmask 130112   ;;  %vm3290_vm4 = vcmask 195712  }
 0x3d4   : > { %v2099_v41 = vsel %vm834_vm10, %v2070_v23, %v2091_v15  ;;  %v2102_v22 = vsel %vm842_vm12, %v2092_v28, %v2093_v9  ;;  %v2104_v29 = vsel %vm838_vm11, %v2070_v23, %v2091_v15  ;;  %v2105_v26 = vsel %vm846_vm13, %v2092_v28, %v2093_v9  ;;  %vm5209_vm15 = vmor %vm2133_vm7, %vm2134_vm9 }
 0x3d5   : > { %v2103_v46 = vsel %vm1432_vm14, %v2099_v41, %v2102_v22  ;;  %v2107_v49 = vsel %vm2106_vm6, %v2104_v29, %v2105_v26  ;;  %v2410_v12 = vsel %vm5209_vm15, %v2403_v36, %v2408_v34  ;;  %v4134_v41 = vld [vmem:[%s5513_s7 + $0xf8] sm:$0xff]  ;;  %v4125_v22 = vld [vmem:[%s5513_s7 + $0xb0] sm:$0xff]  ;;  %v4127_v34 = vld [vmem:[%s5513_s7 + $0xc0] sm:$0xff]  ;;  %vm3294_vm7 = vcmask 261312  }
 0x3d6   : > { %v2109_v63 = vrot.slane %v2107_v49, 1  ;;  %v2136_v27 = vshrl.u32 %v2103_v46, 16  ;;  %2746 = vmatpush.bf16.msrb.mxu1 %v4134_v41  ;;  %v4133_v26 = vld [vmem:[%s5513_s7 + $0xf0] sm:$0xff]  ;;  %v4110_v46 = vld [vmem:[%s5513_s7 + $0x38] sm:$0xff]  ;;  %2734 = vmatpush.bf16.msrb.mxu0 %v4125_v22  ;;  %vm3298_vm9 = vcmask 326912  }
 0x3d7   : > { %v4118_v49 = vld [vmem:[%s5513_s7 + $0x78] sm:$0xff]  ;;  %2860 = vmatpush.bf16.msrb.mxu2 %v4110_v46  ;;  %v4105_v36 = vld [vmem:[%s5513_s7 + $0x10] sm:$0xff] }
 0x3d8   : > { %v2141_v53 = vshll.u32 %v2109_v63, 16  ;;  %v4219_v63 = vld [vmem:[%s5512_s6] ss:$0 sm:$0xff]  ;;  %2873 = vmatpush.bf16.msrb.mxu3 %v4118_v49  ;;  %v4138_v41 = vld [vmem:[%s5513_s7 + $0x118] sm:$0xff]  ;;  %v4137_v46 = vld [vmem:[%s5513_s7 + $0x110] sm:$0xff] }
 0x3d9   : > { %v4146_v22 = vld [vmem:[%s5513_s7 + $0x158] sm:$0xff]  ;;  %v4145_v49 = vld [vmem:[%s5513_s7 + $0x150] sm:$0xff] }
 0x3da   : > { %v2143_v10 = vsel %vm5209_vm15, %v2136_v27, %v2141_v53  ;;  %v2071_v57 = vld [vmem:[#allocation3 + $0x2] sm:$0x3]  ;;  %v4117_v27 = vld [vmem:[%s5513_s7 + $0x70] sm:$0xff]  ;;  %2747 = vmatpush.bf16.msrb.mxu1 %v4133_v26  ;;  %2735 = vmatpush.bf16.msrb.mxu0 %v4124_v30  ;;  %v4164_v26 = vld [vmem:[%s5513_s7 + $0x1e8] sm:$0xff] }
 0x3db   : > { %2170 = vst [vmem:[#allocation1] ss:$9 sm:$0xff] %v2143_v10  ;;  %v2094_v19 = vrot.slane %v2071_v57, 1  ;;  %v2095_v60 = vrot.slane %v2071_v57, 2  ;;  %v2096_v37 = vrot.slane %v2071_v57, 3  ;;  %v4132_v10 = vld [vmem:[%s5513_s7 + $0xe8] sm:$0xff]  ;;  %2861 = vmatpush.bf16.msrb.mxu2 %v4109_v6 }
 0x3dc   : > { %2874 = vmatpush.bf16.msrb.mxu3 %v4117_v27  ;;  %v4144_v6 = vld [vmem:[%s5513_s7 + $0x148] sm:$0xff]  ;;  %v4154_v27 = vld [vmem:[%s5513_s7 + $0x198] sm:$0xff]  ;;  %v4135_v30 = vld [vmem:[%s5513_s7 + $0x100] sm:$0xff] }
 0x3dd   : > { %v2112_v61 = vsel %vm834_vm10, %v2071_v57, %v2094_v19  ;;  %v2115_v1 = vsel %vm842_vm12, %v2095_v60, %v2096_v37  ;;  %v2117_v59 = vsel %vm838_vm11, %v2071_v57, %v2094_v19  ;;  %v2118_v35 = vsel %vm846_vm13, %v2095_v60, %v2096_v37  ;;  %v4108_v19 = vld [vmem:[%s5513_s7 + $0x28] sm:$0xff] }
 0x3de   : > { %v2116_v20 = vsel %vm1432_vm14, %v2112_v61, %v2115_v1  ;;  %v2119_v24 = vsel %vm2106_vm6, %v2117_v59, %v2118_v35  ;;  %vm2506_vm6 = vmor %vm5016_vm2, %vm5008_vm1  ;;  %vm2513_vm12 = vsmask.f32 7938  ;;  %vm2515_vm13 = vsmask.f32 7942  ;;  %v4116_v60 = vld [vmem:[%s5513_s7 + $0x68] sm:$0xff]  ;;  %2748 = vmatpush.bf16.msrb.mxu1 %v4132_v10  ;;  %v4123_v61 = vld [vmem:[%s5513_s7 + $0xa0] sm:$0xff] }
 0x3df   : > { %v2121_v58 = vrot.slane %v2119_v24, 1  ;;  %v2144_v54 = vshrl.u32 %v2116_v20, 16  ;;  %v2508_v2 = vsel %vm2506_vm6, 0, %v2507_v47  ;;  %vm2514_vm14 = vmand %vm834_vm10, %vm2513_vm12  ;;  %v2511_v51 = vsel %vm2506_vm6, 0, %v2510_v39  ;;  %v4131_v1 = vld [vmem:[%s5513_s7 + $0xe0] sm:$0xff]  ;;  %2862 = vmatpush.bf16.msrb.mxu2 %v4108_v19  ;;  %2736 = vmatpush.bf16.msrb.mxu0 %v4123_v61  ;;  %v4104_v47 = vld [vmem:[%s5513_s7 + $0x8] sm:$0xff] }
 0x3e0   : > { %2509 = vst [vmem:[#allocation4] sm:$0x3] %v2508_v2  ;;  %vm2516_vm0 = vmand %vm838_vm11, %vm2515_vm13  ;;  %2875 = vmatpush.bf16.msrb.mxu3 %v4116_v60  ;;  %v4107_v35 = vld [vmem:[%s5513_s7 + $0x20] sm:$0xff]  ;;  %v4112_v2 = vld [vmem:[%s5513_s7 + $0x48] sm:$0xff]  ;;  %vm5549_vm1 = vsmask.f32 256 }
 0x3e1   : > { %v2149_v56 = vshll.u32 %v2121_v58, 16  ;;  %vm2517_vm3 = vmor %vm2516_vm0, %vm2514_vm14  ;;  %2512 = vst [vmem:[#allocation4 + $0x2] sm:$0x3] %v2511_v51  ;;  %v4115_v20 = vld [vmem:[%s5513_s7 + $0x60] sm:$0xff]  ;;  %v4149_v39 = vld [vmem:[%s5513_s7 + $0x170] sm:$0xff]  ;;  %vm3306_vm6 = vcmask 458112  }
 0x3e2   : > { %vm5301_vm11 = vmand %vm775_vm5, %vm2513_vm12  ;;  %2749 = vmatpush.bf16.msrb.mxu1 %v4131_v1  ;;  %v4111_v51 = vld [vmem:[%s5513_s7 + $0x40] sm:$0xff]  ;;  %v4161_v19 = vld [vmem:[%s5513_s7 + $0x1d0] sm:$0xff]  ;;  %vm3310_vm12 = vcmask 523712  }
 0x3e3   : > { %v2151_v50 = vsel %vm5209_vm15, %v2144_v54, %v2149_v56  ;;  %v4122_v54 = vld [vmem:[%s5513_s7 + $0x98] sm:$0xff]  ;;  %2863 = vmatpush.bf16.msrb.mxu2 %v4107_v35  ;;  %v4143_v10 = vld [vmem:[%s5513_s7 + $0x140] sm:$0xff]  ;;  %v4152_v1 = vld [vmem:[%s5513_s7 + $0x188] sm:$0xff]  ;;  %vm3302_vm15 = vcmask 392512  }
 0x3e4   : > { %2173 = vst [vmem:[#allocation1 + $0x1] ss:$9 sm:$0xff] %v2151_v50  ;;  %v4130_v56 = vld [vmem:[%s5513_s7 + $0xd8] sm:$0xff]  ;;  %2876 = vmatpush.bf16.msrb.mxu3 %v4115_v20  ;;  %2737 = vmatpush.bf16.msrb.mxu0 %v4122_v54  ;;  %v4151_v35 = vld [vmem:[%s5513_s7 + $0x180] sm:$0xff] }
 0x3e5   : > { %v4159_v20 = vld [vmem:[%s5513_s7 + $0x1c0] sm:$0xff] }
 0x3e6   : > { %2750 = vmatpush.bf16.msrb.mxu1 %v4130_v56 }
 0x3e7   : > { %v2518_v14 = vld [vmem:[#allocation4] sm:$0x3] }
 0x3e8   : > { %v2519_v18 = vsel %vm2517_vm3, 0, %v2518_v14  ;;  %v2521_v15 = vld [vmem:[#allocation4 + $0x2] sm:$0x3]  ;;  %2877 = vmatpush.bf16.msrb.mxu3 %v4114_v16  ;;  %2738 = vmatpush.bf16.msrb.mxu0 %v4121_v11 }
 0x3e9   : > { %2520 = vst [vmem:[#allocation4] sm:$0x3] %v2519_v18  ;;  %v2522_v28 = vsel %vm2517_vm3, 0, %v2521_v15  ;;  %v4103_v14 = vld [vmem:[%s5513_s7] sm:$0xff]  ;;  %v4140_v18 = vld [vmem:[%s5513_s7 + $0x128] sm:$0xff]  ;;  %v4166_v15 = vld [vmem:[%s5513_s7 + $0x1f8] sm:$0xff] }
 0x3ea   : > { %2523 = vst [vmem:[#allocation4 + $0x2] sm:$0x3] %v2522_v28  ;;  %2751 = vmatpush.bf16.msrb.mxu1 %v4129_v0  ;;  %v4139_v28 = vld [vmem:[%s5513_s7 + $0x120] sm:$0xff] }
 0x3eb   : > { %v2174_v55 = vld [vmem:[#allocation1] sm:$0xff] }
 0x3ec   : > { %2232 = vmatmul.bf16.vlgmr.msra.gmra.mxu0 %v2174_v55  ;;  %2237 = vst [vmem:[#allocation1] ss:$9 sm:$0xff] %v2070_v23  ;;  %v4106_v55 = vld [vmem:[%s5513_s7 + $0x18] sm:$0xff] }
 0x3ed   : > { %2239 = vst [vmem:[#allocation1 + $0x1] ss:$9 sm:$0xff] %v2071_v57  ;;  %2864 = vmatpush.bf16.msrb.mxu2 %v4106_v55  ;;  %2739 = vmatpush.bf16.msrb.mxu0 %v4120_v4 }
 0x3f0   : > { %v2546_v48 = vld [vmem:[#allocation4 + $0x1] sm:$0x1] }
 0x3f1   : > { %v2531_v5 = vld [vmem:[#allocation4 + $0x2] sm:$0x1]  ;;  %2740 = vmatpush.bf16.msrb.mxu0 %v4119_v31  ;;  %2865 = vmatpush.bf16.msrb.mxu2 %v4105_v36 }
 0x3f4   : > { %v2240_v13 = vld [vmem:[#allocation1] sm:$0xff] }
 0x3f5   : > { %2298 = vmatmul.bf16.vlgmr.msra.gmra.mxu1 %v2240_v13  ;;  %2320 = vst [vmem:[#allocation1] ss:$9 sm:$0xff] %v2071_v57  ;;  %v4128_v13 = vld [vmem:[%s5513_s7 + $0xc8] sm:$0xff]  ;;  %2866 = vmatpush.bf16.msrb.mxu2 %v4104_v47 }
 0x3f6   : > { %2323 = vst [vmem:[#allocation1 + $0x1] ss:$9 sm:$0xff] %v2072_v7  ;;  %2752 = vmatpush.bf16.msrb.mxu1 %v4128_v13 }
 0x3f9   : > { %2867 = vmatpush.bf16.msrb.mxu2 %v4103_v14 }
 0x3fa   : > { %2753 = vmatpush.bf16.msrb.mxu1 %v4127_v34 }
 0x3fd   : > { %v2324_v3 = vld [vmem:[#allocation1] sm:$0xff] }
 0x3fe   : > { %2382 = vmatmul.bf16.vlgmr.msra.gmra.mxu2 %v2324_v3  ;;  %2428 = vst [vmem:[#allocation1] ss:$9 sm:$0xff] %v2151_v50  ;;  %v4113_v3 = vld [vmem:[%s5513_s7 + $0x50] sm:$0xff] }
 0x3ff   : > { %2431 = vst [vmem:[#allocation1 + $0x1] ss:$9 sm:$0xff] %v2410_v12  ;;  %v4142_v12 = vld [vmem:[%s5513_s7 + $0x138] sm:$0xff]  ;;  %2878 = vmatpush.bf16.msrb.mxu3 %v4113_v3 }
 0x400   : > { %3021 = vmatpush.bf16.msra.mxu0 %v4142_v12 }
 0x403   : > { %2879 = vmatpush.bf16.msrb.mxu3 %v4112_v2 }
 0x406   : > { %v2432_v52 = vld [vmem:[#allocation1] sm:$0xff] }
 0x407   : > { %2490 = vmatmul.bf16.vlgmr.msra.gmra.mxu3 %v2432_v52  ;;  %v4150_v52 = vld [vmem:[%s5513_s7 + $0x178] sm:$0xff] }
 0x408   : > { %3034 = vmatpush.bf16.msra.mxu1 %v4150_v52  ;;  %2880 = vmatpush.bf16.msrb.mxu3 %v4111_v51 }
 0x40c   : > { %3035 = vmatpush.bf16.msra.mxu1 %v4149_v39  ;;  %3199 = vmatpush.bf16.msra.mxu3 %v4166_v15 }
 0x410   : > { %3200 = vmatpush.bf16.msra.mxu3 %v4165_v25 }
 0x414   : > { %3201 = vmatpush.bf16.msra.mxu3 %v4164_v26 }
 0x469   : > { %v2233_v8 = vpop.f32.mrf.mxu0 }
 0x471   : > { %v2235_v33 = vpop.f32.mrf.mxu0 }
 0x472   : > { %v2299_v23 = vpop.f32.mrf.mxu1  ;;  %v4148_v33 = vld [vmem:[%s5513_s7 + $0x168] sm:$0xff] }
 0x473   : > { %v2300_v29 = vadd.f32 %v2299_v23, %v2233_v8  ;;  %v4141_v8 = vld [vmem:[%s5513_s7 + $0x130] sm:$0xff]  ;;  %v4158_v23 = vld [vmem:[%s5513_s7 + $0x1b8] sm:$0xff]  ;;  %3036 = vmatpush.bf16.msra.mxu1 %v4148_v33 }
 0x474   : > { %3022 = vmatpush.bf16.msra.mxu0 %v4141_v8  ;;  %3186 = vmatpush.bf16.msra.mxu2 %v4158_v23 }
 0x478   : > { %3023 = vmatpush.bf16.msra.mxu0 %v4140_v18 }
 0x47a   : > { %v2301_v9 = vpop.f32.mrf.mxu1 }
 0x47b   : > { %v4147_v9 = vld [vmem:[%s5513_s7 + $0x160] sm:$0xff] }
 0x47c   : > { %3024 = vmatpush.bf16.msra.mxu0 %v4139_v28  ;;  %3037 = vmatpush.bf16.msra.mxu1 %v4147_v9 }
 0x480   : > { %3025 = vmatpush.bf16.msra.mxu0 %v4138_v41  ;;  %3038 = vmatpush.bf16.msra.mxu1 %v4146_v22 }
 0x481   : > { %v2383_v40 = vpop.f32.mrf.mxu2 }
 0x482   : > { %v2387_v45 = vadd.f32 %v2383_v40, %v2300_v29  ;;  %v4157_v40 = vld [vmem:[%s5513_s7 + $0x1b0] sm:$0xff]  ;;  %v4156_v29 = vld [vmem:[%s5513_s7 + $0x1a8] sm:$0xff] }
 0x483   : > { %3187 = vmatpush.bf16.msra.mxu2 %v4157_v40  ;;  %v3213_v40 = vld [vmem:[%s5514_s8] sm:$0x1] }
 0x484   : > { %3026 = vmatpush.bf16.msra.mxu0 %v4137_v46  ;;  %3039 = vmatpush.bf16.msra.mxu1 %v4145_v49 }
 0x487   : > { %3188 = vmatpush.bf16.msra.mxu2 %v4156_v29 }
 0x488   : > { %3040 = vmatpush.bf16.msra.mxu1 %v4144_v6 }
 0x489   : > { %v2385_v38 = vpop.f32.mrf.mxu2 }
 0x48a   : > { %v2491_v53 = vpop.f32.mrf.mxu3  ;;  %v4163_v38 = vld [vmem:[%s5513_s7 + $0x1e0] sm:$0xff] }
 0x48b   : > { %v2495_v44 = vadd.f32 %v2491_v53, %v2387_v45  ;;  %v4155_v45 = vld [vmem:[%s5513_s7 + $0x1a0] sm:$0xff]  ;;  %3202 = vmatpush.bf16.msra.mxu3 %v4163_v38  ;;  %v4162_v53 = vld [vmem:[%s5513_s7 + $0x1d8] sm:$0xff] }
 0x48c   : > { %3189 = vmatpush.bf16.msra.mxu2 %v4155_v45  ;;  %3041 = vmatpush.bf16.msra.mxu1 %v4143_v10 }
 0x48d   : > { %v2500_v57 = vadd.f32 %v4219_v63, %v2495_v44  ;;  %v4136_v63 = vld [vmem:[%s5513_s7 + $0x108] sm:$0xff] }
 0x48e   : > { %3027 = vmatpush.bf16.msra.mxu0 %v4136_v63 }
 0x48f   : > { %v2501_v37 = vmul.f32 0.2, %v2500_v57  ;;  %3203 = vmatpush.bf16.msra.mxu3 %v4162_v53 }
 0x490   : > { %3190 = vmatpush.bf16.msra.mxu2 %v4154_v27 }
 0x491   : > { %v2502_v59 = vmax.f32 %v2500_v57, %v2501_v37  ;;  %v4153_v57 = vld [vmem:[%s5513_s7 + $0x190] sm:$0xff] }
 0x492   : > { %v2493_v58 = vpop.f32.mrf.mxu3  ;;  %3028 = vmatpush.bf16.msra.mxu0 %v4135_v30 }
 0x493   : > { %v2524_v43 = vpack.c.bf16 %v2502_v59, %v2502_v59  ;;  %3204 = vmatpush.bf16.msra.mxu3 %v4161_v19  ;;  %v4160_v59 = vld [vmem:[%s5513_s7 + $0x1c8] sm:$0xff] }
 0x494   : > { %3191 = vmatpush.bf16.msra.mxu2 %v4153_v57 }
 0x495   : > { %2526 = vst [vmem:[#allocation1] sm:$0xff] %v2524_v43  ;;  %v2547_v50 = vsel %vm5301_vm11, %v2524_v43, %v2546_v48  ;;  %v2550_v7 = vrot.slane %v2524_v43, 3 }
 0x496   : > { %2548 = vst [vmem:[#allocation4 + $0x1] sm:$0x1] %v2547_v50 }
 0x497   : > { %v2552_v62 = vsel %vm834_vm10, %v2524_v43, %v2550_v7  ;;  %vm2541_vm10 = vcmask 1040896   ;;  %3205 = vmatpush.bf16.msra.mxu3 %v4160_v59 }
 0x498   : > { %2554 = vrot.lane.b32.xlu0 %v2552_v62, %s4287_s28  ;;  %vm5433_vm2 = vmand %vm2541_vm10, %vm5549_vm1  ;;  %3192 = vmatpush.bf16.msra.mxu2 %v4152_v1 }
 0x49b   : > { %3206 = vmatpush.bf16.msra.mxu3 %v4159_v20 }
 0x49c   : > { %v2528_v42 = vld [vmem:[#allocation1 + $0x1] ss:$4 sm:$0xff]  ;;  %3193 = vmatpush.bf16.msra.mxu2 %v4151_v35 }
 0x49d   : > { %2534 = vst [vmem:[#allocation1] sm:$0xff] %v2524_v43  ;;  %v2532_v21 = vsel %vm5301_vm11, %v2528_v42, %v2531_v5  ;;  %v2557_v37 = vld [vmem:[#allocation4 + $0x1] sm:$0x1] }
 0x49e   : > { %2533 = vst [vmem:[#allocation4 + $0x2] sm:$0x1] %v2532_v21 }
 0x4a4   : > { %v2536_v32 = vld [vmem:[#allocation1 + $0x1] ss:$4 sm:$0xff] }
 0x4a5   : > { %2538 = vrot.lane.b32.xlu1 %v2536_v32, %s4287_s28  ;;  %v2543_v58 = vld [vmem:[#allocation4 + $0x2] sm:$0x1]  ;;  %s323_s28 = sand.u32 1, %s4274_s10  }
 0x4a6   : > { %s324_s23 = scalar_lea.vmem [#allocation5], %s323_s28  ;;  %s3316_s13 = scalar_lea.sflag [#allocation6], %s323_s28 }
 0x4a7   : > { %s3326_s24 = sshll.u32 %s324_s23, 4  ;;  %s3327_s24 = int_to_ptr.vmem [resolvable:$true] %s3326_s24 }
 0x50a   : > { %v2555_v60 = vpop.permute.xlu0 %2554 }
 0x50b   : > { %v2558_v61 = vsel %vm5433_vm2, %v2555_v60, %v2557_v37 }
 0x50c   : > { %2559 = vst [vmem:[#allocation4 + $0x1] sm:$0x1] %v2558_v61 }
 0x513   : > { %v2560_v24 = vld [vmem:[#allocation4] sm:$0x3] }
 0x514   : > { %2628 = vst [vmem:[#allocation1] ss:$9 sm:$0xff] %v2560_v24 }
 0x517   : > { %v2539_v48 = vpop.permute.xlu1 %2538 }
 0x518   : > { %v2544_v43 = vsel %vm5433_vm2, %v2539_v48, %v2543_v58 }
 0x519   : > { %2545 = vst [vmem:[#allocation4 + $0x2] sm:$0x1] %v2544_v43 }
 0x51b   : > { %v2629_v54 = vld [vmem:[#allocation1] sm:$0xff]  ;;  %v2630_v56 = vld [vmem:[#allocation1 + $0x9] sm:$0xff] }
 0x51c   : > { %v2631_v50 = vshrl.u32 %v2629_v54, 16  ;;  %v2633_v7 = vshrl.u32 %v2630_v56, 16  ;;  %2759 = vst [vmem:[#allocation1] ss:$9 sm:$0xff] %v2560_v24 }
 0x51e   : > { %2741 = vmatmul.bf16.vlgmr.msrb.gmra.mxu0 %v2631_v50  ;;  %2754 = vmatmul.bf16.vlgmr.msrb.gmra.mxu1 %v2633_v7 }
 0x520   : > { %v2561_v55 = vld [vmem:[#allocation4 + $0x2] sm:$0x3] }
 0x523   : > { %v2760_v16 = vld [vmem:[#allocation1] sm:$0xff]  ;;  %v2761_v62 = vld [vmem:[#allocation1 + $0x9] sm:$0xff] }
 0x524   : > { %2868 = vmatmul.bf16.vlgmr.msrb.gmra.mxu2 %v2760_v16  ;;  %2881 = vmatmul.bf16.vlgmr.msrb.gmra.mxu3 %v2761_v62  ;;  %2920 = vst [vmem:[#allocation1] ss:$9 sm:$0xff] %v2561_v55 }
 0x52b   : > { %v2921_v11 = vld [vmem:[#allocation1] sm:$0xff]  ;;  %v2922_v0 = vld [vmem:[#allocation1 + $0x9] sm:$0xff] }
 0x52c   : > { %3081 = vst [vmem:[#allocation1] ss:$9 sm:$0xff] %v2561_v55 }
 0x52e   : > { %3029 = vmatmul.bf16.vlgmr.msra.gmra.mxu0 %v2921_v11  ;;  %3042 = vmatmul.bf16.vlgmr.msra.gmra.mxu1 %v2922_v0 }
 0x533   : > { %v3082_v5 = vld [vmem:[#allocation1] sm:$0xff]  ;;  %v3083_v4 = vld [vmem:[#allocation1 + $0x9] sm:$0xff] }
 0x534   : > { %v3084_v13 = vshrl.u32 %v3082_v5, 16  ;;  %v3086_v42 = vshrl.u32 %v3083_v4, 16 }
 0x536   : > { %3194 = vmatmul.bf16.vlgmr.msra.gmra.mxu2 %v3084_v13  ;;  %3207 = vmatmul.bf16.vlgmr.msra.gmra.mxu3 %v3086_v42 }
 0x59b   : > { %v2742_v21 = vpop.f32.mrf.mxu0  ;;  %v2755_v32 = vpop.f32.mrf.mxu1 }
 0x59c   : > { %v2756_v8 = vadd.f32 %v2755_v32, %v2742_v21 }
 0x5a3   : > { %v2744_v31 = vpop.f32.mrf.mxu0  ;;  %v2757_v34 = vpop.f32.mrf.mxu1 }
 0x5a7   : > { %v2869_v36 = vpop.f32.mrf.mxu2  ;;  %v2882_v3 = vpop.f32.mrf.mxu3 }
 0x5a8   : > { %v2870_v51 = vadd.f32 %v2869_v36, %v2756_v8 }
 0x5aa   : > { %v2883_v33 = vadd.f32 %v2882_v3, %v2870_v51 }
 0x5ab   : > { %v3030_v12 = vpop.f32.mrf.mxu0  ;;  %v3043_v52 = vpop.f32.mrf.mxu1 }
 0x5ac   : > { %v3044_v18 = vadd.f32 %v3043_v52, %v3030_v12 }
 0x5ae   : > { %v3047_v28 = vadd.f32 %v3044_v18, %v2883_v33 }
 0x5af   : > { %v2871_v47 = vpop.f32.mrf.mxu2  ;;  %v2884_v2 = vpop.f32.mrf.mxu3 }
 0x5b3   : > { %v3032_v39 = vpop.f32.mrf.mxu0  ;;  %v3045_v14 = vpop.f32.mrf.mxu1 }
 0x5b9   : > { %v3195_v23 = vpop.f32.mrf.mxu2  ;;  %v3208_v15 = vpop.f32.mrf.mxu3 }
 0x5ba   : > { %v3209_v9 = vadd.f32 %v3208_v15, %v3195_v23 }
 0x5bc   : > { %v3212_v25 = vadd.f32 %v3209_v9, %v3047_v28 }
 0x5be   : > { %v3214_v41 = vadd.f32 %v3213_v40, %v3212_v25 }
 0x5c0   : > { %v3215_v22 = vmul.f32 0.2, %v3214_v41 }
 0x5c1   : > { %v3197_v29 = vpop.f32.mrf.mxu2  ;;  %v3210_v26 = vpop.f32.mrf.mxu3 }
 0x5c2   : > { %v3216_v46 = vmax.f32 %v3214_v41, %v3215_v22 }
 0x5c4   : > { %3217 = vxpose.xlu2.b32.start.end [1/1] (short) (narrow) %v3216_v46, 64 }
 0x626   : > { %4216 = vset.pattern.permute.xlu2 %v4289_v17  ;;  %v3281_v17 = vlaneseq }
 0x628   : > { %v3282_v60 = vand.u32 127, %v3281_v17 }
 0x62a   : > { %v3284_v37 = vadd.s32 4294967288, %v3282_v60  ;;  %v3288_v61 = vadd.s32 4294967280, %v3282_v60  ;;  %v3292_v1 = vadd.s32 4294967272, %v3282_v60  ;;  %v3296_v35 = vadd.s32 4294967264, %v3282_v60 }
 0x62b   : > { %v3300_v24 = vadd.s32 4294967256, %v3282_v60  ;;  %v3308_v56 = vadd.s32 4294967240, %v3282_v60  ;;  %v3304_v7 = vadd.s32 4294967248, %v3282_v60 }
 0x65d   : > { %v3233_v49 = vpop.trf.xlu2 }
 0x65e   : > { %3258 = vperm.xlu0 %4214, %v3233_v49  }
 0x665   : > { %v3234_v45 = vpop.trf.xlu2 }
 0x666   : > { %3261 = vperm.xlu1 %4215, %v3234_v45  }
 0x66d   : > { %v3235_v38 = vpop.trf.xlu2 }
 0x66e   : > { %3264 = vperm.xlu1 %4215, %v3235_v38  }
 0x675   : > { %v3236_v63 = vpop.trf.xlu2 }
 0x676   : > { %3267 = vperm.xlu0 %4214, %v3236_v63  }
 0x67d   : > { %v3237_v6 = vpop.trf.xlu2 }
 0x67e   : > { %3270 = vperm.xlu1 %4215, %v3237_v6  }
 0x685   : > { %v3238_v27 = vpop.trf.xlu2 }
 0x686   : > { %3273 = vperm.xlu0 %4214, %v3238_v27  }
 0x68d   : > { %v3239_v53 = vpop.trf.xlu2 }
 0x68e   : > { %3276 = vperm.xlu1 %4215, %v3239_v53  }
 0x695   : > { %v3240_v44 = vpop.trf.xlu2 }
 0x696   : > { %3279 = vperm.xlu2 %4216, %v3240_v44  }
 0x6d0   : > { %v3259_v10 = vpop.permute.xlu0 %3258 }
 0x6d1   : > { %v3283_v43 = vperm.slane %v3259_v10, %v3282_v60 }
 0x6d8   : > { %v3262_v30 = vpop.permute.xlu1 %3261 }
 0x6d9   : > { %v3285_v20 = vperm.slane %v3262_v30, %v3284_v37 }
 0x6db   : > { %v3287_v16 = vsel %vm3286_vm8, %v3285_v20, %v3283_v43 }
 0x6e0   : > { %v3265_v57 = vpop.permute.xlu1 %3264 }
 0x6e1   : > { %v3289_v48 = vperm.slane %v3265_v57, %v3288_v61 }
 0x6e3   : > { %v3291_v11 = vsel %vm3290_vm4, %v3289_v48, %v3287_v16 }
 0x6e8   : > { %v3268_v19 = vpop.permute.xlu0 %3267 }
 0x6e9   : > { %v3293_v54 = vperm.slane %v3268_v19, %v3292_v1 }
 0x6eb   : > { %v3295_v0 = vsel %vm3294_vm7, %v3293_v54, %v3291_v11 }
 0x6f0   : > { %v3271_v59 = vpop.permute.xlu1 %3270  ;;  %v3280_v55 = vpop.permute.xlu2 %3279 }
 0x6f1   : > { %v3297_v50 = vperm.slane %v3271_v59, %v3296_v35  ;;  %v3309_v4 = vperm.slane %v3280_v55, %v3308_v56 }
 0x6f3   : > { %v3299_v13 = vsel %vm3298_vm9, %v3297_v50, %v3295_v0 }
 0x6f8   : > { %v3274_v58 = vpop.permute.xlu0 %3273 }
 0x6f9   : > { %v3301_v62 = vperm.slane %v3274_v58, %v3300_v24 }
 0x6fb   : > { %v3303_v21 = vsel %vm3302_vm15, %v3301_v62, %v3299_v13 }
 0x700   : > { %v3277_v5 = vpop.permute.xlu1 %3276 }
 0x701   : > { %v3305_v42 = vperm.slane %v3277_v5, %v3304_v7 }
 0x703   : > { %v3307_v32 = vsel %vm3306_vm6, %v3305_v42, %v3303_v21 }
 0x704   : > { %v3311_v31 = vsel %vm3310_vm12, %v3309_v4, %v3307_v32 }
 0x705   : > { %3314 = vst.msk [vmem:[%s324_s23] sm:$0x1] %vm775_vm5, %v3311_v31 }
 0x706   : > { %4247 = shalt.err (!%p4244_p3)
}
 0x707   : > { %4168 = dma.vmem_to_hbm [thread:$0]  (%p4378_p5), %s3327_s24, 16, %s3329_s26, %s3316_s13  }
 0x708 PF: > { %p4174_p4 = scmp.ge.s32.totalorder %s4282_s12, 2  ;;  %s3340_s28 = sand.u32 1, %s4270_s30  }
 0x709   : > { %s3341_s22 = scalar_lea.sflag [#allocation6], %s3340_s28 }
 0x70a   : > { %p4171_p7 = pnand %p4174_p4, %p4382_p6 }
 0x70c   : > { %p4172_p8 = pneg %p4171_p7 }
 0x70e   : > { %4265 = dma.done.wait (%p4172_p8), %s3341_s22, 16  }
 0x70f   : > { %4267 = vsyncadd (%p4172_p8), %s3341_s22, 4294967280  ;;  %p19_p9 = scmp.ge.s32.totalorder %s4365_s15, 4   ;;  %s5552_s30 = smov %s4274_s10 }
 0x710   : > { %s5553_s10 = smov %s4278_s11  ;;  %s5554_s11 = smov %s4376_s18 }
 0x711   : > { %s5555_s12 = smov %s4365_s15  ;;  %21 = sbr.rel (!%p19_p9) target bundleno = 3 (0x3), region = 154 }
 0x716   :  { %3346 = vsyncpa [#allocation6], 1 }
 0x717   :  { %3348 = vsyncpa [#allocation6 + $0x1], 1 }

</bundles_post_ra>
